<compile_context>
chip_gen: v6e
topology: v6e:2x2x1
jax: 0.10.0
libtpu: 0.0.40
codegen_flags: <defaults>
</compile_context>

<pallas_src>
import jax
import jax.numpy as jnp
from jax.experimental import pallas as pl
from jax.experimental.pallas import tpu as pltpu

BN_EPS = 1e-5


# --------------- Conv + BatchNorm(train) + ReLU kernel -----------------------
# pt_ref:    (B, K, S)  transposed im2col patches, K = Cin*KH*KW, S = OH*OW
# wt_ref:    (Cout, K)  = PyTorch OIHW weight reshaped
# gamma/beta:(Cout, 1)
# o_ref:     (B, Cout, S)  channel-major output (lane-dense along S)

def _conv_bn_relu_kernel(pt_ref, wt_ref, gamma_ref, beta_ref, o_ref):
    B = pt_ref.shape[0]
    S = pt_ref.shape[2]
    # Per-batch MXU matmuls, output channel-major (Cout, S).
    ys = [jnp.dot(wt_ref[...], pt_ref[b], preferred_element_type=jnp.float32)
          for b in range(B)]
    # BatchNorm2d training-mode statistics: biased stats over (N, H, W).
    cnt = float(B * S)
    mean = sum(y.sum(axis=1, keepdims=True) for y in ys) / cnt          # (Cout,1)
    var = sum(((y - mean) ** 2).sum(axis=1, keepdims=True) for y in ys) / cnt
    scale = gamma_ref[...] * jax.lax.rsqrt(var + BN_EPS)                # (Cout,1)
    shift = beta_ref[...] - mean * scale
    for b in range(B):
        o_ref[b] = jnp.maximum(ys[b] * scale + shift, 0.0)              # ReLU


def _im2col_nchw_t(xp, kh, kw):
    """Channel-major transposed im2col.

    xp: (B, C, Hp, Wp) spatially padded input.
    Returns pt (B, C*kh*kw, OH*OW) with k ordered (ci, kh, kw), matching a
    PyTorch OIHW weight reshaped to (Cout, Cin*KH*KW).
    """
    B, C, Hp, Wp = xp.shape
    oh, ow = Hp - kh + 1, Wp - kw + 1
    slabs = []
    for i in range(kh):
        for j in range(kw):
            slabs.append(xp[:, :, i:i + oh, j:j + ow].reshape(B, C, 1, oh * ow))
    pt = jnp.concatenate(slabs, axis=2)              # (B, C, kh*kw, OH*OW)
    return pt.reshape(B, C * kh * kw, oh * ow), oh, ow


def conv_bn_relu(pt, w_oihw, gamma, beta):
    B, K, S = pt.shape
    Cout = w_oihw.shape[0]
    wt = w_oihw.reshape(Cout, K)
    vmem = lambda: pl.BlockSpec(memory_space=pltpu.MemorySpace.VMEM)
    return pl.pallas_call(
        _conv_bn_relu_kernel,
        out_shape=jax.ShapeDtypeStruct((B, Cout, S), jnp.float32),
        in_specs=[vmem() for _ in range(4)],
        out_specs=vmem(),
    )(pt, wt, gamma.reshape(Cout, 1), beta.reshape(Cout, 1))


# --------------- fc1 (+ReLU) and fc2, single-shot kernel ---------------------
# x_ref: (B, K) channel-major flatten; w1t_ref: (H1, K) lane-dense (PyTorch
# Linear layout); contraction is lane-vs-lane via dot_general.

def _mlp_kernel(x_ref, w1t_ref, b1_ref, w2_ref, b2_ref, o_ref):
    h = jax.lax.dot_general(
        x_ref[...], w1t_ref[...],
        dimension_numbers=(((1,), (1,)), ((), ())),
        preferred_element_type=jnp.float32)                     # (B, H1)
    h = jnp.maximum(h + b1_ref[...], 0.0)                       # fc1 + ReLU
    o_ref[...] = jnp.dot(h, w2_ref[...],
                         preferred_element_type=jnp.float32) + b2_ref[...]


def mlp(x2d, w1t, b1, w2, b2):
    B = x2d.shape[0]
    H1 = w1t.shape[0]
    NC = w2.shape[1]
    vmem = lambda: pl.BlockSpec(memory_space=pltpu.MemorySpace.VMEM)
    return pl.pallas_call(
        _mlp_kernel,
        out_shape=jax.ShapeDtypeStruct((B, NC), jnp.float32),
        in_specs=[vmem() for _ in range(5)],
        out_specs=vmem(),
    )(x2d, w1t, b1.reshape(1, H1), w2, b2.reshape(1, NC))


# --------------- parameters & forward ----------------------------------------

def init_params(key, in_channels, num_classes):
    ks = jax.random.split(key, 8)
    p = {}
    # Conv weights in PyTorch OIHW layout. Conv biases are omitted: training-mode
    # BatchNorm subtracts the per-channel mean, cancelling any per-channel bias.
    p["w1"] = 0.1 * jax.random.normal(ks[0], (16, in_channels, 2, 4), jnp.float32)
    p["g1"] = 1.0 + 0.1 * jax.random.normal(ks[1], (16,), jnp.float32)
    p["beta1"] = 0.1 * jax.random.normal(ks[2], (16,), jnp.float32)
    p["w2"] = 0.1 * jax.random.normal(ks[3], (32, 16, 2, 4), jnp.float32)
    p["g2"] = 1.0 + 0.1 * jax.random.normal(ks[4], (32,), jnp.float32)
    p["beta2"] = 0.1 * jax.random.normal(ks[5], (32,), jnp.float32)
    fan_in = 32 * 30 * 26                                        # 24960
    # fc1 weight in PyTorch Linear layout (out_features, in_features) = (16, K):
    # exactly the lane-dense layout the kernel wants.
    p["fc1_w"] = jax.random.normal(ks[6], (16, fan_in), jnp.float32) / jnp.sqrt(
        jnp.float32(fan_in))
    p["fc1_b"] = jnp.zeros((16,), jnp.float32)
    p["fc2_w"] = jax.random.normal(ks[7], (16, num_classes), jnp.float32) / 4.0
    p["fc2_b"] = jnp.zeros((num_classes,), jnp.float32)
    return p


@jax.jit
def net22_2_forward(x_nchw, params):
    B = x_nchw.shape[0]
    # layer1: Conv2d(in,16,(2,4),1,1) + BN + ReLU
    xp1 = jnp.pad(x_nchw, ((0, 0), (0, 0), (1, 1), (1, 1)))
    pt1, OH1, OW1 = _im2col_nchw_t(xp1, 2, 4)
    y1 = conv_bn_relu(pt1, params["w1"], params["g1"], params["beta1"])   # (B,16,OH1*OW1)
    # layer2: Conv2d(16,32,(2,4),1,1) + BN + ReLU
    x2 = y1.reshape(B, 16, OH1, OW1)
    xp2 = jnp.pad(x2, ((0, 0), (0, 0), (1, 1), (1, 1)))
    pt2, OH2, OW2 = _im2col_nchw_t(xp2, 2, 4)
    y2 = conv_bn_relu(pt2, params["w2"], params["g2"], params["beta2"])   # (B,32,OH2*OW2)
    # x.view(B, -1): output is already channel-major, so the flatten is free.
    x_flat = y2.reshape(B, 32 * OH2 * OW2)                                # (B, 24960)
    return mlp(x_flat, params["fc1_w"], params["fc1_b"],
               params["fc2_w"], params["fc2_b"])


if __name__ == "__main__":
    in_channels, num_classes = 4, 10
    key = jax.random.PRNGKey(0)
    kx, kp = jax.random.split(key)
    # fc1's 32*30*26 input size implies a 28x28 spatial input.
    x = jax.random.normal(kx, (2, in_channels, 28, 28), jnp.float32)
    params = init_params(kp, in_channels, num_classes)
    out = net22_2_forward(x, params)
    out = jax.block_until_ready(out)
    assert out.shape == (2, num_classes)
    assert bool(jnp.all(jnp.isfinite(out)))
    print("KERNEL_OK")
</pallas_src>

<mosaic_0001>
module attributes {stable_mosaic.version = 11 : i64} {
  func.func @_conv_bn_relu_kernel(%arg0: memref<2x32x783xf32, #tpu.memory_space<vmem>>, %arg1: memref<16x32xf32, #tpu.memory_space<vmem>>, %arg2: memref<16x1xf32, #tpu.memory_space<vmem>>, %arg3: memref<16x1xf32, #tpu.memory_space<vmem>>, %arg4: memref<2x16x783xf32, #tpu.memory_space<vmem>>) attributes {dimension_semantics = [], scalar_prefetch = 0 : i64, scratch_operands = 0 : i64, tpu.core_type = #tpu.core_type<tc>} {
    %c0 = arith.constant 0 : index
    %c0_0 = arith.constant 0 : index
    %0 = vector.load %arg1[%c0, %c0_0] : memref<16x32xf32, #tpu.memory_space<vmem>>, vector<16x32xf32>
    %c0_1 = arith.constant 0 : index
    %c0_2 = arith.constant 0 : index
    %c0_3 = arith.constant 0 : index
    %1 = vector.load %arg0[%c0_1, %c0_2, %c0_3] : memref<2x32x783xf32, #tpu.memory_space<vmem>>, vector<1x32x783xf32>
    %2 = vector.shape_cast %1 : vector<1x32x783xf32> to vector<32x783xf32>
    %cst = arith.constant dense<0.000000e+00> : vector<16x783xf32>
    %3 = tpu.matmul %0, %2, %cst {dimension_numbers = #tpu.dot_dimension_numbers<[1], [0], [0], [1], [0, 0, 1, 1], [], []>} : vector<16x32xf32>, vector<32x783xf32>, vector<16x783xf32> -> vector<16x783xf32>
    %c0_4 = arith.constant 0 : index
    %c0_5 = arith.constant 0 : index
    %4 = vector.load %arg1[%c0_4, %c0_5] : memref<16x32xf32, #tpu.memory_space<vmem>>, vector<16x32xf32>
    %c1 = arith.constant 1 : index
    %c0_6 = arith.constant 0 : index
    %c0_7 = arith.constant 0 : index
    %5 = vector.load %arg0[%c1, %c0_6, %c0_7] : memref<2x32x783xf32, #tpu.memory_space<vmem>>, vector<1x32x783xf32>
    %6 = vector.shape_cast %5 : vector<1x32x783xf32> to vector<32x783xf32>
    %cst_8 = arith.constant dense<0.000000e+00> : vector<16x783xf32>
    %7 = tpu.matmul %4, %6, %cst_8 {dimension_numbers = #tpu.dot_dimension_numbers<[1], [0], [0], [1], [0, 0, 1, 1], [], []>} : vector<16x32xf32>, vector<32x783xf32>, vector<16x783xf32> -> vector<16x783xf32>
    %cst_9 = arith.constant dense<0.000000e+00> : vector<16xf32>
    %8 = vector.multi_reduction <add>, %3, %cst_9 [1] : vector<16x783xf32> to vector<16xf32>
    %9 = vector.shape_cast %8 : vector<16xf32> to vector<16x1xf32>
    %cst_10 = arith.constant 0.000000e+00 : f32
    %10 = vector.broadcast %cst_10 : f32 to vector<16x1xf32>
    %11 = arith.addf %10, %9 : vector<16x1xf32>
    %cst_11 = arith.constant dense<0.000000e+00> : vector<16xf32>
    %12 = vector.multi_reduction <add>, %7, %cst_11 [1] : vector<16x783xf32> to vector<16xf32>
    %13 = vector.shape_cast %12 : vector<16xf32> to vector<16x1xf32>
    %14 = arith.addf %11, %13 : vector<16x1xf32>
    %cst_12 = arith.constant 1.566000e+03 : f32
    %15 = vector.broadcast %cst_12 : f32 to vector<16x1xf32>
    %16 = arith.divf %14, %15 : vector<16x1xf32>
    %17 = vector.broadcast %16 : vector<16x1xf32> to vector<16x783xf32>
    %18 = arith.subf %3, %17 : vector<16x783xf32>
    %19 = arith.mulf %18, %18 : vector<16x783xf32>
    %cst_13 = arith.constant dense<0.000000e+00> : vector<16xf32>
    %20 = vector.multi_reduction <add>, %19, %cst_13 [1] : vector<16x783xf32> to vector<16xf32>
    %21 = vector.shape_cast %20 : vector<16xf32> to vector<16x1xf32>
    %cst_14 = arith.constant 0.000000e+00 : f32
    %22 = vector.broadcast %cst_14 : f32 to vector<16x1xf32>
    %23 = arith.addf %22, %21 : vector<16x1xf32>
    %24 = vector.broadcast %16 : vector<16x1xf32> to vector<16x783xf32>
    %25 = arith.subf %7, %24 : vector<16x783xf32>
    %26 = arith.mulf %25, %25 : vector<16x783xf32>
    %cst_15 = arith.constant dense<0.000000e+00> : vector<16xf32>
    %27 = vector.multi_reduction <add>, %26, %cst_15 [1] : vector<16x783xf32> to vector<16xf32>
    %28 = vector.shape_cast %27 : vector<16xf32> to vector<16x1xf32>
    %29 = arith.addf %23, %28 : vector<16x1xf32>
    %cst_16 = arith.constant 1.566000e+03 : f32
    %30 = vector.broadcast %cst_16 : f32 to vector<16x1xf32>
    %31 = arith.divf %29, %30 : vector<16x1xf32>
    %c0_17 = arith.constant 0 : index
    %c0_18 = arith.constant 0 : index
    %32 = vector.load %arg2[%c0_17, %c0_18] : memref<16x1xf32, #tpu.memory_space<vmem>>, vector<16x1xf32>
    %cst_19 = arith.constant 9.99999974E-6 : f32
    %33 = vector.broadcast %cst_19 : f32 to vector<16x1xf32>
    %34 = arith.addf %31, %33 : vector<16x1xf32>
    %35 = math.rsqrt %34 : vector<16x1xf32>
    %36 = arith.mulf %32, %35 : vector<16x1xf32>
    %c0_20 = arith.constant 0 : index
    %c0_21 = arith.constant 0 : index
    %37 = vector.load %arg3[%c0_20, %c0_21] : memref<16x1xf32, #tpu.memory_space<vmem>>, vector<16x1xf32>
    %38 = arith.mulf %16, %36 : vector<16x1xf32>
    %39 = arith.subf %37, %38 : vector<16x1xf32>
    %40 = vector.broadcast %36 : vector<16x1xf32> to vector<16x783xf32>
    %41 = arith.mulf %3, %40 : vector<16x783xf32>
    %42 = vector.broadcast %39 : vector<16x1xf32> to vector<16x783xf32>
    %43 = arith.addf %41, %42 : vector<16x783xf32>
    %cst_22 = arith.constant 0.000000e+00 : f32
    %44 = vector.broadcast %cst_22 : f32 to vector<16x783xf32>
    %45 = arith.maximumf %43, %44 : vector<16x783xf32>
    %c0_23 = arith.constant 0 : index
    %c0_24 = arith.constant 0 : index
    %c0_25 = arith.constant 0 : index
    %46 = vector.load %arg4[%c0_23, %c0_24, %c0_25] : memref<2x16x783xf32, #tpu.memory_space<vmem>>, vector<1x16x783xf32>
    %47 = vector.shape_cast %46 : vector<1x16x783xf32> to vector<16x783xf32>
    %48 = vector.shape_cast %45 : vector<16x783xf32> to vector<1x16x783xf32>
    tpu.vector_store %arg4[%c0_23, %c0_24, %c0_25], %48 {strides = array<i32>} : memref<2x16x783xf32, #tpu.memory_space<vmem>>, vector<1x16x783xf32>,
    %49 = vector.broadcast %36 : vector<16x1xf32> to vector<16x783xf32>
    %50 = arith.mulf %7, %49 : vector<16x783xf32>
    %51 = vector.broadcast %39 : vector<16x1xf32> to vector<16x783xf32>
    %52 = arith.addf %50, %51 : vector<16x783xf32>
    %cst_26 = arith.constant 0.000000e+00 : f32
    %53 = vector.broadcast %cst_26 : f32 to vector<16x783xf32>
    %54 = arith.maximumf %52, %53 : vector<16x783xf32>
    %c1_27 = arith.constant 1 : index
    %c0_28 = arith.constant 0 : index
    %c0_29 = arith.constant 0 : index
    %55 = vector.load %arg4[%c1_27, %c0_28, %c0_29] : memref<2x16x783xf32, #tpu.memory_space<vmem>>, vector<1x16x783xf32>
    %56 = vector.shape_cast %55 : vector<1x16x783xf32> to vector<16x783xf32>
    %57 = vector.shape_cast %54 : vector<16x783xf32> to vector<1x16x783xf32>
    tpu.vector_store %arg4[%c1_27, %c0_28, %c0_29], %57 {strides = array<i32>} : memref<2x16x783xf32, #tpu.memory_space<vmem>>, vector<1x16x783xf32>,
    return
  }
}

module attributes {stable_mosaic.version = 11 : i64} {
  func.func @_conv_bn_relu_kernel(%arg0: memref<2x128x780xf32, #tpu.memory_space<vmem>>, %arg1: memref<32x128xf32, #tpu.memory_space<vmem>>, %arg2: memref<32x1xf32, #tpu.memory_space<vmem>>, %arg3: memref<32x1xf32, #tpu.memory_space<vmem>>, %arg4: memref<2x32x780xf32, #tpu.memory_space<vmem>>) attributes {dimension_semantics = [], scalar_prefetch = 0 : i64, scratch_operands = 0 : i64, tpu.core_type = #tpu.core_type<tc>} {
    %c0 = arith.constant 0 : index
    %c0_0 = arith.constant 0 : index
    %0 = vector.load %arg1[%c0, %c0_0] : memref<32x128xf32, #tpu.memory_space<vmem>>, vector<32x128xf32>
    %c0_1 = arith.constant 0 : index
    %c0_2 = arith.constant 0 : index
    %c0_3 = arith.constant 0 : index
    %1 = vector.load %arg0[%c0_1, %c0_2, %c0_3] : memref<2x128x780xf32, #tpu.memory_space<vmem>>, vector<1x128x780xf32>
    %2 = vector.shape_cast %1 : vector<1x128x780xf32> to vector<128x780xf32>
    %cst = arith.constant dense<0.000000e+00> : vector<32x780xf32>
    %3 = tpu.matmul %0, %2, %cst {dimension_numbers = #tpu.dot_dimension_numbers<[1], [0], [0], [1], [0, 0, 1, 1], [], []>} : vector<32x128xf32>, vector<128x780xf32>, vector<32x780xf32> -> vector<32x780xf32>
    %c0_4 = arith.constant 0 : index
    %c0_5 = arith.constant 0 : index
    %4 = vector.load %arg1[%c0_4, %c0_5] : memref<32x128xf32, #tpu.memory_space<vmem>>, vector<32x128xf32>
    %c1 = arith.constant 1 : index
    %c0_6 = arith.constant 0 : index
    %c0_7 = arith.constant 0 : index
    %5 = vector.load %arg0[%c1, %c0_6, %c0_7] : memref<2x128x780xf32, #tpu.memory_space<vmem>>, vector<1x128x780xf32>
    %6 = vector.shape_cast %5 : vector<1x128x780xf32> to vector<128x780xf32>
    %cst_8 = arith.constant dense<0.000000e+00> : vector<32x780xf32>
    %7 = tpu.matmul %4, %6, %cst_8 {dimension_numbers = #tpu.dot_dimension_numbers<[1], [0], [0], [1], [0, 0, 1, 1], [], []>} : vector<32x128xf32>, vector<128x780xf32>, vector<32x780xf32> -> vector<32x780xf32>
    %cst_9 = arith.constant dense<0.000000e+00> : vector<32xf32>
    %8 = vector.multi_reduction <add>, %3, %cst_9 [1] : vector<32x780xf32> to vector<32xf32>
    %9 = vector.shape_cast %8 : vector<32xf32> to vector<32x1xf32>
    %cst_10 = arith.constant 0.000000e+00 : f32
    %10 = vector.broadcast %cst_10 : f32 to vector<32x1xf32>
    %11 = arith.addf %10, %9 : vector<32x1xf32>
    %cst_11 = arith.constant dense<0.000000e+00> : vector<32xf32>
    %12 = vector.multi_reduction <add>, %7, %cst_11 [1] : vector<32x780xf32> to vector<32xf32>
    %13 = vector.shape_cast %12 : vector<32xf32> to vector<32x1xf32>
    %14 = arith.addf %11, %13 : vector<32x1xf32>
    %cst_12 = arith.constant 1.560000e+03 : f32
    %15 = vector.broadcast %cst_12 : f32 to vector<32x1xf32>
    %16 = arith.divf %14, %15 : vector<32x1xf32>
    %17 = vector.broadcast %16 : vector<32x1xf32> to vector<32x780xf32>
    %18 = arith.subf %3, %17 : vector<32x780xf32>
    %19 = arith.mulf %18, %18 : vector<32x780xf32>
    %cst_13 = arith.constant dense<0.000000e+00> : vector<32xf32>
    %20 = vector.multi_reduction <add>, %19, %cst_13 [1] : vector<32x780xf32> to vector<32xf32>
    %21 = vector.shape_cast %20 : vector<32xf32> to vector<32x1xf32>
    %cst_14 = arith.constant 0.000000e+00 : f32
    %22 = vector.broadcast %cst_14 : f32 to vector<32x1xf32>
    %23 = arith.addf %22, %21 : vector<32x1xf32>
    %24 = vector.broadcast %16 : vector<32x1xf32> to vector<32x780xf32>
    %25 = arith.subf %7, %24 : vector<32x780xf32>
    %26 = arith.mulf %25, %25 : vector<32x780xf32>
    %cst_15 = arith.constant dense<0.000000e+00> : vector<32xf32>
    %27 = vector.multi_reduction <add>, %26, %cst_15 [1] : vector<32x780xf32> to vector<32xf32>
    %28 = vector.shape_cast %27 : vector<32xf32> to vector<32x1xf32>
    %29 = arith.addf %23, %28 : vector<32x1xf32>
    %cst_16 = arith.constant 1.560000e+03 : f32
    %30 = vector.broadcast %cst_16 : f32 to vector<32x1xf32>
    %31 = arith.divf %29, %30 : vector<32x1xf32>
    %c0_17 = arith.constant 0 : index
    %c0_18 = arith.constant 0 : index
    %32 = vector.load %arg2[%c0_17, %c0_18] : memref<32x1xf32, #tpu.memory_space<vmem>>, vector<32x1xf32>
    %cst_19 = arith.constant 9.99999974E-6 : f32
    %33 = vector.broadcast %cst_19 : f32 to vector<32x1xf32>
    %34 = arith.addf %31, %33 : vector<32x1xf32>
    %35 = math.rsqrt %34 : vector<32x1xf32>
    %36 = arith.mulf %32, %35 : vector<32x1xf32>
    %c0_20 = arith.constant 0 : index
    %c0_21 = arith.constant 0 : index
    %37 = vector.load %arg3[%c0_20, %c0_21] : memref<32x1xf32, #tpu.memory_space<vmem>>, vector<32x1xf32>
    %38 = arith.mulf %16, %36 : vector<32x1xf32>
    %39 = arith.subf %37, %38 : vector<32x1xf32>
    %40 = vector.broadcast %36 : vector<32x1xf32> to vector<32x780xf32>
    %41 = arith.mulf %3, %40 : vector<32x780xf32>
    %42 = vector.broadcast %39 : vector<32x1xf32> to vector<32x780xf32>
    %43 = arith.addf %41, %42 : vector<32x780xf32>
    %cst_22 = arith.constant 0.000000e+00 : f32
    %44 = vector.broadcast %cst_22 : f32 to vector<32x780xf32>
    %45 = arith.maximumf %43, %44 : vector<32x780xf32>
    %c0_23 = arith.constant 0 : index
    %c0_24 = arith.constant 0 : index
    %c0_25 = arith.constant 0 : index
    %46 = vector.load %arg4[%c0_23, %c0_24, %c0_25] : memref<2x32x780xf32, #tpu.memory_space<vmem>>, vector<1x32x780xf32>
    %47 = vector.shape_cast %46 : vector<1x32x780xf32> to vector<32x780xf32>
    %48 = vector.shape_cast %45 : vector<32x780xf32> to vector<1x32x780xf32>
    tpu.vector_store %arg4[%c0_23, %c0_24, %c0_25], %48 {strides = array<i32>} : memref<2x32x780xf32, #tpu.memory_space<vmem>>, vector<1x32x780xf32>,
    %49 = vector.broadcast %36 : vector<32x1xf32> to vector<32x780xf32>
    %50 = arith.mulf %7, %49 : vector<32x780xf32>
    %51 = vector.broadcast %39 : vector<32x1xf32> to vector<32x780xf32>
    %52 = arith.addf %50, %51 : vector<32x780xf32>
    %cst_26 = arith.constant 0.000000e+00 : f32
    %53 = vector.broadcast %cst_26 : f32 to vector<32x780xf32>
    %54 = arith.maximumf %52, %53 : vector<32x780xf32>
    %c1_27 = arith.constant 1 : index
    %c0_28 = arith.constant 0 : index
    %c0_29 = arith.constant 0 : index
    %55 = vector.load %arg4[%c1_27, %c0_28, %c0_29] : memref<2x32x780xf32, #tpu.memory_space<vmem>>, vector<1x32x780xf32>
    %56 = vector.shape_cast %55 : vector<1x32x780xf32> to vector<32x780xf32>
    %57 = vector.shape_cast %54 : vector<32x780xf32> to vector<1x32x780xf32>
    tpu.vector_store %arg4[%c1_27, %c0_28, %c0_29], %57 {strides = array<i32>} : memref<2x32x780xf32, #tpu.memory_space<vmem>>, vector<1x32x780xf32>,
    return
  }
}

module attributes {stable_mosaic.version = 11 : i64} {
  func.func @_mlp_kernel(%arg0: memref<2x24960xf32, #tpu.memory_space<vmem>>, %arg1: memref<16x24960xf32, #tpu.memory_space<vmem>>, %arg2: memref<1x16xf32, #tpu.memory_space<vmem>>, %arg3: memref<16x10xf32, #tpu.memory_space<vmem>>, %arg4: memref<1x10xf32, #tpu.memory_space<vmem>>, %arg5: memref<2x10xf32, #tpu.memory_space<vmem>>) attributes {dimension_semantics = [], scalar_prefetch = 0 : i64, scratch_operands = 0 : i64, tpu.core_type = #tpu.core_type<tc>} {
    %c0 = arith.constant 0 : index
    %c0_0 = arith.constant 0 : index
    %0 = vector.load %arg0[%c0, %c0_0] : memref<2x24960xf32, #tpu.memory_space<vmem>>, vector<2x24960xf32>
    %c0_1 = arith.constant 0 : index
    %c0_2 = arith.constant 0 : index
    %1 = vector.load %arg1[%c0_1, %c0_2] : memref<16x24960xf32, #tpu.memory_space<vmem>>, vector<16x24960xf32>
    %cst = arith.constant dense<0.000000e+00> : vector<2x16xf32>
    %2 = tpu.matmul %0, %1, %cst {dimension_numbers = #tpu.dot_dimension_numbers<[1], [1], [0], [0], [0, 0, 1, 0], [], []>} : vector<2x24960xf32>, vector<16x24960xf32>, vector<2x16xf32> -> vector<2x16xf32>
    %c0_3 = arith.constant 0 : index
    %c0_4 = arith.constant 0 : index
    %3 = vector.load %arg2[%c0_3, %c0_4] : memref<1x16xf32, #tpu.memory_space<vmem>>, vector<1x16xf32>
    %4 = vector.broadcast %3 : vector<1x16xf32> to vector<2x16xf32>
    %5 = arith.addf %2, %4 : vector<2x16xf32>
    %cst_5 = arith.constant 0.000000e+00 : f32
    %6 = vector.broadcast %cst_5 : f32 to vector<2x16xf32>
    %7 = arith.maximumf %5, %6 : vector<2x16xf32>
    %c0_6 = arith.constant 0 : index
    %c0_7 = arith.constant 0 : index
    %8 = vector.load %arg3[%c0_6, %c0_7] : memref<16x10xf32, #tpu.memory_space<vmem>>, vector<16x10xf32>
    %cst_8 = arith.constant dense<0.000000e+00> : vector<2x10xf32>
    %9 = tpu.matmul %7, %8, %cst_8 {dimension_numbers = #tpu.dot_dimension_numbers<[1], [0], [0], [1], [0, 0, 1, 1], [], []>} : vector<2x16xf32>, vector<16x10xf32>, vector<2x10xf32> -> vector<2x10xf32>
    %c0_9 = arith.constant 0 : index
    %c0_10 = arith.constant 0 : index
    %10 = vector.load %arg4[%c0_9, %c0_10] : memref<1x10xf32, #tpu.memory_space<vmem>>, vector<1x10xf32>
    %11 = vector.broadcast %10 : vector<1x10xf32> to vector<2x10xf32>
    %12 = arith.addf %9, %11 : vector<2x10xf32>
    %c0_11 = arith.constant 0 : index
    %c0_12 = arith.constant 0 : index
    %13 = vector.load %arg5[%c0_11, %c0_12] : memref<2x10xf32, #tpu.memory_space<vmem>>, vector<2x10xf32>
    tpu.vector_store %arg5[%c0_11, %c0_12], %12 {strides = array<i32>} : memref<2x10xf32, #tpu.memory_space<vmem>>, vector<2x10xf32>,
    return
  }
}

</mosaic_0001>

<bundles_post_ra>
// kernel: net22_2_forward.3
= control target key start
LH: loop header
LB: loop body
LE: loop exit
PB: predicated region body
PF: predicated region fallthrough
CT: control target
= control target key end

     0   :  { %v1088_v3 = vmov 0.0   ;;  %vm47_vm0 = vcmask 261120   ;;  %vm700_vm1 = vcmask 121856   ;;  %s1640_s0 = inlined_call_operand.vmem [shape: f32[2,32,783], index: 0, kind: input, shape index: {}]   ;;  %s1641_s1 = inlined_call_operand.vmem [shape: f32[16,32], index: 1, kind: input, shape index: {}]   ;;  %s1642_s2 = inlined_call_operand.vmem [shape: f32[16,1], index: 2, kind: input, shape index: {}]   ;;  %s1643_s3 = inlined_call_operand.vmem [shape: f32[16,1], index: 3, kind: input, shape index: {}]   ;;  %s1644_s4 = inlined_call_operand.vmem [shape: f32[2,16,783], index: 4, kind: output, shape index: {}]  }
   0x1   :  { %v41_v0 = vld [vmem:[%s1640_s0 + $0xb0] sm:$0xff]  ;;  %v43_v1 = vld [vmem:[%s1640_s0 + $0xc0] sm:$0xff]  ;;  %v40_v2 = vld [vmem:[%s1640_s0 + $0xa8] sm:$0xff]  ;;  %118 = vmatprep.mubr.f32.mxu0 %v1088_v3  ;;  %195 = vmatprep.mubr.f32.mxu1 %v1088_v3 }
   0x2   :  { %78 = vmatprep.subr.mxu0 %v41_v0  ;;  %155 = vmatprep.subr.mxu1 %v43_v1  ;;  %v42_v4 = vld [vmem:[%s1640_s0 + $0xb8] sm:$0xff]  ;;  %v36_v6 = vld [vmem:[%s1640_s0 + $0x88] sm:$0xff]  ;;  %v33_v7 = vld [vmem:[%s1640_s0 + $0x70] sm:$0xff] }
   0x3   :  { %v34_v5 = vld [vmem:[%s1640_s0 + $0x78] sm:$0xff]  ;;  %79 = vmatpush1.msra.mxu0 %v40_v2  ;;  %156 = vmatpush1.msra.mxu1 %v42_v4  ;;  %v35_v8 = vld [vmem:[%s1640_s0 + $0x80] sm:$0xff]  ;;  %v29_v10 = vld [vmem:[%s1640_s0 + $0x50] sm:$0xff] }
   0x4   :  { %v27_v9 = vld [vmem:[%s1640_s0 + $0x40] sm:$0xff]  ;;  %80 = vmatprep.subr.mxu0 %v34_v5  ;;  %157 = vmatprep.subr.mxu1 %v36_v6  ;;  %v26_v11 = vld [vmem:[%s1640_s0 + $0x38] sm:$0xff]  ;;  %v28_v12 = vld [vmem:[%s1640_s0 + $0x48] sm:$0xff] }
   0x5   :  { %81 = vmatpush1.msra.mxu0 %v33_v7  ;;  %158 = vmatpush1.msra.mxu1 %v35_v8  ;;  %v20_v13 = vld [vmem:[%s1640_s0 + $0x8] sm:$0xff]  ;;  %v22_v14 = vld [vmem:[%s1640_s0 + $0x18] sm:$0xff]  ;;  %v19_v15 = vld [vmem:[%s1640_s0] sm:$0xff] }
   0x6   :  { %82 = vmatprep.subr.mxu0 %v27_v9  ;;  %159 = vmatprep.subr.mxu1 %v29_v10  ;;  %v21_v16 = vld [vmem:[%s1640_s0 + $0x10] sm:$0xff]  ;;  %v1168_v17 = vld [vmem:[%s1641_s1] sm:$0xff]  ;;  %v46_v19 = vld [vmem:[%s1640_s0 + $0xd8] sm:$0xff] }
   0x7   :  { %83 = vmatpush1.msra.mxu0 %v26_v11  ;;  %160 = vmatpush1.msra.mxu1 %v28_v12  ;;  %v45_v18 = vld [vmem:[%s1640_s0 + $0xd0] sm:$0xff]  ;;  %v44_v20 = vld [vmem:[%s1640_s0 + $0xc8] sm:$0xff]  ;;  %v38_v21 = vld [vmem:[%s1640_s0 + $0x98] sm:$0xff] }
   0x8   :  { %84 = vmatprep.subr.mxu0 %v20_v13  ;;  %161 = vmatprep.subr.mxu1 %v22_v14  ;;  %v39_v22 = vld [vmem:[%s1640_s0 + $0xa0] sm:$0xff]  ;;  %v37_v23 = vld [vmem:[%s1640_s0 + $0x90] sm:$0xff]  ;;  %v1195_v24 = vld [vmem:[%s1641_s1 + $0x8] sm:$0xff] }
   0x9   :  { %85 = vmatpush1.msra.mxu0 %v19_v15  ;;  %162 = vmatpush1.msra.mxu1 %v21_v16  ;;  %v31_v25 = vld [vmem:[%s1640_s0 + $0x60] sm:$0xff]  ;;  %v32_v26 = vld [vmem:[%s1640_s0 + $0x68] sm:$0xff]  ;;  %v30_v27 = vld [vmem:[%s1640_s0 + $0x58] sm:$0xff] }
   0xa   :  { %988 = vmatmul.mubr.msk.f32.vlgmr.msra.gmra.mxu0 %vm47_vm0, %v1168_v17  ;;  %990 = vmatmul.mubr.msk.f32.vlgmr.msra.gmra.mxu1 %vm47_vm0, %v1168_v17  ;;  %v24_v28 = vld [vmem:[%s1640_s0 + $0x28] sm:$0xff]  ;;  %v25_v29 = vld [vmem:[%s1640_s0 + $0x30] sm:$0xff]  ;;  %v23_v30 = vld [vmem:[%s1640_s0 + $0x20] sm:$0xff] }
   0xb   :  { %232 = vmatprep.subr.mxu0 %v45_v18  ;;  %1058 = vmatprep.subr.mxu1 %v46_v19  ;;  %v1018_v31 = vld [vmem:[%s1640_s0 + $0x190] sm:$0xff]  ;;  %v1020_v32 = vld [vmem:[%s1640_s0 + $0x1a0] sm:$0xff]  ;;  %v1017_v33 = vld [vmem:[%s1640_s0 + $0x188] sm:$0xff] }
   0xc   :  { %233 = vmatpush1.msra.mxu0 %v44_v20  ;;  %1059 = vmatpush3.msra.mxu1 %v46_v19  ;;  %v1019_v34 = vld [vmem:[%s1640_s0 + $0x198] sm:$0xff]  ;;  %v1013_v36 = vld [vmem:[%s1640_s0 + $0x168] sm:$0xff]  ;;  %v1010_v37 = vld [vmem:[%s1640_s0 + $0x150] sm:$0xff] }
   0xd   :  { %234 = vmatprep.subr.mxu0 %v38_v21  ;;  %1060 = vmatprep.subr.mxu1 %v39_v22  ;;  %v1011_v35 = vld [vmem:[%s1640_s0 + $0x158] sm:$0xff]  ;;  %v1012_v38 = vld [vmem:[%s1640_s0 + $0x160] sm:$0xff]  ;;  %v1006_v40 = vld [vmem:[%s1640_s0 + $0x130] sm:$0xff] }
   0xe   :  { %124 = vmatprep.mubr.f32.mxu0 %v1088_v3  ;;  %201 = vmatprep.mubr.f32.mxu1 %v1088_v3  ;;  %v1004_v39 = vld [vmem:[%s1640_s0 + $0x120] sm:$0xff]  ;;  %v1003_v41 = vld [vmem:[%s1640_s0 + $0x118] sm:$0xff]  ;;  %v1005_v42 = vld [vmem:[%s1640_s0 + $0x128] sm:$0xff] }
   0xf   :  { %235 = vmatpush1.msra.mxu0 %v37_v23  ;;  %1061 = vmatpush3.msra.mxu1 %v39_v22  ;;  %v997_v43 = vld [vmem:[%s1640_s0 + $0xe8] sm:$0xff]  ;;  %v999_v44 = vld [vmem:[%s1640_s0 + $0xf8] sm:$0xff]  ;;  %v996_v45 = vld [vmem:[%s1640_s0 + $0xe0] sm:$0xff] }
  0x10   :  { %989 = vmatmul.mubr.msk.f32.gmra.mxu0 %vm47_vm0, %v1195_v24  ;;  %991 = vmatmul.mubr.msk.f32.gmra.mxu1 %vm47_vm0, %v1195_v24  ;;  %v998_v46 = vld [vmem:[%s1640_s0 + $0xf0] sm:$0xff]  ;;  %v1023_v48 = vld [vmem:[%s1640_s0 + $0x1b8] sm:$0xff]  ;;  %v1021_v49 = vld [vmem:[%s1640_s0 + $0x1a8] sm:$0xff] }
  0x11   :  { %236 = vmatprep.subr.mxu0 %v31_v25  ;;  %1062 = vmatprep.subr.mxu1 %v32_v26  ;;  %v1022_v47 = vld [vmem:[%s1640_s0 + $0x1b0] sm:$0xff]  ;;  %v1015_v50 = vld [vmem:[%s1640_s0 + $0x178] sm:$0xff]  ;;  %v1016_v51 = vld [vmem:[%s1640_s0 + $0x180] sm:$0xff] }
  0x12   :  { %237 = vmatpush1.msra.mxu0 %v30_v27  ;;  %1063 = vmatpush3.msra.mxu1 %v32_v26  ;;  %v1014_v52 = vld [vmem:[%s1640_s0 + $0x170] sm:$0xff]  ;;  %v1008_v53 = vld [vmem:[%s1640_s0 + $0x140] sm:$0xff]  ;;  %v1009_v54 = vld [vmem:[%s1640_s0 + $0x148] sm:$0xff] }
  0x13   :  { %238 = vmatprep.subr.mxu0 %v24_v28  ;;  %1064 = vmatprep.subr.mxu1 %v25_v29  ;;  %v1007_v55 = vld [vmem:[%s1640_s0 + $0x138] sm:$0xff]  ;;  %v1001_v56 = vld [vmem:[%s1640_s0 + $0x108] sm:$0xff]  ;;  %v1002_v57 = vld [vmem:[%s1640_s0 + $0x110] sm:$0xff] }
  0x14   :  { %239 = vmatpush1.msra.mxu0 %v23_v30  ;;  %272 = vmatprep.mubr.f32.mxu0 %v1088_v3  ;;  %v1000_v58 = vld [vmem:[%s1640_s0 + $0x100] sm:$0xff] }
  0x15   :  { %1065 = vmatpush3.msra.mxu1 %v25_v29  ;;  %1066 = vmatprep.mubr.msk.f32.mxu1 %vm47_vm0, %v1168_v17 }
  0x16   :  { %992 = vmatmul.mubr.msk.f32.vlgmr.msra.gmra.mxu0 %vm47_vm0, %v1168_v17  ;;  %1067 = vmatmul.mubr.msk.f32.vlgmr.msra.gmra.mxu1 %vm47_vm0, %v1195_v24 }
  0x17   :  { %413 = vmatprep.subr.mxu0 %v1018_v31  ;;  %490 = vmatprep.subr.mxu1 %v1020_v32 }
  0x18   :  { %414 = vmatpush1.msra.mxu0 %v1017_v33  ;;  %491 = vmatpush1.msra.mxu1 %v1019_v34 }
  0x19   :  { %415 = vmatprep.subr.mxu0 %v1011_v35  ;;  %492 = vmatprep.subr.mxu1 %v1013_v36 }
  0x1a   :  { %278 = vmatprep.mubr.f32.mxu0 %v1088_v3  ;;  %416 = vmatpush1.msra.mxu0 %v1010_v37 }
  0x1b   :  { %493 = vmatpush1.msra.mxu1 %v1012_v38  ;;  %993 = vmatmul.mubr.msk.f32.gmra.mxu0 %vm47_vm0, %v1195_v24 }
  0x1c   :  { %417 = vmatprep.subr.mxu0 %v1004_v39  ;;  %494 = vmatprep.subr.mxu1 %v1006_v40 }
  0x1d   :  { %418 = vmatpush1.msra.mxu0 %v1003_v41  ;;  %495 = vmatpush1.msra.mxu1 %v1005_v42 }
  0x1e   :  { %419 = vmatprep.subr.mxu0 %v997_v43  ;;  %496 = vmatprep.subr.mxu1 %v999_v44 }
  0x1f   :  { %420 = vmatpush1.msra.mxu0 %v996_v45  ;;  %453 = vmatprep.mubr.f32.mxu0 %v1088_v3 }
  0x20   :  { %497 = vmatpush1.msra.mxu1 %v998_v46  ;;  %530 = vmatprep.mubr.f32.mxu1 %v1088_v3 }
  0x21   :  { %1024 = vmatmul.mubr.msk.f32.vlgmr.msra.gmra.mxu0 %vm47_vm0, %v1168_v17  ;;  %1026 = vmatmul.mubr.msk.f32.vlgmr.msra.gmra.mxu1 %vm47_vm0, %v1168_v17 }
  0x22   :  { %567 = vmatprep.subr.mxu0 %v1022_v47  ;;  %1069 = vmatprep.subr.mxu1 %v1023_v48 }
  0x23   :  { %568 = vmatpush1.msra.mxu0 %v1021_v49  ;;  %1070 = vmatpush3.msra.mxu1 %v1023_v48 }
  0x24   :  { %569 = vmatprep.subr.mxu0 %v1015_v50  ;;  %1071 = vmatprep.subr.mxu1 %v1016_v51 }
  0x25   :  { %459 = vmatprep.mubr.f32.mxu0 %v1088_v3  ;;  %536 = vmatprep.mubr.f32.mxu1 %v1088_v3 }
  0x26   :  { %570 = vmatpush1.msra.mxu0 %v1014_v52  ;;  %1072 = vmatpush3.msra.mxu1 %v1016_v51 }
  0x27   :  { %1025 = vmatmul.mubr.msk.f32.gmra.mxu0 %vm47_vm0, %v1195_v24  ;;  %1027 = vmatmul.mubr.msk.f32.gmra.mxu1 %vm47_vm0, %v1195_v24 }
  0x28   :  { %571 = vmatprep.subr.mxu0 %v1008_v53  ;;  %1073 = vmatprep.subr.mxu1 %v1009_v54 }
  0x29   :  { %572 = vmatpush1.msra.mxu0 %v1007_v55  ;;  %1074 = vmatpush3.msra.mxu1 %v1009_v54 }
  0x2a   :  { %573 = vmatprep.subr.mxu0 %v1001_v56  ;;  %1075 = vmatprep.subr.mxu1 %v1002_v57 }
  0x2b   :  { %574 = vmatpush1.msra.mxu0 %v1000_v58  ;;  %607 = vmatprep.mubr.f32.mxu0 %v1088_v3 }
  0x2c   :  { %1076 = vmatpush3.msra.mxu1 %v1002_v57  ;;  %1077 = vmatprep.mubr.msk.f32.mxu1 %vm47_vm0, %v1168_v17 }
  0x2d   :  { %1028 = vmatmul.mubr.msk.f32.vlgmr.msra.gmra.mxu0 %vm47_vm0, %v1168_v17  ;;  %1078 = vmatmul.mubr.msk.f32.vlgmr.msra.gmra.mxu1 %vm47_vm0, %v1195_v24 }
  0x2e   :  { %613 = vmatprep.mubr.f32.mxu0 %v1088_v3 }
  0x31   :  { %1029 = vmatmul.mubr.msk.f32.gmra.mxu0 %vm47_vm0, %v1195_v24 }
  0xca   :  { %v1337_v59 = vpop.f32.mrf.mxu0  ;;  %v1339_v60 = vpop.f32.mrf.mxu1 }
  0xcc   :  { %v1341_v61 = vpop.f32.mrf.mxu0  ;;  %v1343_v62 = vpop.f32.mrf.mxu1 }
  0xcd   :  { %v695_v63 = vadd.f32 %v1341_v61, %v1337_v59 }
  0xcf   :  { %v696_v0 = vadd.f32 %v695_v63, %v1339_v60 }
  0xd0   :  { %v1348_v1 = vpop.f32.mrf.mxu0  ;;  %v1350_v2 = vpop.f32.mrf.mxu1 }
  0xd1   :  { %v697_v5 = vadd.f32 %v696_v0, %v1343_v62 }
  0xd2   :  { %v1352_v3 = vpop.f32.mrf.mxu0  ;;  %v1354_v4 = vpop.f32.mrf.mxu1 }
  0xd3   :  { %v705_v6 = vadd.f32 %v1352_v3, %v1348_v1 }
  0xd5   :  { %v706_v7 = vadd.f32 %v705_v6, %v1350_v2 }
  0xd6   :  { %v1360_v8 = vpop.f32.mrf.mxu0  ;;  %v1362_v9 = vpop.f32.mrf.mxu1 }
  0xd7   :  { %v698_v10 = vadd.f32 %v697_v5, %v1360_v8  ;;  %v707_v11 = vadd.f32 %v706_v7, %v1354_v4  ;;  %v710_v21 = vsel %vm700_vm1, %v1362_v9, 0.0 }
  0xd8   :  { %v1366_v12 = vpop.f32.mrf.mxu0  ;;  %v1368_v13 = vpop.f32.mrf.mxu1 }
  0xd9   :  { %v699_v14 = vadd.f32 %v698_v10, %v1366_v12  ;;  %v701_v15 = vsel %vm700_vm1, %v1368_v13, 0.0 }
  0xdb   :  { %v1373_v16 = vpop.f32.mrf.mxu0  ;;  %v702_v17 = vadd.f32 %v701_v15, %v699_v14 }
  0xdc   :  { %v708_v18 = vadd.f32 %v707_v11, %v1373_v16 }
  0xdd   :  { %v1376_v19 = vpop.f32.mrf.mxu0  ;;  %703 = vadd.xlane.f32.xlu0 %v702_v17 }
  0xde   :  { %v709_v20 = vadd.f32 %v708_v18, %v1376_v19 }
  0xe0   :  { %v711_v22 = vadd.f32 %v710_v21, %v709_v20 }
  0xe1   :  { %v1381_v23 = vpop.f32.mrf.mxu0  ;;  %v1383_v24 = vpop.f32.mrf.mxu1 }
  0xe2   :  { %712 = vadd.xlane.f32.xlu0 %v711_v22 }
  0xe3   :  { %v1385_v25 = vpop.f32.mrf.mxu0  ;;  %v1387_v26 = vpop.f32.mrf.mxu1 }
  0xe4   :  { %v716_v27 = vadd.f32 %v1385_v25, %v1381_v23 }
  0xe6   :  { %v717_v28 = vadd.f32 %v716_v27, %v1383_v24 }
  0xe7   :  { %v1392_v29 = vpop.f32.mrf.mxu0  ;;  %v1394_v30 = vpop.f32.mrf.mxu1 }
  0xe8   :  { %v718_v33 = vadd.f32 %v717_v28, %v1387_v26 }
  0xe9   :  { %v1396_v31 = vpop.f32.mrf.mxu0  ;;  %v1398_v32 = vpop.f32.mrf.mxu1 }
  0xea   :  { %v725_v34 = vadd.f32 %v1396_v31, %v1392_v29 }
  0xec   :  { %v726_v35 = vadd.f32 %v725_v34, %v1394_v30 }
  0xed   :  { %v1404_v36 = vpop.f32.mrf.mxu0  ;;  %v1406_v37 = vpop.f32.mrf.mxu1 }
  0xee   :  { %v727_v38 = vadd.f32 %v726_v35, %v1398_v32  ;;  %v719_v39 = vadd.f32 %v718_v33, %v1404_v36  ;;  %v730_v49 = vsel %vm700_vm1, %v1406_v37, 0.0 }
  0xef   :  { %v1410_v40 = vpop.f32.mrf.mxu0  ;;  %v1412_v41 = vpop.f32.mrf.mxu1 }
  0xf0   :  { %v720_v42 = vadd.f32 %v719_v39, %v1410_v40  ;;  %v721_v43 = vsel %vm700_vm1, %v1412_v41, 0.0 }
  0xf1   :  { %v1417_v44 = vpop.f32.mrf.mxu0 }
  0xf2   :  { %v728_v45 = vadd.f32 %v727_v38, %v1417_v44  ;;  %v722_v46 = vadd.f32 %v721_v43, %v720_v42 }
  0xf3   :  { %v1420_v47 = vpop.f32.mrf.mxu0 }
  0xf4   :  { %v729_v48 = vadd.f32 %v728_v45, %v1420_v47  ;;  %723 = vadd.xlane.f32.xlu1 %v722_v46 }
  0xf6   :  { %v731_v50 = vadd.f32 %v730_v49, %v729_v48 }
  0xf8   :  { %732 = vadd.xlane.f32.xlu1 %v731_v50 }
 0x166   :  { %v704_v51 = vpop.xlane.xlu0 %703 }
 0x16b   :  { %v713_v55 = vpop.xlane.xlu0 %712 }
 0x17d   :  { %v724_v52 = vpop.xlane.xlu1 %723 }
 0x17e   :  { %v734_v53 = vadd.f32 %v724_v52, %v704_v51 }
 0x180   :  { %v1425_v54 = vmul.f32 0.0006385696, %v734_v53 }
 0x181   :  { %v733_v56 = vpop.xlane.xlu1 %732 }
 0x182   :  { %v735_v57 = vadd.f32 %v733_v56, %v713_v55  ;;  %v739_v58 = vsub.f32 %v1337_v59, %v1425_v54  ;;  %v740_v63 = vsub.f32 %v1341_v61, %v1425_v54  ;;  %v741_v0 = vsub.f32 %v1339_v60, %v1425_v54 }
 0x183   :  { %v742_v5 = vsub.f32 %v1343_v62, %v1425_v54  ;;  %v745_v6 = vsub.f32 %v1368_v13, %v1425_v54  ;;  %v743_v14 = vsub.f32 %v1360_v8, %v1425_v54  ;;  %v787_v18 = vsub.f32 %v1381_v23, %v1425_v54 }
 0x184   :  { %v753_v7 = vmul.f32 %v739_v58, %v739_v58  ;;  %v754_v10 = vmul.f32 %v740_v63, %v740_v63  ;;  %v1437_v11 = vmul.f32 0.0006385696, %v735_v57  ;;  %v755_v15 = vmul.f32 %v741_v0, %v741_v0 }
 0x185   :  { %v788_v20 = vsub.f32 %v1385_v25, %v1425_v54  ;;  %v789_v21 = vsub.f32 %v1383_v24, %v1425_v54  ;;  %v744_v22 = vsub.f32 %v1366_v12, %v1425_v54  ;;  %v756_v27 = vmul.f32 %v742_v5, %v742_v5 }
 0x186   :  { %v767_v17 = vadd.f32 %v754_v10, %v753_v7  ;;  %v759_v28 = vmul.f32 %v745_v6, %v745_v6  ;;  %v790_v33 = vsub.f32 %v1387_v26, %v1425_v54  ;;  %v791_v35 = vsub.f32 %v1404_v36, %v1425_v54 }
 0x187   :  { %v801_v38 = vmul.f32 %v787_v18, %v787_v18  ;;  %v802_v39 = vmul.f32 %v788_v20, %v788_v20  ;;  %v757_v42 = vmul.f32 %v743_v14, %v743_v14  ;;  %v792_v43 = vsub.f32 %v1410_v40, %v1425_v54 }
 0x188   :  { %v768_v34 = vadd.f32 %v767_v17, %v755_v15  ;;  %v793_v45 = vsub.f32 %v1412_v41, %v1425_v54  ;;  %v803_v48 = vmul.f32 %v789_v21, %v789_v21  ;;  %v746_v50 = vsub.f32 %v1348_v1, %v1437_v11 }
 0x189   :  { %v815_v49 = vadd.f32 %v802_v39, %v801_v38  ;;  %v758_v51 = vmul.f32 %v744_v22, %v744_v22  ;;  %v772_v52 = vsel %vm700_vm1, %v759_v28, 0.0  ;;  %v747_v53 = vsub.f32 %v1352_v3, %v1437_v11 }
 0x18a   :  { %v769_v46 = vadd.f32 %v768_v34, %v756_v27  ;;  %v748_v55 = vsub.f32 %v1350_v2, %v1437_v11  ;;  %v804_v57 = vmul.f32 %v790_v33, %v790_v33  ;;  %v805_v58 = vmul.f32 %v791_v35, %v791_v35 }
 0x18b   :  { %v816_v63 = vadd.f32 %v815_v49, %v803_v48  ;;  %v806_v0 = vmul.f32 %v792_v43, %v792_v43  ;;  %v749_v5 = vsub.f32 %v1354_v4, %v1437_v11  ;;  %v760_v6 = vmul.f32 %v746_v50, %v746_v50 }
 0x18c   :  { %v770_v56 = vadd.f32 %v769_v46, %v757_v42  ;;  %v761_v7 = vmul.f32 %v747_v53, %v747_v53  ;;  %v807_v14 = vmul.f32 %v793_v45, %v793_v45  ;;  %v750_v17 = vsub.f32 %v1373_v16, %v1437_v11 }
 0x18d   :  { %v817_v15 = vadd.f32 %v816_v63, %v804_v57  ;;  %v751_v18 = vsub.f32 %v1376_v19, %v1437_v11  ;;  %v762_v20 = vmul.f32 %v748_v55, %v748_v55  ;;  %v794_v22 = vsub.f32 %v1392_v29, %v1437_v11 }
 0x18e   :  { %v771_v10 = vadd.f32 %v770_v56, %v758_v51  ;;  %v776_v21 = vadd.f32 %v761_v7, %v760_v6  ;;  %v752_v33 = vsub.f32 %v1362_v9, %v1437_v11  ;;  %v795_v34 = vsub.f32 %v1396_v31, %v1437_v11 }
 0x18f   :  { %v818_v28 = vadd.f32 %v817_v15, %v805_v58  ;;  %v763_v35 = vmul.f32 %v749_v5, %v749_v5  ;;  %v796_v39 = vsub.f32 %v1394_v30, %v1437_v11  ;;  %v820_v43 = vsel %vm700_vm1, %v807_v14, 0.0 }
 0x190   :  { %v773_v27 = vadd.f32 %v772_v52, %v771_v10  ;;  %v777_v38 = vadd.f32 %v776_v21, %v762_v20  ;;  %v808_v45 = vmul.f32 %v794_v22, %v794_v22  ;;  %v764_v46 = vmul.f32 %v750_v17, %v750_v17 }
 0x191   :  { %v819_v42 = vadd.f32 %v818_v28, %v806_v0  ;;  %v797_v49 = vsub.f32 %v1398_v32, %v1437_v11  ;;  %v809_v50 = vmul.f32 %v795_v34, %v795_v34  ;;  %v765_v52 = vmul.f32 %v751_v18, %v751_v18 }
 0x192   :  { %774 = vadd.xlane.f32.xlu0 %v773_v27  ;;  %v778_v48 = vadd.f32 %v777_v38, %v763_v35  ;;  %v766_v53 = vmul.f32 %v752_v33, %v752_v33  ;;  %v798_v56 = vsub.f32 %v1417_v44, %v1437_v11  ;;  %v810_v57 = vmul.f32 %v796_v39, %v796_v39 }
 0x193   :  { %v821_v51 = vadd.f32 %v820_v43, %v819_v42  ;;  %v824_v58 = vadd.f32 %v809_v50, %v808_v45  ;;  %v800_v63 = vsub.f32 %v1406_v37, %v1437_v11  ;;  %v799_v5 = vsub.f32 %v1420_v47, %v1437_v11  ;;  %v837_v50 = vld [vmem:[%s1642_s2] sm:$0xff] }
 0x194   :  { %v779_v55 = vadd.f32 %v778_v48, %v764_v46  ;;  %v811_v6 = vmul.f32 %v797_v49, %v797_v49  ;;  %v781_v10 = vsel %vm700_vm1, %v766_v53, 0.0  ;;  %v812_v15 = vmul.f32 %v798_v56, %v798_v56  ;;  %v838_v53 = vld [vmem:[%s1642_s2 + $0x8] sm:$0xff] }
 0x195   :  { %v825_v7 = vadd.f32 %v824_v58, %v810_v57  ;;  %v814_v18 = vmul.f32 %v800_v63, %v800_v63  ;;  %v813_v20 = vmul.f32 %v799_v5, %v799_v5  ;;  %v1089_v33 = vmov 0   ;;  %v845_v58 = vld [vmem:[%s1643_s3] sm:$0xff]  ;;  %v846_v5 = vld [vmem:[%s1643_s3 + $0x8] sm:$0xff] }
 0x196   :  { %822 = vadd.xlane.f32.xlu0 %v821_v51  ;;  %v780_v0 = vadd.f32 %v779_v55, %v765_v52  ;;  %1083 = vset.pattern.permute.xlu1 %v1089_v33 }
 0x197   :  { %v826_v17 = vadd.f32 %v825_v7, %v811_v6  ;;  %v829_v27 = vsel %vm700_vm1, %v814_v18, 0.0  ;;  %1082 = vset.pattern.permute.xlu0 %v1089_v33 }
 0x198   :  { %v782_v14 = vadd.f32 %v781_v10, %v780_v0 }
 0x199   :  { %v827_v21 = vadd.f32 %v826_v17, %v812_v15 }
 0x19a   :  { %783 = vadd.xlane.f32.xlu1 %v782_v14 }
 0x19b   :  { %v828_v22 = vadd.f32 %v827_v21, %v813_v20 }
 0x19d   :  { %v830_v28 = vadd.f32 %v829_v27, %v828_v22 }
 0x19f   :  { %831 = vadd.xlane.f32.xlu1 %v830_v28 }
 0x21b   :  { %v775_v34 = vpop.xlane.xlu0 %774 }
 0x21f   :  { %v823_v35 = vpop.xlane.xlu0 %822 }
 0x220   :  { %v833_v38 = vadd.f32 %v823_v35, %v775_v34 }
 0x222   :  { %v835_v39 = vmul.f32 0.0006385696, %v833_v38 }
 0x223   :  { %v784_v43 = vpop.xlane.xlu1 %783 }
 0x224   :  { %v839_v42 = vadd.f32 1e-05, %v835_v39 }
 0x226   :  { %1084 = vrsqrt.f32 %v839_v42 }
 0x228   :  { %v832_v45 = vpop.xlane.xlu1 %831 }
 0x229   :  { %v834_v46 = vadd.f32 %v832_v45, %v784_v43 }
 0x22b   :  { %v836_v48 = vmul.f32 0.0006385696, %v834_v46 }
 0x22d   :  { %v840_v49 = vadd.f32 1e-05, %v836_v48 }
 0x22f   :  { %1086 = vrsqrt.f32 %v840_v49 }
 0x233   :  { %v1085_v51 = vpop.eup %1084 }
 0x234   :  { %v843_v52 = vmul.f32 %v1085_v51, %v837_v50 }
 0x236   :  { %853 = vperm.xlu0 %1082, %v843_v52   ;;  %v847_v57 = vmul.f32 %v843_v52, %v1425_v54 }
 0x238   :  { %v849_v63 = vsub.f32 %v845_v58, %v847_v57 }
 0x23c   :  { %v1087_v55 = vpop.eup %1086 }
 0x23d   :  { %v844_v56 = vmul.f32 %v1087_v55, %v838_v53 }
 0x23f   :  { %858 = vperm.xlu1 %1083, %v844_v56   ;;  %v848_v0 = vmul.f32 %v844_v56, %v1437_v11 }
 0x241   :  { %v850_v6 = vsub.f32 %v846_v5, %v848_v0 }
 0x243   :  { %877 = vperm.xlu1 %1083, %v849_v63  }
 0x247   :  { %882 = vperm.xlu1 %1083, %v850_v6  }
 0x2b1   :  { %v854_v7 = vpop.permute.xlu0 %853 }
 0x2b2   :  { %v861_v10 = vmul.f32 %v854_v7, %v1337_v59  ;;  %v862_v54 = vmul.f32 %v854_v7, %v1341_v61  ;;  %v863_v14 = vmul.f32 %v854_v7, %v1339_v60  ;;  %v864_v15 = vmul.f32 %v854_v7, %v1343_v62 }
 0x2b3   :  { %v865_v17 = vmul.f32 %v854_v7, %v1360_v8  ;;  %v866_v11 = vmul.f32 %v854_v7, %v1366_v12  ;;  %v867_v18 = vmul.f32 %v854_v7, %v1368_v13  ;;  %v927_v20 = vmul.f32 %v854_v7, %v1381_v23 }
 0x2b4   :  { %v928_v21 = vmul.f32 %v854_v7, %v1385_v25  ;;  %v929_v22 = vmul.f32 %v854_v7, %v1383_v24  ;;  %v930_v59 = vmul.f32 %v854_v7, %v1387_v26  ;;  %v931_v61 = vmul.f32 %v854_v7, %v1404_v36 }
 0x2b5   :  { %v932_v60 = vmul.f32 %v854_v7, %v1410_v40  ;;  %v933_v62 = vmul.f32 %v854_v7, %v1412_v41 }
 0x2ba   :  { %v859_v27 = vpop.permute.xlu1 %858 }
 0x2bb   :  { %v868_v8 = vmul.f32 %v859_v27, %v1348_v1  ;;  %v869_v12 = vmul.f32 %v859_v27, %v1352_v3  ;;  %v870_v13 = vmul.f32 %v859_v27, %v1350_v2  ;;  %v871_v23 = vmul.f32 %v859_v27, %v1354_v4 }
 0x2bc   :  { %v872_v25 = vmul.f32 %v859_v27, %v1373_v16  ;;  %v873_v24 = vmul.f32 %v859_v27, %v1376_v19  ;;  %v874_v26 = vmul.f32 %v1362_v9, %v859_v27  ;;  %v1525_v36 = vmul.f32 %v859_v27, %v1392_v29 }
 0x2bd   :  { %v1528_v40 = vmul.f32 %v859_v27, %v1396_v31  ;;  %v1531_v1 = vmul.f32 %v859_v27, %v1394_v30  ;;  %v1534_v2 = vmul.f32 %v859_v27, %v1398_v32  ;;  %v1537_v4 = vmul.f32 %v859_v27, %v1417_v44 }
 0x2be   :  { %v878_v3 = vpop.permute.xlu1 %877  ;;  %v1540_v16 = vmul.f32 %v859_v27, %v1420_v47  ;;  %v1543_v9 = vmul.f32 %v1406_v37, %v859_v27 }
 0x2bf   :  { %v885_v19 = vadd.f32 %v878_v3, %v861_v10  ;;  %v886_v29 = vadd.f32 %v878_v3, %v862_v54  ;;  %v887_v31 = vadd.f32 %v878_v3, %v863_v14  ;;  %v888_v41 = vadd.f32 %v878_v3, %v864_v15 }
 0x2c0   :  { %v889_v28 = vadd.f32 %v878_v3, %v865_v17  ;;  %v890_v30 = vadd.f32 %v878_v3, %v866_v11  ;;  %v891_v33 = vadd.f32 %v878_v3, %v867_v18  ;;  %v941_v34 = vadd.f32 %v927_v20, %v878_v3 }
 0x2c1   :  { %v899_v35 = vmax.f32 %v885_v19, 0.0  ;;  %v900_v32 = vmax.f32 %v886_v29, 0.0  ;;  %v901_v38 = vmax.f32 %v887_v31, 0.0  ;;  %v902_v39 = vmax.f32 %v888_v41, 0.0 }
 0x2c2   :  { %v903_v44 = vmax.f32 %v889_v28, 0.0  ;;  %v904_v42 = vmax.f32 %v890_v30, 0.0  ;;  %v905_v43 = vmax.f32 %v891_v33, 0.0  ;;  %v942_v47 = vadd.f32 %v928_v21, %v878_v3  ;;  %v883_v45 = vpop.permute.xlu1 %882 }
 0x2c3   :  { %913 = vst [vmem:[%s1644_s4] sm:$0xff] %v899_v35  ;;  %914 = vst [vmem:[%s1644_s4 + $0x8] sm:$0xff] %v900_v32  ;;  %v943_v37 = vadd.f32 %v929_v22, %v878_v3  ;;  %v944_v46 = vadd.f32 %v930_v59, %v878_v3  ;;  %v945_v48 = vadd.f32 %v931_v61, %v878_v3  ;;  %v955_v51 = vmax.f32 %v941_v34, 0.0 }
 0x2c4   :  { %915 = vst [vmem:[%s1644_s4 + $0x10] sm:$0xff] %v901_v38  ;;  %916 = vst [vmem:[%s1644_s4 + $0x18] sm:$0xff] %v902_v39  ;;  %v946_v49 = vadd.f32 %v932_v60, %v878_v3  ;;  %v947_v50 = vadd.f32 %v933_v62, %v878_v3  ;;  %v956_v52 = vmax.f32 %v942_v47, 0.0  ;;  %v892_v53 = vadd.f32 %v883_v45, %v868_v8 }
 0x2c5   :  { %917 = vst [vmem:[%s1644_s4 + $0x20] sm:$0xff] %v903_v44  ;;  %918 = vst [vmem:[%s1644_s4 + $0x28] sm:$0xff] %v904_v42  ;;  %v957_v55 = vmax.f32 %v943_v37, 0.0  ;;  %v958_v56 = vmax.f32 %v944_v46, 0.0  ;;  %v959_v57 = vmax.f32 %v945_v48, 0.0  ;;  %v893_v0 = vadd.f32 %v883_v45, %v869_v12 }
 0x2c6   :  { %919 = vst.msk [vmem:[%s1644_s4 + $0x30] sm:$0xff] %vm700_vm1, %v905_v43  ;;  %v960_v58 = vmax.f32 %v946_v49, 0.0  ;;  %v961_v63 = vmax.f32 %v947_v50, 0.0  ;;  %1032 = vst [vmem:[%s1644_s4 + $0x70] sm:$0xff] %v955_v51  ;;  %v894_v5 = vadd.f32 %v883_v45, %v870_v13  ;;  %v895_v6 = vadd.f32 %v883_v45, %v871_v23 }
 0x2c7   :  { %1033 = vst [vmem:[%s1644_s4 + $0x78] sm:$0xff] %v956_v52  ;;  %1034 = vst [vmem:[%s1644_s4 + $0x80] sm:$0xff] %v957_v55  ;;  %v896_v7 = vadd.f32 %v883_v45, %v872_v25  ;;  %v897_v10 = vadd.f32 %v883_v45, %v873_v24  ;;  %v898_v54 = vadd.f32 %v883_v45, %v874_v26  ;;  %v906_v14 = vmax.f32 %v892_v53, 0.0 }
 0x2c8   :  { %1035 = vst [vmem:[%s1644_s4 + $0x88] sm:$0xff] %v958_v56  ;;  %1036 = vst [vmem:[%s1644_s4 + $0x90] sm:$0xff] %v959_v57  ;;  %v907_v15 = vmax.f32 %v893_v0, 0.0  ;;  %v908_v17 = vmax.f32 %v894_v5, 0.0  ;;  %v909_v11 = vmax.f32 %v895_v6, 0.0  ;;  %v948_v18 = vadd.f32 %v1525_v36, %v883_v45 }
 0x2c9   :  { %1037 = vst [vmem:[%s1644_s4 + $0x98] sm:$0xff] %v960_v58  ;;  %1038 = vst.msk [vmem:[%s1644_s4 + $0xa0] sm:$0xff] %vm700_vm1, %v961_v63  ;;  %v910_v20 = vmax.f32 %v896_v7, 0.0  ;;  %v911_v21 = vmax.f32 %v897_v10, 0.0  ;;  %v912_v22 = vmax.f32 %v898_v54, 0.0  ;;  %v949_v59 = vadd.f32 %v1528_v40, %v883_v45 }
 0x2ca   :  { %920 = vst [vmem:[%s1644_s4 + $0x38] sm:$0xff] %v906_v14  ;;  %921 = vst [vmem:[%s1644_s4 + $0x40] sm:$0xff] %v907_v15  ;;  %v950_v61 = vadd.f32 %v1531_v1, %v883_v45  ;;  %v951_v27 = vadd.f32 %v1534_v2, %v883_v45  ;;  %v952_v60 = vadd.f32 %v1537_v4, %v883_v45  ;;  %v962_v12 = vmax.f32 %v948_v18, 0.0 }
 0x2cb   :  { %922 = vst [vmem:[%s1644_s4 + $0x48] sm:$0xff] %v908_v17  ;;  %923 = vst [vmem:[%s1644_s4 + $0x50] sm:$0xff] %v909_v11  ;;  %v953_v62 = vadd.f32 %v1540_v16, %v883_v45  ;;  %v954_v8 = vadd.f32 %v1543_v9, %v883_v45  ;;  %v963_v13 = vmax.f32 %v949_v59, 0.0 }
 0x2cc   :  { %924 = vst [vmem:[%s1644_s4 + $0x58] sm:$0xff] %v910_v20  ;;  %925 = vst [vmem:[%s1644_s4 + $0x60] sm:$0xff] %v911_v21  ;;  %v964_v23 = vmax.f32 %v950_v61, 0.0  ;;  %v965_v25 = vmax.f32 %v951_v27, 0.0  ;;  %v966_v24 = vmax.f32 %v952_v60, 0.0 }
 0x2cd   :  { %926 = vst.msk [vmem:[%s1644_s4 + $0x68] sm:$0xff] %vm700_vm1, %v912_v22  ;;  %v967_v26 = vmax.f32 %v953_v62, 0.0  ;;  %v968_v36 = vmax.f32 %v954_v8, 0.0  ;;  %1039 = vst [vmem:[%s1644_s4 + $0xa8] sm:$0xff] %v962_v12 }
 0x2ce   :  { %1040 = vst [vmem:[%s1644_s4 + $0xb0] sm:$0xff] %v963_v13  ;;  %1041 = vst [vmem:[%s1644_s4 + $0xb8] sm:$0xff] %v964_v23 }
 0x2cf   :  { %1042 = vst [vmem:[%s1644_s4 + $0xc0] sm:$0xff] %v965_v25  ;;  %1043 = vst [vmem:[%s1644_s4 + $0xc8] sm:$0xff] %v966_v24 }
 0x2d0   :  { %1044 = vst [vmem:[%s1644_s4 + $0xd0] sm:$0xff] %v967_v26  ;;  %1045 = vst.msk [vmem:[%s1644_s4 + $0xd8] sm:$0xff] %vm700_vm1, %v968_v36 }

// kernel: net22_2_forward.4
= control target key start
LH: loop header
LB: loop body
LE: loop exit
PB: predicated region body
PF: predicated region fallthrough
CT: control target
= control target key end

     0   :  { %v1797_v3 = vmov 0.0   ;;  %vm955_vm0 = vcmask 97280   ;;  %s3215_s0 = inlined_call_operand.vmem [shape: f32[2,128,780], index: 0, kind: input, shape index: {}]   ;;  %s3216_s1 = inlined_call_operand.vmem [shape: f32[32,128], index: 1, kind: input, shape index: {}]   ;;  %s3217_s2 = inlined_call_operand.vmem [shape: f32[32,1], index: 2, kind: input, shape index: {}]   ;;  %s3218_s3 = inlined_call_operand.vmem [shape: f32[32,1], index: 3, kind: input, shape index: {}]   ;;  %s3219_s4 = inlined_call_operand.vmem [shape: f32[2,32,780], index: 4, kind: output, shape index: {}]  }
   0x1   :  { %v127_v0 = vld [vmem:[%s3215_s0 + $0x350] sm:$0xff]  ;;  %v126_v1 = vld [vmem:[%s3215_s0 + $0x348] sm:$0xff]  ;;  %v129_v2 = vld [vmem:[%s3215_s0 + $0x360] sm:$0xff]  ;;  %197 = vmatprep.mubr.f32.mxu0 %v1797_v3  ;;  %286 = vmatprep.mubr.f32.mxu1 %v1797_v3 }
   0x2   :  { %133 = vmatprep.subr.mxu0 %v127_v0  ;;  %222 = vmatprep.subr.mxu1 %v129_v2  ;;  %v120_v4 = vld [vmem:[%s3215_s0 + $0x318] sm:$0xff]  ;;  %v119_v6 = vld [vmem:[%s3215_s0 + $0x310] sm:$0xff]  ;;  %v122_v7 = vld [vmem:[%s3215_s0 + $0x328] sm:$0xff] }
   0x3   :  { %v128_v5 = vld [vmem:[%s3215_s0 + $0x358] sm:$0xff]  ;;  %134 = vmatpush1.msra.mxu0 %v126_v1  ;;  %v113_v8 = vld [vmem:[%s3215_s0 + $0x2e0] sm:$0xff]  ;;  %v115_v11 = vld [vmem:[%s3215_s0 + $0x2f0] sm:$0xff] }
   0x4   :  { %223 = vmatpush1.msra.mxu1 %v128_v5  ;;  %v121_v9 = vld [vmem:[%s3215_s0 + $0x320] sm:$0xff]  ;;  %135 = vmatprep.subr.mxu0 %v120_v4  ;;  %v112_v10 = vld [vmem:[%s3215_s0 + $0x2d8] sm:$0xff]  ;;  %v106_v12 = vld [vmem:[%s3215_s0 + $0x2a8] sm:$0xff] }
   0x5   :  { %224 = vmatprep.subr.mxu1 %v122_v7  ;;  %136 = vmatpush1.msra.mxu0 %v119_v6  ;;  %v114_v13 = vld [vmem:[%s3215_s0 + $0x2e8] sm:$0xff]  ;;  %v108_v14 = vld [vmem:[%s3215_s0 + $0x2b8] sm:$0xff]  ;;  %v105_v15 = vld [vmem:[%s3215_s0 + $0x2a0] sm:$0xff] }
   0x6   :  { %225 = vmatpush1.msra.mxu1 %v121_v9  ;;  %137 = vmatprep.subr.mxu0 %v113_v8  ;;  %v107_v16 = vld [vmem:[%s3215_s0 + $0x2b0] sm:$0xff]  ;;  %v101_v18 = vld [vmem:[%s3215_s0 + $0x280] sm:$0xff]  ;;  %v98_v19 = vld [vmem:[%s3215_s0 + $0x268] sm:$0xff] }
   0x7   :  { %226 = vmatprep.subr.mxu1 %v115_v11  ;;  %138 = vmatpush1.msra.mxu0 %v112_v10  ;;  %v99_v17 = vld [vmem:[%s3215_s0 + $0x270] sm:$0xff]  ;;  %v100_v20 = vld [vmem:[%s3215_s0 + $0x278] sm:$0xff]  ;;  %v94_v22 = vld [vmem:[%s3215_s0 + $0x248] sm:$0xff] }
   0x8   :  { %227 = vmatpush1.msra.mxu1 %v114_v13  ;;  %139 = vmatprep.subr.mxu0 %v106_v12  ;;  %v92_v21 = vld [vmem:[%s3215_s0 + $0x238] sm:$0xff]  ;;  %v91_v23 = vld [vmem:[%s3215_s0 + $0x230] sm:$0xff]  ;;  %v93_v24 = vld [vmem:[%s3215_s0 + $0x240] sm:$0xff] }
   0x9   :  { %228 = vmatprep.subr.mxu1 %v108_v14  ;;  %140 = vmatpush1.msra.mxu0 %v105_v15  ;;  %v85_v25 = vld [vmem:[%s3215_s0 + $0x200] sm:$0xff]  ;;  %v87_v26 = vld [vmem:[%s3215_s0 + $0x210] sm:$0xff]  ;;  %v84_v27 = vld [vmem:[%s3215_s0 + $0x1f8] sm:$0xff] }
   0xa   :  { %229 = vmatpush1.msra.mxu1 %v107_v16  ;;  %141 = vmatprep.subr.mxu0 %v99_v17  ;;  %v86_v28 = vld [vmem:[%s3215_s0 + $0x208] sm:$0xff]  ;;  %v80_v30 = vld [vmem:[%s3215_s0 + $0x1d8] sm:$0xff]  ;;  %v77_v31 = vld [vmem:[%s3215_s0 + $0x1c0] sm:$0xff] }
   0xb   :  { %230 = vmatprep.subr.mxu1 %v101_v18  ;;  %142 = vmatpush1.msra.mxu0 %v98_v19  ;;  %v78_v29 = vld [vmem:[%s3215_s0 + $0x1c8] sm:$0xff]  ;;  %v79_v32 = vld [vmem:[%s3215_s0 + $0x1d0] sm:$0xff]  ;;  %v73_v34 = vld [vmem:[%s3215_s0 + $0x1a0] sm:$0xff] }
   0xc   :  { %231 = vmatpush1.msra.mxu1 %v100_v20  ;;  %143 = vmatprep.subr.mxu0 %v92_v21  ;;  %v71_v33 = vld [vmem:[%s3215_s0 + $0x190] sm:$0xff]  ;;  %v70_v35 = vld [vmem:[%s3215_s0 + $0x188] sm:$0xff]  ;;  %v72_v36 = vld [vmem:[%s3215_s0 + $0x198] sm:$0xff] }
   0xd   :  { %232 = vmatprep.subr.mxu1 %v94_v22  ;;  %144 = vmatpush1.msra.mxu0 %v91_v23  ;;  %v64_v37 = vld [vmem:[%s3215_s0 + $0x158] sm:$0xff]  ;;  %v66_v38 = vld [vmem:[%s3215_s0 + $0x168] sm:$0xff]  ;;  %v63_v39 = vld [vmem:[%s3215_s0 + $0x150] sm:$0xff] }
   0xe   :  { %233 = vmatpush1.msra.mxu1 %v93_v24  ;;  %145 = vmatprep.subr.mxu0 %v85_v25  ;;  %v65_v40 = vld [vmem:[%s3215_s0 + $0x160] sm:$0xff]  ;;  %v59_v42 = vld [vmem:[%s3215_s0 + $0x130] sm:$0xff]  ;;  %v56_v43 = vld [vmem:[%s3215_s0 + $0x118] sm:$0xff] }
   0xf   :  { %234 = vmatprep.subr.mxu1 %v87_v26  ;;  %146 = vmatpush1.msra.mxu0 %v84_v27  ;;  %v57_v41 = vld [vmem:[%s3215_s0 + $0x120] sm:$0xff]  ;;  %v58_v44 = vld [vmem:[%s3215_s0 + $0x128] sm:$0xff]  ;;  %v52_v46 = vld [vmem:[%s3215_s0 + $0xf8] sm:$0xff] }
  0x10   :  { %235 = vmatpush1.msra.mxu1 %v86_v28  ;;  %147 = vmatprep.subr.mxu0 %v78_v29  ;;  %v50_v45 = vld [vmem:[%s3215_s0 + $0xe8] sm:$0xff]  ;;  %v49_v47 = vld [vmem:[%s3215_s0 + $0xe0] sm:$0xff]  ;;  %v51_v48 = vld [vmem:[%s3215_s0 + $0xf0] sm:$0xff] }
  0x11   :  { %236 = vmatprep.subr.mxu1 %v80_v30  ;;  %148 = vmatpush1.msra.mxu0 %v77_v31  ;;  %v43_v49 = vld [vmem:[%s3215_s0 + $0xb0] sm:$0xff]  ;;  %v45_v50 = vld [vmem:[%s3215_s0 + $0xc0] sm:$0xff]  ;;  %v42_v51 = vld [vmem:[%s3215_s0 + $0xa8] sm:$0xff] }
  0x12   :  { %237 = vmatpush1.msra.mxu1 %v79_v32  ;;  %149 = vmatprep.subr.mxu0 %v71_v33  ;;  %v44_v52 = vld [vmem:[%s3215_s0 + $0xb8] sm:$0xff]  ;;  %v38_v54 = vld [vmem:[%s3215_s0 + $0x88] sm:$0xff]  ;;  %v35_v55 = vld [vmem:[%s3215_s0 + $0x70] sm:$0xff] }
  0x13   :  { %238 = vmatprep.subr.mxu1 %v73_v34  ;;  %150 = vmatpush1.msra.mxu0 %v70_v35  ;;  %v36_v53 = vld [vmem:[%s3215_s0 + $0x78] sm:$0xff]  ;;  %v37_v56 = vld [vmem:[%s3215_s0 + $0x80] sm:$0xff]  ;;  %v31_v58 = vld [vmem:[%s3215_s0 + $0x50] sm:$0xff] }
  0x14   :  { %239 = vmatpush1.msra.mxu1 %v72_v36  ;;  %151 = vmatprep.subr.mxu0 %v64_v37  ;;  %v29_v57 = vld [vmem:[%s3215_s0 + $0x40] sm:$0xff]  ;;  %v28_v59 = vld [vmem:[%s3215_s0 + $0x38] sm:$0xff]  ;;  %v30_v60 = vld [vmem:[%s3215_s0 + $0x48] sm:$0xff] }
  0x15   :  { %240 = vmatprep.subr.mxu1 %v66_v38  ;;  %152 = vmatpush1.msra.mxu0 %v63_v39  ;;  %v22_v61 = vld [vmem:[%s3215_s0 + $0x8] sm:$0xff]  ;;  %v24_v62 = vld [vmem:[%s3215_s0 + $0x18] sm:$0xff]  ;;  %v21_v63 = vld [vmem:[%s3215_s0] sm:$0xff] }
  0x16   :  { %241 = vmatpush1.msra.mxu1 %v65_v40  ;;  %153 = vmatprep.subr.mxu0 %v57_v41  ;;  %v23_v0 = vld [vmem:[%s3215_s0 + $0x10] sm:$0xff]  ;;  %v2021_v1 = vld [vmem:[%s3216_s1] sm:$0xff]  ;;  %v130_v4 = vld [vmem:[%s3215_s0 + $0x368] sm:$0xff] }
  0x17   :  { %242 = vmatprep.subr.mxu1 %v59_v42  ;;  %154 = vmatpush1.msra.mxu0 %v56_v43  ;;  %v131_v2 = vld [vmem:[%s3215_s0 + $0x370] sm:$0xff]  ;;  %v132_v5 = vld [vmem:[%s3215_s0 + $0x378] sm:$0xff]  ;;  %v125_v8 = vld [vmem:[%s3215_s0 + $0x340] sm:$0xff] }
  0x18   :  { %243 = vmatpush1.msra.mxu1 %v58_v44  ;;  %155 = vmatprep.subr.mxu0 %v50_v45  ;;  %v124_v6 = vld [vmem:[%s3215_s0 + $0x338] sm:$0xff]  ;;  %v123_v7 = vld [vmem:[%s3215_s0 + $0x330] sm:$0xff]  ;;  %v117_v9 = vld [vmem:[%s3215_s0 + $0x300] sm:$0xff] }
  0x19   :  { %244 = vmatprep.subr.mxu1 %v52_v46  ;;  %156 = vmatpush1.msra.mxu0 %v49_v47  ;;  %v116_v10 = vld [vmem:[%s3215_s0 + $0x2f8] sm:$0xff]  ;;  %v118_v11 = vld [vmem:[%s3215_s0 + $0x308] sm:$0xff]  ;;  %v109_v13 = vld [vmem:[%s3215_s0 + $0x2c0] sm:$0xff] }
  0x1a   :  { %245 = vmatpush1.msra.mxu1 %v51_v48  ;;  %157 = vmatprep.subr.mxu0 %v43_v49  ;;  %v110_v12 = vld [vmem:[%s3215_s0 + $0x2c8] sm:$0xff]  ;;  %v111_v14 = vld [vmem:[%s3215_s0 + $0x2d0] sm:$0xff]  ;;  %v104_v17 = vld [vmem:[%s3215_s0 + $0x298] sm:$0xff] }
  0x1b   :  { %246 = vmatprep.subr.mxu1 %v45_v50  ;;  %158 = vmatpush1.msra.mxu0 %v42_v51  ;;  %v103_v15 = vld [vmem:[%s3215_s0 + $0x290] sm:$0xff]  ;;  %v102_v16 = vld [vmem:[%s3215_s0 + $0x288] sm:$0xff]  ;;  %v96_v18 = vld [vmem:[%s3215_s0 + $0x258] sm:$0xff] }
  0x1c   :  { %247 = vmatpush1.msra.mxu1 %v44_v52  ;;  %159 = vmatprep.subr.mxu0 %v36_v53  ;;  %v95_v19 = vld [vmem:[%s3215_s0 + $0x250] sm:$0xff]  ;;  %v97_v20 = vld [vmem:[%s3215_s0 + $0x260] sm:$0xff]  ;;  %v88_v22 = vld [vmem:[%s3215_s0 + $0x218] sm:$0xff] }
  0x1d   :  { %248 = vmatprep.subr.mxu1 %v38_v54  ;;  %160 = vmatpush1.msra.mxu0 %v35_v55  ;;  %v89_v21 = vld [vmem:[%s3215_s0 + $0x220] sm:$0xff]  ;;  %v90_v23 = vld [vmem:[%s3215_s0 + $0x228] sm:$0xff]  ;;  %v83_v26 = vld [vmem:[%s3215_s0 + $0x1f0] sm:$0xff] }
  0x1e   :  { %249 = vmatpush1.msra.mxu1 %v37_v56  ;;  %161 = vmatprep.subr.mxu0 %v29_v57  ;;  %v82_v24 = vld [vmem:[%s3215_s0 + $0x1e8] sm:$0xff]  ;;  %v81_v25 = vld [vmem:[%s3215_s0 + $0x1e0] sm:$0xff]  ;;  %v75_v27 = vld [vmem:[%s3215_s0 + $0x1b0] sm:$0xff] }
  0x1f   :  { %250 = vmatprep.subr.mxu1 %v31_v58  ;;  %162 = vmatpush1.msra.mxu0 %v28_v59  ;;  %v74_v28 = vld [vmem:[%s3215_s0 + $0x1a8] sm:$0xff]  ;;  %v76_v29 = vld [vmem:[%s3215_s0 + $0x1b8] sm:$0xff]  ;;  %v69_v32 = vld [vmem:[%s3215_s0 + $0x180] sm:$0xff] }
  0x20   :  { %251 = vmatpush1.msra.mxu1 %v30_v60  ;;  %163 = vmatprep.subr.mxu0 %v22_v61  ;;  %v68_v30 = vld [vmem:[%s3215_s0 + $0x178] sm:$0xff]  ;;  %v2112_v31 = vld [vmem:[%s3216_s1 + $0x8] sm:$0xff]  ;;  %v67_v33 = vld [vmem:[%s3215_s0 + $0x170] sm:$0xff] }
  0x21   :  { %252 = vmatprep.subr.mxu1 %v24_v62  ;;  %164 = vmatpush1.msra.mxu0 %v21_v63  ;;  %v61_v34 = vld [vmem:[%s3215_s0 + $0x140] sm:$0xff]  ;;  %v60_v35 = vld [vmem:[%s3215_s0 + $0x138] sm:$0xff]  ;;  %v62_v36 = vld [vmem:[%s3215_s0 + $0x148] sm:$0xff] }
  0x22   :  { %253 = vmatpush1.msra.mxu1 %v23_v0  ;;  %198 = vmatmul.mubr.f32.vlgmr.msra.gmra.mxu0 %v2021_v1  ;;  %v54_v37 = vld [vmem:[%s3215_s0 + $0x108] sm:$0xff]  ;;  %v2139_v38 = vld [vmem:[%s3216_s1 + $0x10] sm:$0xff]  ;;  %v53_v40 = vld [vmem:[%s3215_s0 + $0x100] sm:$0xff] }
  0x23   :  { %311 = vmatprep.subr.mxu0 %v131_v2  ;;  %1709 = vmatprep.subr.mxu1 %v132_v5  ;;  %v55_v39 = vld [vmem:[%s3215_s0 + $0x110] sm:$0xff]  ;;  %v46_v42 = vld [vmem:[%s3215_s0 + $0xc8] sm:$0xff]  ;;  %v48_v43 = vld [vmem:[%s3215_s0 + $0xd8] sm:$0xff] }
  0x24   :  { %312 = vmatpush1.msra.mxu0 %v130_v4  ;;  %287 = vmatmul.mubr.f32.vlgmr.msra.gmra.mxu1 %v2021_v1  ;;  %v47_v41 = vld [vmem:[%s3215_s0 + $0xd0] sm:$0xff]  ;;  %v40_v44 = vld [vmem:[%s3215_s0 + $0x98] sm:$0xff]  ;;  %v41_v46 = vld [vmem:[%s3215_s0 + $0xa0] sm:$0xff] }
  0x25   :  { %313 = vmatprep.subr.mxu0 %v124_v6  ;;  %1710 = vmatpush3.msra.mxu1 %v132_v5  ;;  %v2166_v45 = vld [vmem:[%s3216_s1 + $0x18] sm:$0xff]  ;;  %v39_v47 = vld [vmem:[%s3215_s0 + $0x90] sm:$0xff]  ;;  %v33_v48 = vld [vmem:[%s3215_s0 + $0x60] sm:$0xff] }
  0x26   :  { %314 = vmatpush1.msra.mxu0 %v123_v7  ;;  %1711 = vmatprep.subr.mxu1 %v125_v8  ;;  %v32_v49 = vld [vmem:[%s3215_s0 + $0x58] sm:$0xff]  ;;  %v34_v50 = vld [vmem:[%s3215_s0 + $0x68] sm:$0xff]  ;;  %v25_v52 = vld [vmem:[%s3215_s0 + $0x20] sm:$0xff] }
  0x27   :  { %315 = vmatprep.subr.mxu0 %v117_v9  ;;  %1712 = vmatpush3.msra.mxu1 %v125_v8  ;;  %v26_v51 = vld [vmem:[%s3215_s0 + $0x28] sm:$0xff]  ;;  %v27_v53 = vld [vmem:[%s3215_s0 + $0x30] sm:$0xff]  ;;  %v1637_v56 = vld [vmem:[%s3215_s0 + $0x6e0] sm:$0xff] }
  0x28   :  { %316 = vmatpush1.msra.mxu0 %v116_v10  ;;  %1713 = vmatprep.subr.mxu1 %v118_v11  ;;  %v1635_v54 = vld [vmem:[%s3215_s0 + $0x6d0] sm:$0xff]  ;;  %v1634_v55 = vld [vmem:[%s3215_s0 + $0x6c8] sm:$0xff]  ;;  %v1628_v57 = vld [vmem:[%s3215_s0 + $0x698] sm:$0xff] }
  0x29   :  { %317 = vmatprep.subr.mxu0 %v110_v12  ;;  %1714 = vmatpush3.msra.mxu1 %v118_v11  ;;  %v1636_v58 = vld [vmem:[%s3215_s0 + $0x6d8] sm:$0xff]  ;;  %v1627_v59 = vld [vmem:[%s3215_s0 + $0x690] sm:$0xff]  ;;  %v1630_v60 = vld [vmem:[%s3215_s0 + $0x6a8] sm:$0xff] }
  0x2a   :  { %318 = vmatpush1.msra.mxu0 %v109_v13  ;;  %1715 = vmatprep.subr.mxu1 %v111_v14  ;;  %v1621_v61 = vld [vmem:[%s3215_s0 + $0x660] sm:$0xff]  ;;  %v1620_v63 = vld [vmem:[%s3215_s0 + $0x658] sm:$0xff]  ;;  %v1623_v0 = vld [vmem:[%s3215_s0 + $0x670] sm:$0xff] }
  0x2b   :  { %319 = vmatprep.subr.mxu0 %v103_v15  ;;  %1716 = vmatpush3.msra.mxu1 %v111_v14  ;;  %v1629_v62 = vld [vmem:[%s3215_s0 + $0x6a0] sm:$0xff]  ;;  %v1614_v2 = vld [vmem:[%s3215_s0 + $0x628] sm:$0xff]  ;;  %v1616_v6 = vld [vmem:[%s3215_s0 + $0x638] sm:$0xff] }
  0x2c   :  { %320 = vmatpush1.msra.mxu0 %v102_v16  ;;  %1717 = vmatprep.subr.mxu1 %v104_v17  ;;  %v1622_v4 = vld [vmem:[%s3215_s0 + $0x668] sm:$0xff]  ;;  %v1613_v5 = vld [vmem:[%s3215_s0 + $0x620] sm:$0xff]  ;;  %v1607_v7 = vld [vmem:[%s3215_s0 + $0x5f0] sm:$0xff] }
  0x2d   :  { %321 = vmatprep.subr.mxu0 %v96_v18  ;;  %1718 = vmatpush3.msra.mxu1 %v104_v17  ;;  %v1615_v8 = vld [vmem:[%s3215_s0 + $0x630] sm:$0xff]  ;;  %v1606_v9 = vld [vmem:[%s3215_s0 + $0x5e8] sm:$0xff]  ;;  %v1609_v10 = vld [vmem:[%s3215_s0 + $0x600] sm:$0xff] }
  0x2e   :  { %322 = vmatpush1.msra.mxu0 %v95_v19  ;;  %1719 = vmatprep.subr.mxu1 %v97_v20  ;;  %v1600_v11 = vld [vmem:[%s3215_s0 + $0x5b8] sm:$0xff]  ;;  %v1599_v13 = vld [vmem:[%s3215_s0 + $0x5b0] sm:$0xff]  ;;  %v1602_v14 = vld [vmem:[%s3215_s0 + $0x5c8] sm:$0xff] }
  0x2f   :  { %323 = vmatprep.subr.mxu0 %v89_v21  ;;  %1720 = vmatpush3.msra.mxu1 %v97_v20  ;;  %v1608_v12 = vld [vmem:[%s3215_s0 + $0x5f8] sm:$0xff]  ;;  %v1593_v15 = vld [vmem:[%s3215_s0 + $0x580] sm:$0xff]  ;;  %v1595_v18 = vld [vmem:[%s3215_s0 + $0x590] sm:$0xff] }
  0x30   :  { %324 = vmatpush1.msra.mxu0 %v88_v22  ;;  %1721 = vmatprep.subr.mxu1 %v90_v23  ;;  %v1601_v16 = vld [vmem:[%s3215_s0 + $0x5c0] sm:$0xff]  ;;  %v1592_v17 = vld [vmem:[%s3215_s0 + $0x578] sm:$0xff]  ;;  %v1586_v19 = vld [vmem:[%s3215_s0 + $0x548] sm:$0xff] }
  0x31   :  { %325 = vmatprep.subr.mxu0 %v82_v24  ;;  %1722 = vmatpush3.msra.mxu1 %v90_v23  ;;  %v1594_v20 = vld [vmem:[%s3215_s0 + $0x588] sm:$0xff]  ;;  %v1585_v21 = vld [vmem:[%s3215_s0 + $0x540] sm:$0xff]  ;;  %v1588_v22 = vld [vmem:[%s3215_s0 + $0x558] sm:$0xff] }
  0x32   :  { %326 = vmatpush1.msra.mxu0 %v81_v25  ;;  %1723 = vmatprep.subr.mxu1 %v83_v26  ;;  %v1579_v23 = vld [vmem:[%s3215_s0 + $0x510] sm:$0xff]  ;;  %v1578_v25 = vld [vmem:[%s3215_s0 + $0x508] sm:$0xff] }
  0x33   :  { %327 = vmatprep.subr.mxu0 %v75_v27  ;;  %1724 = vmatpush3.msra.mxu1 %v83_v26  ;;  %v1587_v24 = vld [vmem:[%s3215_s0 + $0x550] sm:$0xff]  ;;  %v1581_v26 = vld [vmem:[%s3215_s0 + $0x520] sm:$0xff]  ;;  %v1572_v27 = vld [vmem:[%s3215_s0 + $0x4d8] sm:$0xff] }
  0x34   :  { %328 = vmatpush1.msra.mxu0 %v74_v28  ;;  %1725 = vmatprep.subr.mxu1 %v76_v29  ;;  %v1580_v28 = vld [vmem:[%s3215_s0 + $0x518] sm:$0xff] }
  0x35   :  { %203 = vmatprep.mubr.f32.mxu0 %v1797_v3  ;;  %329 = vmatprep.subr.mxu0 %v68_v30  ;;  %v1574_v30 = vld [vmem:[%s3215_s0 + $0x4e8] sm:$0xff] }
  0x36   :  { %1726 = vmatpush3.msra.mxu1 %v76_v29  ;;  %204 = vmatmul.mubr.f32.gmra.mxu0 %v2112_v31  ;;  %v1571_v29 = vld [vmem:[%s3215_s0 + $0x4d0] sm:$0xff] }
  0x37   :  { %1727 = vmatprep.subr.mxu1 %v69_v32  ;;  %330 = vmatpush1.msra.mxu0 %v67_v33  ;;  %v1573_v33 = vld [vmem:[%s3215_s0 + $0x4e0] sm:$0xff] }
  0x38   :  { %292 = vmatprep.mubr.f32.mxu1 %v1797_v3  ;;  %331 = vmatprep.subr.mxu0 %v61_v34  ;;  %v1564_v34 = vld [vmem:[%s3215_s0 + $0x498] sm:$0xff] }
  0x39   :  { %1728 = vmatpush3.msra.mxu1 %v69_v32  ;;  %332 = vmatpush1.msra.mxu0 %v60_v35  ;;  %v1565_v32 = vld [vmem:[%s3215_s0 + $0x4a0] sm:$0xff]  ;;  %v1567_v35 = vld [vmem:[%s3215_s0 + $0x4b0] sm:$0xff] }
  0x3a   :  { %293 = vmatmul.mubr.f32.gmra.mxu1 %v2112_v31  ;;  %1729 = vmatprep.subr.mxu1 %v62_v36 }
  0x3b   :  { %209 = vmatprep.mubr.f32.mxu0 %v1797_v3  ;;  %333 = vmatprep.subr.mxu0 %v54_v37  ;;  %v1566_v37 = vld [vmem:[%s3215_s0 + $0x4a8] sm:$0xff] }
  0x3c   :  { %1730 = vmatpush3.msra.mxu1 %v62_v36  ;;  %210 = vmatmul.mubr.f32.gmra.mxu0 %v2139_v38  ;;  %v1558_v36 = vld [vmem:[%s3215_s0 + $0x468] sm:$0xff] }
  0x3d   :  { %1731 = vmatprep.subr.mxu1 %v55_v39  ;;  %334 = vmatpush1.msra.mxu0 %v53_v40  ;;  %v1560_v40 = vld [vmem:[%s3215_s0 + $0x478] sm:$0xff] }
  0x3e   :  { %298 = vmatprep.mubr.f32.mxu1 %v1797_v3  ;;  %335 = vmatprep.subr.mxu0 %v47_v41  ;;  %v1551_v41 = vld [vmem:[%s3215_s0 + $0x430] sm:$0xff] }
  0x3f   :  { %1732 = vmatpush3.msra.mxu1 %v55_v39  ;;  %336 = vmatpush1.msra.mxu0 %v46_v42  ;;  %v1557_v39 = vld [vmem:[%s3215_s0 + $0x460] sm:$0xff]  ;;  %v1559_v42 = vld [vmem:[%s3215_s0 + $0x470] sm:$0xff] }
  0x40   :  { %299 = vmatmul.mubr.f32.gmra.mxu1 %v2139_v38  ;;  %1733 = vmatprep.subr.mxu1 %v48_v43 }
  0x41   :  { %215 = vmatprep.mubr.f32.mxu0 %v1797_v3  ;;  %337 = vmatprep.subr.mxu0 %v40_v44  ;;  %v1553_v44 = vld [vmem:[%s3215_s0 + $0x440] sm:$0xff] }
  0x42   :  { %1734 = vmatpush3.msra.mxu1 %v48_v43  ;;  %216 = vmatmul.mubr.f32.gmra.mxu0 %v2166_v45  ;;  %v1550_v43 = vld [vmem:[%s3215_s0 + $0x428] sm:$0xff] }
  0x43   :  { %1735 = vmatprep.subr.mxu1 %v41_v46  ;;  %338 = vmatpush1.msra.mxu0 %v39_v47  ;;  %v1552_v47 = vld [vmem:[%s3215_s0 + $0x438] sm:$0xff] }
  0x44   :  { %304 = vmatprep.mubr.f32.mxu1 %v1797_v3  ;;  %339 = vmatprep.subr.mxu0 %v33_v48  ;;  %v1543_v48 = vld [vmem:[%s3215_s0 + $0x3f0] sm:$0xff] }
  0x45   :  { %1736 = vmatpush3.msra.mxu1 %v41_v46  ;;  %340 = vmatpush1.msra.mxu0 %v32_v49  ;;  %v1544_v46 = vld [vmem:[%s3215_s0 + $0x3f8] sm:$0xff]  ;;  %v1546_v49 = vld [vmem:[%s3215_s0 + $0x408] sm:$0xff] }
  0x46   :  { %305 = vmatmul.mubr.f32.gmra.mxu1 %v2166_v45  ;;  %1737 = vmatprep.subr.mxu1 %v34_v50 }
  0x47   :  { %341 = vmatprep.subr.mxu0 %v26_v51  ;;  %1738 = vmatpush3.msra.mxu1 %v34_v50  ;;  %v1537_v50 = vld [vmem:[%s3215_s0 + $0x3c0] sm:$0xff] }
  0x48   :  { %342 = vmatpush1.msra.mxu0 %v25_v52  ;;  %375 = vmatprep.mubr.f32.mxu0 %v1797_v3  ;;  %v1545_v51 = vld [vmem:[%s3215_s0 + $0x400] sm:$0xff]  ;;  %v1536_v52 = vld [vmem:[%s3215_s0 + $0x3b8] sm:$0xff] }
  0x49   :  { %1739 = vmatprep.subr.mxu1 %v27_v53  ;;  %376 = vmatmul.mubr.f32.vlgmr.msra.gmra.mxu0 %v2021_v1 }
  0x4a   :  { %1740 = vmatpush3.msra.mxu1 %v27_v53  ;;  %1741 = vmatprep.mubr.f32.mxu1 %v2021_v1  ;;  %v1539_v53 = vld [vmem:[%s3215_s0 + $0x3d0] sm:$0xff] }
  0x4b   :  { %598 = vmatprep.subr.mxu0 %v1635_v54  ;;  %1742 = vmatmul.mubr.f32.vlgmr.msra.gmra.mxu1 %v2112_v31  ;;  %v1530_v54 = vld [vmem:[%s3215_s0 + $0x388] sm:$0xff] }
  0x4c   :  { %599 = vmatpush1.msra.mxu0 %v1634_v55  ;;  %687 = vmatprep.subr.mxu1 %v1637_v56  ;;  %v1538_v55 = vld [vmem:[%s3215_s0 + $0x3c8] sm:$0xff]  ;;  %v1529_v56 = vld [vmem:[%s3215_s0 + $0x380] sm:$0xff] }
  0x4d   :  { %600 = vmatprep.subr.mxu0 %v1628_v57  ;;  %688 = vmatpush1.msra.mxu1 %v1636_v58  ;;  %v1532_v57 = vld [vmem:[%s3215_s0 + $0x398] sm:$0xff]  ;;  %v1531_v58 = vld [vmem:[%s3215_s0 + $0x390] sm:$0xff] }
  0x4e   :  { %381 = vmatprep.mubr.f32.mxu0 %v1797_v3  ;;  %601 = vmatpush1.msra.mxu0 %v1627_v59  ;;  %v1639_v59 = vld [vmem:[%s3215_s0 + $0x6f0] sm:$0xff] }
  0x4f   :  { %689 = vmatprep.subr.mxu1 %v1630_v60  ;;  %382 = vmatmul.mubr.f32.gmra.mxu0 %v2112_v31  ;;  %v1638_v60 = vld [vmem:[%s3215_s0 + $0x6e8] sm:$0xff] }
  0x50   :  { %602 = vmatprep.subr.mxu0 %v1621_v61  ;;  %690 = vmatpush1.msra.mxu1 %v1629_v62  ;;  %v1640_v61 = vld [vmem:[%s3215_s0 + $0x6f8] sm:$0xff] }
  0x51   :  { %603 = vmatpush1.msra.mxu0 %v1620_v63  ;;  %691 = vmatprep.subr.mxu1 %v1623_v0  ;;  %v1632_v62 = vld [vmem:[%s3215_s0 + $0x6b8] sm:$0xff]  ;;  %v1631_v63 = vld [vmem:[%s3215_s0 + $0x6b0] sm:$0xff]  ;;  %v1633_v0 = vld [vmem:[%s3215_s0 + $0x6c0] sm:$0xff] }
  0x52   :  { %604 = vmatprep.subr.mxu0 %v1614_v2  ;;  %692 = vmatpush1.msra.mxu1 %v1622_v4  ;;  %v1625_v2 = vld [vmem:[%s3215_s0 + $0x680] sm:$0xff]  ;;  %v1624_v4 = vld [vmem:[%s3215_s0 + $0x678] sm:$0xff] }
  0x53   :  { %387 = vmatprep.mubr.f32.mxu0 %v1797_v3  ;;  %605 = vmatpush1.msra.mxu0 %v1613_v5  ;;  %v1626_v5 = vld [vmem:[%s3215_s0 + $0x688] sm:$0xff] }
  0x54   :  { %693 = vmatprep.subr.mxu1 %v1616_v6  ;;  %388 = vmatmul.mubr.f32.gmra.mxu0 %v2139_v38  ;;  %v1618_v6 = vld [vmem:[%s3215_s0 + $0x648] sm:$0xff] }
  0x55   :  { %1744 = vmatprep.mubr.f32.mxu1 %v2139_v38  ;;  %606 = vmatprep.subr.mxu0 %v1607_v7  ;;  %v1617_v7 = vld [vmem:[%s3215_s0 + $0x640] sm:$0xff] }
  0x56   :  { %694 = vmatpush1.msra.mxu1 %v1615_v8  ;;  %607 = vmatpush1.msra.mxu0 %v1606_v9  ;;  %v1619_v8 = vld [vmem:[%s3215_s0 + $0x650] sm:$0xff] }
  0x57   :  { %1745 = vmatmul.mubr.f32.gmra.mxu1 %v2166_v45  ;;  %695 = vmatprep.subr.mxu1 %v1609_v10  ;;  %v1611_v9 = vld [vmem:[%s3215_s0 + $0x610] sm:$0xff]  ;;  %v1610_v10 = vld [vmem:[%s3215_s0 + $0x608] sm:$0xff] }
  0x58   :  { %608 = vmatprep.subr.mxu0 %v1600_v11  ;;  %696 = vmatpush1.msra.mxu1 %v1608_v12  ;;  %v1612_v11 = vld [vmem:[%s3215_s0 + $0x618] sm:$0xff] }
  0x59   :  { %393 = vmatprep.mubr.f32.mxu0 %v1797_v3  ;;  %609 = vmatpush1.msra.mxu0 %v1599_v13  ;;  %v1604_v12 = vld [vmem:[%s3215_s0 + $0x5d8] sm:$0xff]  ;;  %v1603_v13 = vld [vmem:[%s3215_s0 + $0x5d0] sm:$0xff] }
  0x5a   :  { %697 = vmatprep.subr.mxu1 %v1602_v14  ;;  %394 = vmatmul.mubr.f32.gmra.mxu0 %v2166_v45  ;;  %v1605_v14 = vld [vmem:[%s3215_s0 + $0x5e0] sm:$0xff] }
  0x5b   :  { %610 = vmatprep.subr.mxu0 %v1593_v15  ;;  %698 = vmatpush1.msra.mxu1 %v1601_v16  ;;  %v1597_v15 = vld [vmem:[%s3215_s0 + $0x5a0] sm:$0xff]  ;;  %v1596_v16 = vld [vmem:[%s3215_s0 + $0x598] sm:$0xff] }
  0x5c   :  { %611 = vmatpush1.msra.mxu0 %v1592_v17  ;;  %699 = vmatprep.subr.mxu1 %v1595_v18  ;;  %v1598_v17 = vld [vmem:[%s3215_s0 + $0x5a8] sm:$0xff] }
  0x5d   :  { %612 = vmatprep.subr.mxu0 %v1586_v19  ;;  %700 = vmatpush1.msra.mxu1 %v1594_v20  ;;  %v1590_v18 = vld [vmem:[%s3215_s0 + $0x568] sm:$0xff]  ;;  %v1589_v19 = vld [vmem:[%s3215_s0 + $0x560] sm:$0xff]  ;;  %v1591_v20 = vld [vmem:[%s3215_s0 + $0x570] sm:$0xff] }
  0x5e   :  { %613 = vmatpush1.msra.mxu0 %v1585_v21  ;;  %701 = vmatprep.subr.mxu1 %v1588_v22  ;;  %v1583_v21 = vld [vmem:[%s3215_s0 + $0x530] sm:$0xff]  ;;  %v1582_v22 = vld [vmem:[%s3215_s0 + $0x528] sm:$0xff] }
  0x5f   :  { %614 = vmatprep.subr.mxu0 %v1579_v23  ;;  %702 = vmatpush1.msra.mxu1 %v1587_v24  ;;  %v1584_v23 = vld [vmem:[%s3215_s0 + $0x538] sm:$0xff] }
  0x60   :  { %615 = vmatpush1.msra.mxu0 %v1578_v25  ;;  %703 = vmatprep.subr.mxu1 %v1581_v26  ;;  %v1576_v24 = vld [vmem:[%s3215_s0 + $0x4f8] sm:$0xff]  ;;  %v1575_v25 = vld [vmem:[%s3215_s0 + $0x4f0] sm:$0xff]  ;;  %v1577_v26 = vld [vmem:[%s3215_s0 + $0x500] sm:$0xff] }
  0x61   :  { %616 = vmatprep.subr.mxu0 %v1572_v27  ;;  %704 = vmatpush1.msra.mxu1 %v1580_v28  ;;  %v1569_v27 = vld [vmem:[%s3215_s0 + $0x4c0] sm:$0xff]  ;;  %v1568_v28 = vld [vmem:[%s3215_s0 + $0x4b8] sm:$0xff] }
  0x62   :  { %617 = vmatpush1.msra.mxu0 %v1571_v29  ;;  %705 = vmatprep.subr.mxu1 %v1574_v30  ;;  %v1570_v29 = vld [vmem:[%s3215_s0 + $0x4c8] sm:$0xff] }
  0x63   :  { %618 = vmatprep.subr.mxu0 %v1565_v32  ;;  %706 = vmatpush1.msra.mxu1 %v1573_v33  ;;  %v1562_v30 = vld [vmem:[%s3215_s0 + $0x488] sm:$0xff]  ;;  %v1561_v32 = vld [vmem:[%s3215_s0 + $0x480] sm:$0xff]  ;;  %v1563_v33 = vld [vmem:[%s3215_s0 + $0x490] sm:$0xff] }
  0x64   :  { %619 = vmatpush1.msra.mxu0 %v1564_v34  ;;  %707 = vmatprep.subr.mxu1 %v1567_v35  ;;  %v1555_v34 = vld [vmem:[%s3215_s0 + $0x450] sm:$0xff]  ;;  %v1554_v35 = vld [vmem:[%s3215_s0 + $0x448] sm:$0xff] }
  0x65   :  { %620 = vmatprep.subr.mxu0 %v1558_v36  ;;  %708 = vmatpush1.msra.mxu1 %v1566_v37  ;;  %v1556_v36 = vld [vmem:[%s3215_s0 + $0x458] sm:$0xff] }
  0x66   :  { %621 = vmatpush1.msra.mxu0 %v1557_v39  ;;  %709 = vmatprep.subr.mxu1 %v1560_v40  ;;  %v1548_v37 = vld [vmem:[%s3215_s0 + $0x418] sm:$0xff]  ;;  %v1547_v39 = vld [vmem:[%s3215_s0 + $0x410] sm:$0xff]  ;;  %v1549_v40 = vld [vmem:[%s3215_s0 + $0x420] sm:$0xff] }
  0x67   :  { %622 = vmatprep.subr.mxu0 %v1551_v41  ;;  %710 = vmatpush1.msra.mxu1 %v1559_v42  ;;  %v1541_v41 = vld [vmem:[%s3215_s0 + $0x3e0] sm:$0xff]  ;;  %v1540_v42 = vld [vmem:[%s3215_s0 + $0x3d8] sm:$0xff] }
  0x68   :  { %623 = vmatpush1.msra.mxu0 %v1550_v43  ;;  %711 = vmatprep.subr.mxu1 %v1553_v44  ;;  %v1542_v43 = vld [vmem:[%s3215_s0 + $0x3e8] sm:$0xff] }
  0x69   :  { %624 = vmatprep.subr.mxu0 %v1544_v46  ;;  %712 = vmatpush1.msra.mxu1 %v1552_v47  ;;  %v1534_v44 = vld [vmem:[%s3215_s0 + $0x3a8] sm:$0xff]  ;;  %v1533_v46 = vld [vmem:[%s3215_s0 + $0x3a0] sm:$0xff]  ;;  %v1535_v47 = vld [vmem:[%s3215_s0 + $0x3b0] sm:$0xff] }
  0x6a   :  { %625 = vmatpush1.msra.mxu0 %v1543_v48  ;;  %713 = vmatprep.subr.mxu1 %v1546_v49 }
  0x6b   :  { %626 = vmatprep.subr.mxu0 %v1537_v50  ;;  %714 = vmatpush1.msra.mxu1 %v1545_v51 }
  0x6c   :  { %627 = vmatpush1.msra.mxu0 %v1536_v52  ;;  %715 = vmatprep.subr.mxu1 %v1539_v53 }
  0x6d   :  { %628 = vmatprep.subr.mxu0 %v1530_v54  ;;  %716 = vmatpush1.msra.mxu1 %v1538_v55 }
  0x6e   :  { %629 = vmatpush1.msra.mxu0 %v1529_v56  ;;  %662 = vmatprep.mubr.f32.mxu0 %v1797_v3 }
  0x6f   :  { %717 = vmatprep.subr.mxu1 %v1532_v57  ;;  %663 = vmatmul.mubr.f32.vlgmr.msra.gmra.mxu0 %v2021_v1 }
  0x70   :  { %718 = vmatpush1.msra.mxu1 %v1531_v58  ;;  %776 = vmatprep.subr.mxu0 %v1639_v59 }
  0x71   :  { %751 = vmatprep.mubr.f32.mxu1 %v1797_v3  ;;  %777 = vmatpush1.msra.mxu0 %v1638_v60 }
  0x72   :  { %1747 = vmatprep.subr.mxu1 %v1640_v61  ;;  %752 = vmatmul.mubr.f32.vlgmr.msra.gmra.mxu1 %v2021_v1 }
  0x73   :  { %778 = vmatprep.subr.mxu0 %v1632_v62  ;;  %1748 = vmatpush3.msra.mxu1 %v1640_v61 }
  0x74   :  { %779 = vmatpush1.msra.mxu0 %v1631_v63  ;;  %1749 = vmatprep.subr.mxu1 %v1633_v0 }
  0x75   :  { %780 = vmatprep.subr.mxu0 %v1625_v2  ;;  %1750 = vmatpush3.msra.mxu1 %v1633_v0 }
  0x76   :  { %781 = vmatpush1.msra.mxu0 %v1624_v4  ;;  %1751 = vmatprep.subr.mxu1 %v1626_v5 }
  0x77   :  { %782 = vmatprep.subr.mxu0 %v1618_v6  ;;  %1752 = vmatpush3.msra.mxu1 %v1626_v5 }
  0x78   :  { %783 = vmatpush1.msra.mxu0 %v1617_v7  ;;  %1753 = vmatprep.subr.mxu1 %v1619_v8 }
  0x79   :  { %784 = vmatprep.subr.mxu0 %v1611_v9  ;;  %1754 = vmatpush3.msra.mxu1 %v1619_v8 }
  0x7a   :  { %785 = vmatpush1.msra.mxu0 %v1610_v10  ;;  %1755 = vmatprep.subr.mxu1 %v1612_v11 }
  0x7b   :  { %786 = vmatprep.subr.mxu0 %v1604_v12  ;;  %1756 = vmatpush3.msra.mxu1 %v1612_v11 }
  0x7c   :  { %787 = vmatpush1.msra.mxu0 %v1603_v13  ;;  %1757 = vmatprep.subr.mxu1 %v1605_v14 }
  0x7d   :  { %788 = vmatprep.subr.mxu0 %v1597_v15  ;;  %1758 = vmatpush3.msra.mxu1 %v1605_v14 }
  0x7e   :  { %789 = vmatpush1.msra.mxu0 %v1596_v16  ;;  %1759 = vmatprep.subr.mxu1 %v1598_v17 }
  0x7f   :  { %790 = vmatprep.subr.mxu0 %v1590_v18  ;;  %1760 = vmatpush3.msra.mxu1 %v1598_v17 }
  0x80   :  { %791 = vmatpush1.msra.mxu0 %v1589_v19  ;;  %1761 = vmatprep.subr.mxu1 %v1591_v20 }
  0x81   :  { %792 = vmatprep.subr.mxu0 %v1583_v21  ;;  %1762 = vmatpush3.msra.mxu1 %v1591_v20 }
  0x82   :  { %668 = vmatprep.mubr.f32.mxu0 %v1797_v3  ;;  %793 = vmatpush1.msra.mxu0 %v1582_v22 }
  0x83   :  { %1763 = vmatprep.subr.mxu1 %v1584_v23  ;;  %669 = vmatmul.mubr.f32.gmra.mxu0 %v2112_v31 }
  0x84   :  { %794 = vmatprep.subr.mxu0 %v1576_v24  ;;  %1764 = vmatpush3.msra.mxu1 %v1584_v23 }
  0x85   :  { %795 = vmatpush1.msra.mxu0 %v1575_v25  ;;  %1765 = vmatprep.subr.mxu1 %v1577_v26 }
  0x86   :  { %757 = vmatprep.mubr.f32.mxu1 %v1797_v3  ;;  %796 = vmatprep.subr.mxu0 %v1569_v27 }
  0x87   :  { %1766 = vmatpush3.msra.mxu1 %v1577_v26  ;;  %674 = vmatprep.mubr.f32.mxu0 %v1797_v3 }
  0x88   :  { %758 = vmatmul.mubr.f32.gmra.mxu1 %v2112_v31  ;;  %797 = vmatpush1.msra.mxu0 %v1568_v28 }
  0x89   :  { %1767 = vmatprep.subr.mxu1 %v1570_v29  ;;  %675 = vmatmul.mubr.f32.gmra.mxu0 %v2139_v38 }
  0x8a   :  { %798 = vmatprep.subr.mxu0 %v1562_v30  ;;  %1768 = vmatpush3.msra.mxu1 %v1570_v29 }
  0x8b   :  { %799 = vmatpush1.msra.mxu0 %v1561_v32  ;;  %1769 = vmatprep.subr.mxu1 %v1563_v33 }
  0x8c   :  { %763 = vmatprep.mubr.f32.mxu1 %v1797_v3  ;;  %800 = vmatprep.subr.mxu0 %v1555_v34 }
  0x8d   :  { %1770 = vmatpush3.msra.mxu1 %v1563_v33  ;;  %680 = vmatprep.mubr.f32.mxu0 %v1797_v3 }
  0x8e   :  { %764 = vmatmul.mubr.f32.gmra.mxu1 %v2139_v38  ;;  %801 = vmatpush1.msra.mxu0 %v1554_v35 }
  0x8f   :  { %1771 = vmatprep.subr.mxu1 %v1556_v36  ;;  %681 = vmatmul.mubr.f32.gmra.mxu0 %v2166_v45 }
  0x90   :  { %802 = vmatprep.subr.mxu0 %v1548_v37  ;;  %1772 = vmatpush3.msra.mxu1 %v1556_v36 }
  0x91   :  { %803 = vmatpush1.msra.mxu0 %v1547_v39  ;;  %1773 = vmatprep.subr.mxu1 %v1549_v40 }
  0x92   :  { %769 = vmatprep.mubr.f32.mxu1 %v1797_v3  ;;  %804 = vmatprep.subr.mxu0 %v1541_v41 }
  0x93   :  { %1774 = vmatpush3.msra.mxu1 %v1549_v40  ;;  %805 = vmatpush1.msra.mxu0 %v1540_v42 }
  0x94   :  { %770 = vmatmul.mubr.f32.gmra.mxu1 %v2166_v45  ;;  %1775 = vmatprep.subr.mxu1 %v1542_v43 }
  0x95   :  { %806 = vmatprep.subr.mxu0 %v1534_v44  ;;  %1776 = vmatpush3.msra.mxu1 %v1542_v43 }
  0x96   :  { %807 = vmatpush1.msra.mxu0 %v1533_v46  ;;  %840 = vmatprep.mubr.f32.mxu0 %v1797_v3 }
  0x97   :  { %1777 = vmatprep.subr.mxu1 %v1535_v47  ;;  %841 = vmatmul.mubr.f32.vlgmr.msra.gmra.mxu0 %v2021_v1 }
  0x98   :  { %1778 = vmatpush3.msra.mxu1 %v1535_v47  ;;  %1779 = vmatprep.mubr.f32.mxu1 %v2021_v1 }
  0x99   :  { %846 = vmatprep.mubr.f32.mxu0 %v1797_v3  ;;  %1780 = vmatmul.mubr.f32.vlgmr.msra.gmra.mxu1 %v2112_v31 }
  0x9a   :  { %1782 = vmatprep.mubr.f32.mxu1 %v2139_v38 }
  0x9b   :  { %847 = vmatmul.mubr.f32.gmra.mxu0 %v2112_v31 }
  0x9c   :  { %852 = vmatprep.mubr.f32.mxu0 %v1797_v3 }
  0x9d   :  { %1783 = vmatmul.mubr.f32.gmra.mxu1 %v2166_v45 }
  0x9f   :  { %853 = vmatmul.mubr.f32.gmra.mxu0 %v2139_v38 }
  0xa0   :  { %858 = vmatprep.mubr.f32.mxu0 %v1797_v3 }
  0xa3   :  { %859 = vmatmul.mubr.f32.gmra.mxu0 %v2166_v45 }
  0xe2   :  { %v2572_v48 = vpop.f32.mrf.mxu0 }
  0xe3   :  { %3254 = vst [vmem:[#allocation2_spill] sm:$0xff] %v2572_v48 }
  0xe4   :  { %v2574_v1 = vpop.f32.mrf.mxu1  ;;  %v2576_v49 = vpop.f32.mrf.mxu0 }
  0xe5   :  { %3255 = vst [vmem:[#allocation3_spill] sm:$0xff] %v2576_v49  ;;  %v950_v54 = vadd.f32 %v2576_v49, %v2572_v48 }
  0xe6   :  { %v2580_v51 = vpop.f32.mrf.mxu1 }
  0xe7   :  { %3257 = vst [vmem:[#allocation5_spill] sm:$0xff] %v2580_v51  ;;  %v951_v57 = vadd.f32 %v950_v54, %v2574_v1 }
  0xe9   :  { %v952_v62 = vadd.f32 %v951_v57, %v2580_v51 }
  0xf6   :  { %v2578_v50 = vpop.f32.mrf.mxu0 }
  0xf7   :  { %3256 = vst [vmem:[#allocation4_spill] sm:$0xff] %v2578_v50 }
  0xf8   :  { %v2582_v31 = vpop.f32.mrf.mxu0 }
  0xf9   :  { %3258 = vst [vmem:[#allocation6_spill] sm:$0xff] %v2582_v31  ;;  %v960_v60 = vadd.f32 %v2582_v31, %v2578_v50 }
  0xfa   :  { %v2584_v52 = vpop.f32.mrf.mxu1 }
  0xfb   :  { %3259 = vst [vmem:[#allocation7_spill] sm:$0xff] %v2584_v52  ;;  %v961_v0 = vadd.f32 %v960_v60, %v2584_v52 }
  0xfc   :  { %v2586_v53 = vpop.f32.mrf.mxu1  ;;  %v2588_v38 = vpop.f32.mrf.mxu0 }
  0xfd   :  { %3260 = vst [vmem:[#allocation8_spill] sm:$0xff] %v2586_v53  ;;  %v962_v9 = vadd.f32 %v961_v0, %v2586_v53 }
  0xfe   :  { %v2590_v3 = vpop.f32.mrf.mxu0 }
  0xff   :  { %v969_v4 = vadd.f32 %v2590_v3, %v2588_v38 }
 0x100   :  { %v2592_v45 = vpop.f32.mrf.mxu1 }
 0x101   :  { %v970_v11 = vadd.f32 %v969_v4, %v2592_v45 }
 0x102   :  { %v2596_v55 = vpop.f32.mrf.mxu1  ;;  %v2598_v56 = vpop.f32.mrf.mxu0 }
 0x103   :  { %v971_v19 = vadd.f32 %v970_v11, %v2596_v55 }
 0x104   :  { %v2601_v58 = vpop.f32.mrf.mxu0 }
 0x105   :  { %v978_v15 = vadd.f32 %v2601_v58, %v2598_v56 }
 0x106   :  { %v2603_v59 = vpop.f32.mrf.mxu1 }
 0x107   :  { %v979_v22 = vadd.f32 %v978_v15, %v2603_v59 }
 0x108   :  { %v2607_v61 = vpop.f32.mrf.mxu1 }
 0x109   :  { %v2610_v63 = vpop.f32.mrf.mxu0  ;;  %v980_v28 = vadd.f32 %v979_v22, %v2607_v61 }
 0x10a   :  { %3261 = vst [vmem:[#allocation9_spill] sm:$0xff] %v2610_v63  ;;  %v953_v2 = vadd.f32 %v952_v62, %v2610_v63 }
 0x10b   :  { %v2616_v5 = vpop.f32.mrf.mxu1  ;;  %v2618_v6 = vpop.f32.mrf.mxu0 }
 0x10c   :  { %3262 = vst [vmem:[#allocation10_spill] sm:$0xff] %v2618_v6  ;;  %v954_v7 = vadd.f32 %v953_v2, %v2618_v6  ;;  %v965_v17 = vsel %vm955_vm0, %v2616_v5, 0.0 }
 0x10d   :  { %v2621_v8 = vpop.f32.mrf.mxu1 }
 0x10e   :  { %3263 = vst [vmem:[#allocation11_spill] sm:$0xff] %v2621_v8  ;;  %v956_v10 = vsel %vm955_vm0, %v2621_v8, 0.0 }
 0x10f   :  { %v2627_v12 = vpop.f32.mrf.mxu0  ;;  %v957_v13 = vadd.f32 %v956_v10, %v954_v7 }
 0x110   :  { %v963_v14 = vadd.f32 %v962_v9, %v2627_v12 }
 0x111   :  { %v2632_v16 = vpop.f32.mrf.mxu0  ;;  %958 = vadd.xlane.f32.xlu0 %v957_v13 }
 0x112   :  { %v964_v18 = vadd.f32 %v963_v14, %v2632_v16 }
 0x114   :  { %v2638_v20 = vpop.f32.mrf.mxu0  ;;  %v966_v21 = vadd.f32 %v965_v17, %v964_v18 }
 0x115   :  { %v972_v23 = vadd.f32 %v971_v19, %v2638_v20 }
 0x116   :  { %v2644_v25 = vpop.f32.mrf.mxu0  ;;  %967 = vadd.xlane.f32.xlu0 %v966_v21 }
 0x117   :  { %v2642_v24 = vpop.f32.mrf.mxu1  ;;  %3265 = vst [vmem:[#allocation13_spill] sm:$0xff] %v2644_v25  ;;  %v973_v26 = vadd.f32 %v972_v23, %v2644_v25 }
 0x118   :  { %3264 = vst [vmem:[#allocation12_spill] sm:$0xff] %v2642_v24  ;;  %v983_v35 = vsel %vm955_vm0, %v2642_v24, 0.0 }
 0x119   :  { %v2647_v27 = vpop.f32.mrf.mxu1 }
 0x11a   :  { %3266 = vst [vmem:[#allocation14_spill] sm:$0xff] %v2647_v27  ;;  %v974_v29 = vsel %vm955_vm0, %v2647_v27, 0.0  ;;  %v2652_v30 = vpop.f32.mrf.mxu0 }
 0x11b   :  { %3267 = vst [vmem:[#allocation15_spill] sm:$0xff] %v2652_v30  ;;  %v975_v32 = vadd.f32 %v974_v29, %v973_v26  ;;  %v981_v33 = vadd.f32 %v980_v28, %v2652_v30 }
 0x11c   :  { %v2655_v34 = vpop.f32.mrf.mxu0 }
 0x11d   :  { %3268 = vst [vmem:[#allocation16_spill] sm:$0xff] %v2655_v34  ;;  %976 = vadd.xlane.f32.xlu1 %v975_v32  ;;  %v982_v36 = vadd.f32 %v981_v33, %v2655_v34 }
 0x11f   :  { %v984_v37 = vadd.f32 %v983_v35, %v982_v36 }
 0x121   :  { %985 = vadd.xlane.f32.xlu1 %v984_v37 }
 0x12f   :  { %v2660_v39 = vpop.f32.mrf.mxu0 }
 0x130   :  { %3269 = vst [vmem:[#allocation17_spill] sm:$0xff] %v2660_v39 }
 0x131   :  { %v2662_v40 = vpop.f32.mrf.mxu0 }
 0x132   :  { %v2664_v41 = vpop.f32.mrf.mxu1  ;;  %v991_v62 = vadd.f32 %v2662_v40, %v2660_v39 }
 0x134   :  { %v2668_v43 = vpop.f32.mrf.mxu1  ;;  %v992_v4 = vadd.f32 %v991_v62, %v2664_v41 }
 0x136   :  { %v993_v13 = vadd.f32 %v992_v4, %v2668_v43 }
 0x143   :  { %v2666_v42 = vpop.f32.mrf.mxu0 }
 0x145   :  { %v2670_v44 = vpop.f32.mrf.mxu0 }
 0x146   :  { %v1000_v7 = vadd.f32 %v2670_v44, %v2666_v42 }
 0x148   :  { %v2672_v46 = vpop.f32.mrf.mxu1 }
 0x149   :  { %v2674_v47 = vpop.f32.mrf.mxu0  ;;  %v1001_v14 = vadd.f32 %v1000_v7, %v2672_v46 }
 0x14a   :  { %v2676_v54 = vpop.f32.mrf.mxu1 }
 0x14b   :  { %v2678_v57 = vpop.f32.mrf.mxu0  ;;  %v1002_v22 = vadd.f32 %v1001_v14, %v2676_v54 }
 0x14c   :  { %v1009_v15 = vadd.f32 %v2678_v57, %v2674_v47 }
 0x14e   :  { %v2680_v60 = vpop.f32.mrf.mxu1 }
 0x14f   :  { %v2686_v2 = vpop.f32.mrf.mxu0  ;;  %v1010_v23 = vadd.f32 %v1009_v15, %v2680_v60 }
 0x150   :  { %v2684_v0 = vpop.f32.mrf.mxu1  ;;  %3270 = vst [vmem:[#allocation18_spill] sm:$0xff] %v2686_v2 }
 0x151   :  { %v2693_v10 = vpop.f32.mrf.mxu0  ;;  %v1011_v4 = vadd.f32 %v1010_v23, %v2684_v0 }
 0x152   :  { %3272 = vst [vmem:[#allocation20_spill] sm:$0xff] %v2693_v10  ;;  %v1018_v26 = vadd.f32 %v2693_v10, %v2686_v2 }
 0x154   :  { %v2691_v9 = vpop.f32.mrf.mxu1 }
 0x155   :  { %3271 = vst [vmem:[#allocation19_spill] sm:$0xff] %v2691_v9  ;;  %v1019_v7 = vadd.f32 %v1018_v26, %v2691_v9 }
 0x156   :  { %v2695_v11 = vpop.f32.mrf.mxu1 }
 0x157   :  { %3273 = vst [vmem:[#allocation21_spill] sm:$0xff] %v2695_v11  ;;  %v2701_v17 = vpop.f32.mrf.mxu0  ;;  %v1020_v26 = vadd.f32 %v1019_v7, %v2695_v11 }
 0x158   :  { %v994_v18 = vadd.f32 %v993_v13, %v2701_v17 }
 0x159   :  { %v2704_v19 = vpop.f32.mrf.mxu1  ;;  %v2706_v21 = vpop.f32.mrf.mxu0 }
 0x15a   :  { %3274 = vst [vmem:[#allocation22_spill] sm:$0xff] %v2706_v21  ;;  %v995_v28 = vadd.f32 %v994_v18, %v2706_v21  ;;  %v1005_v18 = vsel %vm955_vm0, %v2704_v19, 0.0 }
 0x15b   :  { %v2713_v29 = vpop.f32.mrf.mxu1  ;;  %v2715_v32 = vpop.f32.mrf.mxu0 }
 0x15c   :  { %3275 = vst [vmem:[#allocation23_spill] sm:$0xff] %v2713_v29  ;;  %v1003_v33 = vadd.f32 %v1002_v22, %v2715_v32  ;;  %v996_v35 = vsel %vm955_vm0, %v2713_v29, 0.0 }
 0x15d   :  { %v2720_v36 = vpop.f32.mrf.mxu0  ;;  %v997_v37 = vadd.f32 %v996_v35, %v995_v28  ;;  %v2722_v62 = vpop.f32.mrf.mxu1 }
 0x15e   :  { %3276 = vst [vmem:[#allocation24_spill] sm:$0xff] %v2722_v62  ;;  %v1004_v13 = vadd.f32 %v1003_v33, %v2720_v36 }
 0x15f   :  { %998 = vadd.xlane.f32.xlu0 %v997_v37  ;;  %v2727_v14 = vpop.f32.mrf.mxu0  ;;  %v2729_v15 = vpop.f32.mrf.mxu1 }
 0x160   :  { %v1012_v22 = vadd.f32 %v1011_v4, %v2727_v14  ;;  %v1006_v34 = vadd.f32 %v1005_v18, %v1004_v13  ;;  %v1014_v23 = vsel %vm955_vm0, %v2729_v15, 0.0  ;;  %v1023_v13 = vsel %vm955_vm0, %v2722_v62, 0.0 }
 0x161   :  { %v2734_v28 = vpop.f32.mrf.mxu0 }
 0x162   :  { %1007 = vadd.xlane.f32.xlu1 %v1006_v34  ;;  %v1013_v33 = vadd.f32 %v1012_v22, %v2734_v28 }
 0x163   :  { %v2740_v35 = vpop.f32.mrf.mxu0 }
 0x164   :  { %3277 = vst [vmem:[#allocation25_spill] sm:$0xff] %v2740_v35  ;;  %v1021_v37 = vadd.f32 %v1020_v26, %v2740_v35  ;;  %v1015_v9 = vadd.f32 %v1014_v23, %v1013_v33 }
 0x165   :  { %v2743_v10 = vpop.f32.mrf.mxu0 }
 0x166   :  { %3278 = vst [vmem:[#allocation26_spill] sm:$0xff] %v2743_v10  ;;  %v1022_v4 = vadd.f32 %v1021_v37, %v2743_v10  ;;  %1016 = vadd.xlane.f32.xlu0 %v1015_v9 }
 0x168   :  { %v1024_v18 = vadd.f32 %v1023_v13, %v1022_v4 }
 0x16a   :  { %1025 = vadd.xlane.f32.xlu1 %v1024_v18 }
 0x19a   :  { %v959_v2 = vpop.xlane.xlu0 %958 }
 0x19f   :  { %v968_v34 = vpop.xlane.xlu0 %967 }
 0x1a6   :  { %v977_v7 = vpop.xlane.xlu1 %976 }
 0x1aa   :  { %v2748_v11 = vpop.xlane.xlu1 %985 }
 0x1e8   :  { %v999_v22 = vpop.xlane.xlu0 %998 }
 0x1e9   :  { %v1027_v24 = vadd.f32 %v999_v22, %v959_v2 }
 0x1eb   :  { %v2750_v30 = vmul.f32 0.00064102566, %v1027_v24  ;;  %v1008_v23 = vpop.xlane.xlu1 %1007 }
 0x1ec   :  { %v1028_v37 = vadd.f32 %v1008_v23, %v968_v34 }
 0x1ed   :  { %v1036_v26 = vsub.f32 %v2572_v48, %v2750_v30  ;;  %v1037_v9 = vsub.f32 %v2576_v49, %v2750_v30  ;;  %v1038_v33 = vsub.f32 %v2574_v1, %v2750_v30  ;;  %v1039_v4 = vsub.f32 %v2580_v51, %v2750_v30 }
 0x1ee   :  { %v1042_v2 = vsub.f32 %v2621_v8, %v2750_v30  ;;  %v1040_v22 = vsub.f32 %v2610_v63, %v2750_v30  ;;  %v1041_v48 = vsub.f32 %v2618_v6, %v2750_v30  ;;  %v1132_v34 = vsub.f32 %v2660_v39, %v2750_v30 }
 0x1ef   :  { %v1017_v13 = vpop.xlane.xlu0 %1016  ;;  %v1064_v24 = vmul.f32 %v1036_v26, %v1036_v26  ;;  %v1065_v18 = vmul.f32 %v1037_v9, %v1037_v9  ;;  %v1066_v49 = vmul.f32 %v1038_v33, %v1038_v33  ;;  %v1133_v23 = vsub.f32 %v2662_v40, %v2750_v30 }
 0x1f0   :  { %v1029_v10 = vadd.f32 %v1017_v13, %v977_v7  ;;  %v2770_v51 = vmul.f32 0.00064102566, %v1028_v37  ;;  %v1067_v8 = vmul.f32 %v1039_v4, %v1039_v4  ;;  %v1134_v26 = vsub.f32 %v2664_v41, %v2750_v30 }
 0x1f1   :  { %v1092_v62 = vadd.f32 %v1065_v18, %v1064_v24  ;;  %v1070_v9 = vmul.f32 %v1042_v2, %v1042_v2  ;;  %v1135_v6 = vsub.f32 %v2668_v43, %v2750_v30  ;;  %v1160_v33 = vmul.f32 %v1132_v34, %v1132_v34 }
 0x1f2   :  { %v1068_v7 = vmul.f32 %v1040_v22, %v1040_v22  ;;  %v1069_v13 = vmul.f32 %v1041_v48, %v1041_v48  ;;  %v1138_v24 = vsub.f32 %v2713_v29, %v2750_v30  ;;  %v1161_v18 = vmul.f32 %v1133_v23, %v1133_v23 }
 0x1f3   :  { %v1093_v63 = vadd.f32 %v1092_v62, %v1066_v49  ;;  %v2778_v39 = vmul.f32 0.00064102566, %v1029_v10  ;;  %v1136_v4 = vsub.f32 %v2701_v17, %v2750_v30  ;;  %v1137_v2 = vsub.f32 %v2706_v21, %v2750_v30 }
 0x1f4   :  { %v1162_v49 = vmul.f32 %v1134_v26, %v1134_v26  ;;  %v1188_v62 = vadd.f32 %v1161_v18, %v1160_v33  ;;  %v1043_v34 = vsub.f32 %v2578_v50, %v2770_v51  ;;  %v1044_v48 = vsub.f32 %v2582_v31, %v2770_v51 }
 0x1f5   :  { %v1094_v37 = vadd.f32 %v1093_v63, %v1067_v8  ;;  %v1097_v23 = vsel %vm955_vm0, %v1070_v9, 0.0  ;;  %v1163_v10 = vmul.f32 %v1135_v6, %v1135_v6  ;;  %v1045_v63 = vsub.f32 %v2584_v52, %v2770_v51 }
 0x1f6   :  { %v1166_v8 = vmul.f32 %v1138_v24, %v1138_v24  ;;  %v1189_v29 = vadd.f32 %v1188_v62, %v1162_v49  ;;  %v1046_v21 = vsub.f32 %v2586_v53, %v2770_v51  ;;  %v1047_v26 = vsub.f32 %v2627_v12, %v2770_v51 }
 0x1f7   :  { %v1095_v22 = vadd.f32 %v1094_v37, %v1068_v7  ;;  %v1049_v18 = vsub.f32 %v2616_v5, %v2770_v51  ;;  %v1071_v31 = vmul.f32 %v1043_v34, %v1043_v34  ;;  %v1072_v7 = vmul.f32 %v1044_v48, %v1044_v48 }
 0x1f8   :  { %v1164_v37 = vmul.f32 %v1136_v4, %v1136_v4  ;;  %v1165_v9 = vmul.f32 %v1137_v2, %v1137_v2  ;;  %v1190_v6 = vadd.f32 %v1189_v29, %v1163_v10  ;;  %v1048_v52 = vsub.f32 %v2632_v16, %v2770_v51 }
 0x1f9   :  { %v1096_v33 = vadd.f32 %v1095_v22, %v1069_v13  ;;  %v1073_v49 = vmul.f32 %v1045_v63, %v1045_v63  ;;  %v1101_v62 = vadd.f32 %v1072_v7, %v1071_v31  ;;  %v1050_v53 = vsub.f32 %v2588_v38, %v2778_v39 }
 0x1fa   :  { %v1191_v50 = vadd.f32 %v1190_v6, %v1164_v37  ;;  %v1193_v13 = vsel %vm955_vm0, %v1166_v8, 0.0  ;;  %v1051_v22 = vsub.f32 %v2590_v3, %v2778_v39  ;;  %v1052_v4 = vsub.f32 %v2592_v45, %v2778_v39 }
 0x1fb   :  { %v1098_v24 = vadd.f32 %v1097_v23, %v1096_v33  ;;  %v1074_v29 = vmul.f32 %v1046_v21, %v1046_v21  ;;  %v1075_v2 = vmul.f32 %v1047_v26, %v1047_v26  ;;  %v1077_v34 = vmul.f32 %v1049_v18, %v1049_v18  ;;  %v1026_v33 = vpop.xlane.xlu1 %1025 }
 0x1fc   :  { %v1102_v48 = vadd.f32 %v1101_v62, %v1073_v49  ;;  %v1192_v23 = vadd.f32 %v1191_v50, %v1165_v9  ;;  %v1053_v31 = vsub.f32 %v2596_v55, %v2778_v39  ;;  %v1078_v10 = vmul.f32 %v1050_v53, %v1050_v53 }
 0x1fd   :  { %1099 = vadd.xlane.f32.xlu0 %v1098_v24  ;;  %v1079_v63 = vmul.f32 %v1051_v22, %v1051_v22  ;;  %v1076_v7 = vmul.f32 %v1048_v52, %v1048_v52  ;;  %v1054_v37 = vsub.f32 %v2638_v20, %v2778_v39  ;;  %v1056_v6 = vsub.f32 %v2647_v27, %v2778_v39 }
 0x1fe   :  { %v1103_v8 = vadd.f32 %v1102_v48, %v1074_v29  ;;  %v1194_v24 = vadd.f32 %v1193_v13, %v1192_v23  ;;  %v1055_v21 = vsub.f32 %v2644_v25, %v2778_v39  ;;  %v1080_v26 = vmul.f32 %v1052_v4, %v1052_v4 }
 0x1ff   :  { %v1110_v50 = vadd.f32 %v1079_v63, %v1078_v10  ;;  %v1139_v53 = vsub.f32 %v2666_v42, %v2770_v51  ;;  %v1140_v52 = vsub.f32 %v2670_v44, %v2770_v51  ;;  %v1141_v9 = vsub.f32 %v2672_v46, %v2770_v51 }
 0x200   :  { %v1104_v18 = vadd.f32 %v1103_v8, %v1075_v2  ;;  %v1030_v49 = vadd.f32 %v1026_v33, %v2748_v11  ;;  %v1106_v62 = vsel %vm955_vm0, %v1077_v34, 0.0  ;;  %v1081_v13 = vmul.f32 %v1053_v31, %v1053_v31 }
 0x201   :  { %1195 = vadd.xlane.f32.xlu0 %v1194_v24  ;;  %v1111_v22 = vadd.f32 %v1110_v50, %v1080_v26  ;;  %v1082_v4 = vmul.f32 %v1054_v37, %v1054_v37  ;;  %v1084_v48 = vmul.f32 %v1056_v6, %v1056_v6  ;;  %v1167_v2 = vmul.f32 %v1139_v53, %v1139_v53 }
 0x202   :  { %v1105_v29 = vadd.f32 %v1104_v18, %v1076_v7  ;;  %v1142_v10 = vsub.f32 %v2676_v54, %v2770_v51  ;;  %v1145_v63 = vsub.f32 %v2704_v19, %v2770_v51  ;;  %v1168_v8 = vmul.f32 %v1140_v52, %v1140_v52 }
 0x203   :  { %v1112_v23 = vadd.f32 %v1111_v22, %v1081_v13  ;;  %v1083_v25 = vmul.f32 %v1055_v21, %v1055_v21  ;;  %v1143_v11 = vsub.f32 %v2715_v32, %v2770_v51  ;;  %v1169_v34 = vmul.f32 %v1141_v9, %v1141_v9 }
 0x204   :  { %v1107_v27 = vadd.f32 %v1106_v62, %v1105_v29  ;;  %v1197_v33 = vadd.f32 %v1168_v8, %v1167_v2  ;;  %v1146_v7 = vsub.f32 %v2674_v47, %v2778_v39  ;;  %v1147_v37 = vsub.f32 %v2678_v57, %v2778_v39 }
 0x205   :  { %v1113_v31 = vadd.f32 %v1112_v23, %v1082_v4  ;;  %v2832_v6 = vmul.f32 0.00064102566, %v1030_v49  ;;  %v1115_v24 = vsel %vm955_vm0, %v1084_v48, 0.0  ;;  %v1144_v21 = vsub.f32 %v2720_v36, %v2770_v51 }
 0x206   :  { %1108 = vadd.xlane.f32.xlu1 %v1107_v27  ;;  %v1148_v26 = vsub.f32 %v2680_v60, %v2778_v39  ;;  %v1170_v18 = vmul.f32 %v1142_v10, %v1142_v10  ;;  %v1173_v53 = vmul.f32 %v1145_v63, %v1145_v63  ;;  %v1198_v52 = vadd.f32 %v1197_v33, %v1169_v34 }
 0x207   :  { %v1114_v50 = vadd.f32 %v1113_v31, %v1083_v25  ;;  %v1149_v9 = vsub.f32 %v2684_v0, %v2778_v39  ;;  %v1150_v49 = vsub.f32 %v2727_v14, %v2778_v39  ;;  %v1174_v62 = vmul.f32 %v1146_v7, %v1146_v7 }
 0x208   :  { %v1175_v27 = vmul.f32 %v1147_v37, %v1147_v37  ;;  %v1171_v22 = vmul.f32 %v1143_v11, %v1143_v11  ;;  %v1199_v29 = vadd.f32 %v1198_v52, %v1170_v18  ;;  %v1152_v4 = vsub.f32 %v2729_v15, %v2778_v39  ;;  %v3279_v52 = vld [vmem:[#allocation15_spill] sm:$0xff] }
 0x209   :  { %v1116_v13 = vadd.f32 %v1115_v24, %v1114_v50  ;;  %v1176_v48 = vmul.f32 %v1148_v26, %v1148_v26  ;;  %v1057_v25 = vsub.f32 %v2598_v56, %v2832_v6  ;;  %v1058_v23 = vsub.f32 %v2601_v58, %v2832_v6 }
 0x20a   :  { %v1206_v2 = vadd.f32 %v1175_v27, %v1174_v62  ;;  %v1172_v10 = vmul.f32 %v1144_v21, %v1144_v21  ;;  %v1200_v63 = vadd.f32 %v1199_v29, %v1171_v22  ;;  %v1202_v8 = vsel %vm955_vm0, %v1173_v53, 0.0  ;;  %v3280_v62 = vld [vmem:[#allocation12_spill] sm:$0xff] }
 0x20b   :  { %1117 = vadd.xlane.f32.xlu0 %v1116_v13  ;;  %v1059_v11 = vsub.f32 %v2603_v59, %v2832_v6  ;;  %v1151_v34 = vsub.f32 %v2734_v28, %v2778_v39  ;;  %v1177_v31 = vmul.f32 %v1149_v9, %v1149_v9  ;;  %v1178_v33 = vmul.f32 %v1150_v49, %v1150_v49  ;;  %v3281_v9 = vld [vmem:[#allocation18_spill] sm:$0xff] }
 0x20c   :  { %v1207_v7 = vadd.f32 %v1206_v2, %v1176_v48  ;;  %v1201_v37 = vadd.f32 %v1200_v63, %v1172_v10  ;;  %v1060_v24 = vsub.f32 %v2607_v61, %v2832_v6  ;;  %v1085_v26 = vmul.f32 %v1057_v25, %v1057_v25  ;;  %v3282_v10 = vld [vmem:[#allocation20_spill] sm:$0xff] }
 0x20d   :  { %v1086_v50 = vmul.f32 %v1058_v23, %v1058_v23  ;;  %v1180_v18 = vmul.f32 %v1152_v4, %v1152_v4  ;;  %v1061_v53 = vsub.f32 %v3279_v52, %v2832_v6  ;;  %v1063_v27 = vsub.f32 %v3280_v62, %v2832_v6  ;;  %v3283_v4 = vld [vmem:[#allocation19_spill] sm:$0xff]  ;;  %v3284_v63 = vld [vmem:[#allocation16_spill] sm:$0xff] }
 0x20e   :  { %v1208_v21 = vadd.f32 %v1207_v7, %v1177_v31  ;;  %v1203_v13 = vadd.f32 %v1202_v8, %v1201_v37  ;;  %v1087_v22 = vmul.f32 %v1059_v11, %v1059_v11  ;;  %v1153_v49 = vsub.f32 %v3281_v9, %v2832_v6  ;;  %v3285_v11 = vld [vmem:[#allocation21_spill] sm:$0xff] }
 0x20f   :  { %v1119_v29 = vadd.f32 %v1086_v50, %v1085_v26  ;;  %v1179_v48 = vmul.f32 %v1151_v34, %v1151_v34  ;;  %v1154_v25 = vsub.f32 %v3282_v10, %v2832_v6  ;;  %v1155_v23 = vsub.f32 %v3283_v4, %v2832_v6 }
 0x210   :  { %v1209_v2 = vadd.f32 %v1208_v21, %v1178_v33  ;;  %1204 = vadd.xlane.f32.xlu1 %v1203_v13  ;;  %v1062_v31 = vsub.f32 %v3284_v63, %v2832_v6  ;;  %v1088_v7 = vmul.f32 %v1060_v24, %v1060_v24  ;;  %v1156_v37 = vsub.f32 %v3285_v11, %v2832_v6 }
 0x211   :  { %v1120_v62 = vadd.f32 %v1119_v29, %v1087_v22  ;;  %v1181_v26 = vmul.f32 %v1153_v49, %v1153_v49  ;;  %v1182_v50 = vmul.f32 %v1154_v25, %v1154_v25  ;;  %v1211_v34 = vsel %vm955_vm0, %v1180_v18, 0.0  ;;  %v3286_v22 = vld [vmem:[#allocation24_spill] sm:$0xff]  ;;  %v3287_v49 = vld [vmem:[#allocation26_spill] sm:$0xff] }
 0x212   :  { %v1210_v8 = vadd.f32 %v1209_v2, %v1179_v48  ;;  %v1089_v33 = vmul.f32 %v1061_v53, %v1061_v53  ;;  %v1091_v21 = vmul.f32 %v1063_v27, %v1063_v27  ;;  %v1157_v13 = vsub.f32 %v2740_v35, %v2832_v6 }
 0x213   :  { %v1121_v10 = vadd.f32 %v1120_v62, %v1088_v7  ;;  %v1183_v4 = vmul.f32 %v1155_v23, %v1155_v23  ;;  %v1215_v52 = vadd.f32 %v1182_v50, %v1181_v26  ;;  %v1090_v63 = vmul.f32 %v1062_v31, %v1062_v31 }
 0x214   :  { %v1212_v9 = vadd.f32 %v1211_v34, %v1210_v8  ;;  %v1159_v29 = vsub.f32 %v3286_v22, %v2832_v6  ;;  %v1158_v48 = vsub.f32 %v3287_v49, %v2832_v6  ;;  %v1184_v2 = vmul.f32 %v1156_v37, %v1156_v37 }
 0x215   :  { %v1122_v24 = vadd.f32 %v1121_v10, %v1089_v33  ;;  %v1216_v18 = vadd.f32 %v1215_v52, %v1183_v4  ;;  %v1124_v62 = vsel %vm955_vm0, %v1091_v21, 0.0  ;;  %v1185_v27 = vmul.f32 %v1157_v13, %v1157_v13 }
 0x216   :  { %1213 = vadd.xlane.f32.xlu0 %v1212_v9  ;;  %v1187_v8 = vmul.f32 %v1159_v29, %v1159_v29  ;;  %v1186_v23 = vmul.f32 %v1158_v48, %v1158_v48  ;;  %v1798_v9 = vmov 0   ;;  %v1232_v29 = vld [vmem:[%s3217_s2] sm:$0xff] }
 0x217   :  { %v1123_v53 = vadd.f32 %v1122_v24, %v1090_v63  ;;  %v1217_v25 = vadd.f32 %v1216_v18, %v1184_v2  ;;  %1787 = vset.pattern.permute.xlu0 %v1798_v9  ;;  %1788 = vset.pattern.permute.xlu1 %v1798_v9 }
 0x218   :  { %v1220_v31 = vsel %vm955_vm0, %v1187_v8, 0.0 }
 0x219   :  { %v1125_v7 = vadd.f32 %v1124_v62, %v1123_v53  ;;  %v1218_v26 = vadd.f32 %v1217_v25, %v1185_v27 }
 0x21b   :  { %1126 = vadd.xlane.f32.xlu1 %v1125_v7  ;;  %v1219_v10 = vadd.f32 %v1218_v26, %v1186_v23 }
 0x21d   :  { %v1221_v50 = vadd.f32 %v1220_v31, %v1219_v10  ;;  %v1233_v31 = vld [vmem:[%s3217_s2 + $0x8] sm:$0xff] }
 0x21f   :  { %1222 = vadd.xlane.f32.xlu1 %v1221_v50 }
 0x286   :  { %v1100_v37 = vpop.xlane.xlu0 %1099 }
 0x28a   :  { %v1196_v52 = vpop.xlane.xlu0 %1195 }
 0x28b   :  { %v1224_v4 = vadd.f32 %v1196_v52, %v1100_v37 }
 0x28d   :  { %v1228_v63 = vmul.f32 0.00064102566, %v1224_v4  ;;  %v1248_v4 = vld [vmem:[%s3218_s3] sm:$0xff] }
 0x28f   :  { %v1236_v34 = vadd.f32 1e-05, %v1228_v63  ;;  %v1109_v33 = vpop.xlane.xlu1 %1108 }
 0x291   :  { %1789 = vrsqrt.f32 %v1236_v34 }
 0x294   :  { %v1118_v21 = vpop.xlane.xlu0 %1117 }
 0x299   :  { %v1205_v13 = vpop.xlane.xlu1 %1204 }
 0x29a   :  { %v1225_v24 = vadd.f32 %v1205_v13, %v1109_v33  ;;  %v1234_v33 = vld [vmem:[%s3217_s2 + $0x10] sm:$0xff] }
 0x29c   :  { %v1229_v48 = vmul.f32 0.00064102566, %v1225_v24 }
 0x29e   :  { %v1790_v2 = vpop.eup %1789  ;;  %v1237_v18 = vadd.f32 1e-05, %v1229_v48 }
 0x29f   :  { %v1214_v53 = vpop.xlane.xlu0 %1213  ;;  %v1244_v62 = vmul.f32 %v1790_v2, %v1232_v29  ;;  %v1235_v29 = vld [vmem:[%s3217_s2 + $0x18] sm:$0xff] }
 0x2a0   :  { %v1226_v27 = vadd.f32 %v1214_v53, %v1118_v21  ;;  %1791 = vrsqrt.f32 %v1237_v18  ;;  %v1250_v53 = vld [vmem:[%s3218_s3 + $0x10] sm:$0xff] }
 0x2a1   :  { %1262 = vperm.xlu0 %1787, %v1244_v62   ;;  %v1252_v52 = vmul.f32 %v1244_v62, %v2750_v30  ;;  %v1249_v30 = vld [vmem:[%s3218_s3 + $0x8] sm:$0xff] }
 0x2a2   :  { %v1230_v25 = vmul.f32 0.00064102566, %v1226_v27  ;;  %v1251_v27 = vld [vmem:[%s3218_s3 + $0x18] sm:$0xff] }
 0x2a3   :  { %v1256_v63 = vsub.f32 %v1248_v4, %v1252_v52  ;;  %v3292_v52 = vld [vmem:[#allocation10_spill] sm:$0xff]  ;;  %v3293_v4 = vld [vmem:[#allocation11_spill] sm:$0xff] }
 0x2a4   :  { %v1238_v7 = vadd.f32 1e-05, %v1230_v25  ;;  %v1127_v8 = vpop.xlane.xlu1 %1126 }
 0x2a6   :  { %1793 = vrsqrt.f32 %v1238_v7 }
 0x2a8   :  { %v1223_v23 = vpop.xlane.xlu1 %1222 }
 0x2a9   :  { %v1227_v26 = vadd.f32 %v1223_v23, %v1127_v8  ;;  %v3288_v8 = vld [vmem:[#allocation2_spill] sm:$0xff] }
 0x2ab   :  { %v1231_v10 = vmul.f32 0.00064102566, %v1227_v26  ;;  %v3289_v26 = vld [vmem:[#allocation3_spill] sm:$0xff] }
 0x2ad   :  { %v1792_v50 = vpop.eup %1791  ;;  %v1239_v9 = vadd.f32 1e-05, %v1231_v10 }
 0x2ae   :  { %v1245_v37 = vmul.f32 %v1792_v50, %v1233_v31  ;;  %v3290_v31 = vld [vmem:[#allocation5_spill] sm:$0xff] }
 0x2af   :  { %1795 = vrsqrt.f32 %v1239_v9  ;;  %v3291_v9 = vld [vmem:[#allocation9_spill] sm:$0xff] }
 0x2b0   :  { %1267 = vperm.xlu1 %1788, %v1245_v37   ;;  %v1253_v13 = vmul.f32 %v1245_v37, %v2770_v51 }
 0x2b2   :  { %v1257_v24 = vsub.f32 %v1249_v30, %v1253_v13 }
 0x2b3   :  { %v1794_v34 = vpop.eup %1793 }
 0x2b4   :  { %1310 = vperm.xlu1 %1788, %v1256_v63   ;;  %v1246_v21 = vmul.f32 %v1794_v34, %v1234_v33  ;;  %v3294_v34 = vld [vmem:[#allocation17_spill] sm:$0xff] }
 0x2b6   :  { %v1254_v18 = vmul.f32 %v1246_v21, %v2778_v39 }
 0x2b8   :  { %1272 = vperm.xlu1 %1788, %v1246_v21   ;;  %v1258_v51 = vsub.f32 %v1250_v53, %v1254_v18  ;;  %v3297_v53 = vld [vmem:[#allocation4_spill] sm:$0xff] }
 0x2bc   :  { %v1796_v48 = vpop.eup %1795  ;;  %1315 = vperm.xlu1 %1788, %v1257_v24  }
 0x2bd   :  { %v1247_v2 = vmul.f32 %v1796_v48, %v1235_v29 }
 0x2bf   :  { %v1255_v62 = vmul.f32 %v1247_v2, %v2832_v6 }
 0x2c0   :  { %1277 = vperm.xlu1 %1788, %v1247_v2   ;;  %v3296_v2 = vld [vmem:[#allocation23_spill] sm:$0xff] }
 0x2c1   :  { %v1259_v25 = vsub.f32 %v1251_v27, %v1255_v62  ;;  %v3298_v62 = vld [vmem:[#allocation6_spill] sm:$0xff] }
 0x2c4   :  { %1320 = vperm.xlu1 %1788, %v1258_v51  }
 0x2c8   :  { %1325 = vperm.xlu1 %1788, %v1259_v25   ;;  %v3299_v25 = vld [vmem:[#allocation7_spill] sm:$0xff] }
 0x31c   :  { %v1263_v7 = vpop.permute.xlu0 %1262 }
 0x31d   :  { %v1280_v23 = vmul.f32 %v1263_v7, %v3288_v8  ;;  %v1281_v39 = vmul.f32 %v1263_v7, %v3289_v26  ;;  %v1282_v10 = vmul.f32 %v1263_v7, %v2574_v1  ;;  %v1283_v50 = vmul.f32 %v1263_v7, %v3290_v31  ;;  %v3295_v1 = vld [vmem:[#allocation22_spill] sm:$0xff] }
 0x31e   :  { %v1284_v37 = vmul.f32 %v1263_v7, %v3291_v9  ;;  %v1285_v6 = vmul.f32 %v1263_v7, %v3292_v52  ;;  %v1286_v63 = vmul.f32 %v1263_v7, %v3293_v4  ;;  %v1412_v33 = vmul.f32 %v1263_v7, %v3294_v34 }
 0x31f   :  { %v1413_v21 = vmul.f32 %v1263_v7, %v2662_v40  ;;  %v1414_v13 = vmul.f32 %v1263_v7, %v2664_v41  ;;  %v1415_v30 = vmul.f32 %v1263_v7, %v2668_v43  ;;  %v1416_v24 = vmul.f32 %v1263_v7, %v2701_v17  ;;  %v3300_v40 = vld [vmem:[#allocation8_spill] sm:$0xff] }
 0x320   :  { %v1417_v48 = vmul.f32 %v1263_v7, %v3295_v1  ;;  %v1418_v18 = vmul.f32 %v1263_v7, %v3296_v2 }
 0x32b   :  { %v1268_v29 = vpop.permute.xlu1 %1267 }
 0x32c   :  { %v2922_v51 = vmul.f32 %v1268_v29, %v3297_v53  ;;  %v2925_v27 = vmul.f32 %v1268_v29, %v3298_v62  ;;  %v2928_v8 = vmul.f32 %v1268_v29, %v3299_v25  ;;  %v2931_v41 = vmul.f32 %v1268_v29, %v3300_v40 }
 0x32d   :  { %v2934_v43 = vmul.f32 %v1268_v29, %v2627_v12  ;;  %v2937_v17 = vmul.f32 %v1268_v29, %v2632_v16  ;;  %v2940_v7 = vmul.f32 %v2616_v5, %v1268_v29  ;;  %v2943_v26 = vmul.f32 %v1268_v29, %v2666_v42 }
 0x32e   :  { %v2946_v31 = vmul.f32 %v1268_v29, %v2670_v44  ;;  %v2949_v9 = vmul.f32 %v1268_v29, %v2672_v46  ;;  %v2952_v52 = vmul.f32 %v1268_v29, %v2676_v54  ;;  %v2955_v12 = vmul.f32 %v1268_v29, %v2715_v32 }
 0x32f   :  { %v2958_v16 = vmul.f32 %v1268_v29, %v2720_v36  ;;  %v2961_v5 = vmul.f32 %v2704_v19, %v1268_v29  ;;  %v1311_v42 = vpop.permute.xlu1 %1310  ;;  %v3302_v29 = vld [vmem:[#allocation14_spill] sm:$0xff] }
 0x330   :  { %v1328_v4 = vadd.f32 %v1311_v42, %v1280_v23  ;;  %v1329_v34 = vadd.f32 %v1311_v42, %v1281_v39  ;;  %v1330_v44 = vadd.f32 %v1311_v42, %v1282_v10  ;;  %v1331_v1 = vadd.f32 %v1311_v42, %v1283_v50 }
 0x331   :  { %v1332_v2 = vadd.f32 %v1311_v42, %v1284_v37  ;;  %v1333_v46 = vadd.f32 %v1311_v42, %v1285_v6  ;;  %v1334_v53 = vadd.f32 %v1311_v42, %v1286_v63  ;;  %v1440_v62 = vadd.f32 %v1412_v33, %v1311_v42 }
 0x332   :  { %v1356_v54 = vmax.f32 %v1328_v4, 0.0  ;;  %v1357_v25 = vmax.f32 %v1329_v34, 0.0  ;;  %v1358_v40 = vmax.f32 %v1330_v44, 0.0  ;;  %v1359_v32 = vmax.f32 %v1331_v1, 0.0 }
 0x333   :  { %v1360_v22 = vmax.f32 %v1332_v2, 0.0  ;;  %v1361_v49 = vmax.f32 %v1333_v46, 0.0  ;;  %v1362_v36 = vmax.f32 %v1334_v53, 0.0  ;;  %v1441_v35 = vadd.f32 %v1413_v21, %v1311_v42  ;;  %v1273_v11 = vpop.permute.xlu1 %1272 }
 0x334   :  { %1384 = vst [vmem:[%s3219_s4] sm:$0xff] %v1356_v54  ;;  %1385 = vst [vmem:[%s3219_s4 + $0x8] sm:$0xff] %v1357_v25  ;;  %v1442_v19 = vadd.f32 %v1414_v13, %v1311_v42  ;;  %v1443_v23 = vadd.f32 %v1415_v30, %v1311_v42  ;;  %v1444_v39 = vadd.f32 %v1416_v24, %v1311_v42  ;;  %v1468_v37 = vmax.f32 %v1440_v62, 0.0 }
 0x335   :  { %1386 = vst [vmem:[%s3219_s4 + $0x10] sm:$0xff] %v1358_v40  ;;  %1387 = vst [vmem:[%s3219_s4 + $0x18] sm:$0xff] %v1359_v32  ;;  %v1445_v10 = vadd.f32 %v1417_v48, %v1311_v42  ;;  %v1446_v50 = vadd.f32 %v1418_v18, %v1311_v42  ;;  %v1469_v6 = vmax.f32 %v1441_v35, 0.0  ;;  %v1294_v63 = vmul.f32 %v1273_v11, %v2588_v38 }
 0x336   :  { %1388 = vst [vmem:[%s3219_s4 + $0x20] sm:$0xff] %v1360_v22  ;;  %1389 = vst [vmem:[%s3219_s4 + $0x28] sm:$0xff] %v1361_v49  ;;  %v1470_v33 = vmax.f32 %v1442_v19, 0.0  ;;  %v1471_v21 = vmax.f32 %v1443_v23, 0.0  ;;  %v1472_v13 = vmax.f32 %v1444_v39, 0.0  ;;  %v1295_v22 = vmul.f32 %v1273_v11, %v2590_v3 }
 0x337   :  { %1390 = vst.msk [vmem:[%s3219_s4 + $0x30] sm:$0xff] %vm955_vm0, %v1362_v36  ;;  %v1473_v30 = vmax.f32 %v1445_v10, 0.0  ;;  %v1474_v24 = vmax.f32 %v1446_v50, 0.0  ;;  %1641 = vst [vmem:[%s3219_s4 + $0xe0] sm:$0xff] %v1468_v37  ;;  %v1296_v49 = vmul.f32 %v1273_v11, %v2592_v45  ;;  %v1297_v35 = vmul.f32 %v1273_v11, %v2596_v55  ;;  %v1316_v38 = vpop.permute.xlu1 %1315  ;;  %v3301_v45 = vld [vmem:[#allocation13_spill] sm:$0xff] }
 0x338   :  { %1642 = vst [vmem:[%s3219_s4 + $0xe8] sm:$0xff] %v1469_v6  ;;  %1643 = vst [vmem:[%s3219_s4 + $0xf0] sm:$0xff] %v1470_v33  ;;  %v1298_v3 = vmul.f32 %v1273_v11, %v2638_v20  ;;  %v1299_v55 = vmul.f32 %v1273_v11, %v3301_v45  ;;  %v1300_v48 = vmul.f32 %v1273_v11, %v3302_v29 }
 0x339   :  { %1644 = vst [vmem:[%s3219_s4 + $0xf8] sm:$0xff] %v1471_v21  ;;  %1645 = vst [vmem:[%s3219_s4 + $0x100] sm:$0xff] %v1472_v13  ;;  %v1426_v18 = vmul.f32 %v1273_v11, %v2674_v47  ;;  %v3016_v42 = vmul.f32 %v1273_v11, %v2678_v57  ;;  %v3019_v4 = vmul.f32 %v1273_v11, %v2680_v60 }
 0x33a   :  { %1646 = vst [vmem:[%s3219_s4 + $0x108] sm:$0xff] %v1473_v30  ;;  %1647 = vst.msk [vmem:[%s3219_s4 + $0x110] sm:$0xff] %vm955_vm0, %v1474_v24  ;;  %v3022_v34 = vmul.f32 %v1273_v11, %v2684_v0  ;;  %v3025_v20 = vmul.f32 %v1273_v11, %v2727_v14  ;;  %v3028_v44 = vmul.f32 %v1273_v11, %v2734_v28 }
 0x33b   :  { %v3031_v47 = vmul.f32 %v1273_v11, %v2729_v15  ;;  %v1335_v1 = vadd.f32 %v1316_v38, %v2922_v51  ;;  %v1336_v57 = vadd.f32 %v1316_v38, %v2925_v27  ;;  %v1337_v2 = vadd.f32 %v1316_v38, %v2928_v8  ;;  %v3039_v14 = vpop.permute.xlu1 %1277 }
 0x33c   :  { %v1338_v60 = vadd.f32 %v1316_v38, %v2931_v41  ;;  %v1339_v0 = vadd.f32 %v1316_v38, %v2934_v43  ;;  %v1340_v46 = vadd.f32 %v1316_v38, %v2937_v17  ;;  %v1341_v28 = vadd.f32 %v1316_v38, %v2940_v7 }
 0x33d   :  { %v1363_v53 = vmax.f32 %v1335_v1, 0.0  ;;  %v1364_v62 = vmax.f32 %v1336_v57, 0.0  ;;  %v1447_v15 = vadd.f32 %v2943_v26, %v1316_v38  ;;  %v1365_v11 = vmax.f32 %v1337_v2, 0.0  ;;  %v3304_v2 = vld [vmem:[#allocation16_spill] sm:$0xff] }
 0x33e   :  { %v1366_v51 = vmax.f32 %v1338_v60, 0.0  ;;  %v1367_v54 = vmax.f32 %v1339_v0, 0.0  ;;  %v1368_v27 = vmax.f32 %v1340_v46, 0.0  ;;  %v1369_v25 = vmax.f32 %v1341_v28, 0.0  ;;  %v3306_v46 = vld [vmem:[#allocation18_spill] sm:$0xff] }
 0x33f   :  { %1391 = vst [vmem:[%s3219_s4 + $0x38] sm:$0xff] %v1363_v53  ;;  %1392 = vst [vmem:[%s3219_s4 + $0x40] sm:$0xff] %v1364_v62  ;;  %v1448_v8 = vadd.f32 %v2946_v31, %v1316_v38  ;;  %v1449_v41 = vadd.f32 %v2949_v9, %v1316_v38  ;;  %v1450_v43 = vadd.f32 %v2952_v52, %v1316_v38  ;;  %v1475_v31 = vmax.f32 %v1447_v15, 0.0  ;;  %v1321_v9 = vpop.permute.xlu1 %1320  ;;  %v3307_v53 = vld [vmem:[#allocation20_spill] sm:$0xff]  ;;  %v3308_v15 = vld [vmem:[#allocation19_spill] sm:$0xff] }
 0x340   :  { %1393 = vst [vmem:[%s3219_s4 + $0x48] sm:$0xff] %v1365_v11  ;;  %1394 = vst [vmem:[%s3219_s4 + $0x50] sm:$0xff] %v1366_v51  ;;  %v1451_v17 = vadd.f32 %v2955_v12, %v1316_v38  ;;  %v1452_v7 = vadd.f32 %v2958_v16, %v1316_v38  ;;  %v1453_v26 = vadd.f32 %v2961_v5, %v1316_v38  ;;  %v3309_v51 = vld [vmem:[#allocation21_spill] sm:$0xff] }
 0x341   :  { %1395 = vst [vmem:[%s3219_s4 + $0x58] sm:$0xff] %v1367_v54  ;;  %1396 = vst [vmem:[%s3219_s4 + $0x60] sm:$0xff] %v1368_v27  ;;  %v1476_v52 = vmax.f32 %v1448_v8, 0.0  ;;  %v1477_v40 = vmax.f32 %v1449_v41, 0.0  ;;  %v1478_v32 = vmax.f32 %v1450_v43, 0.0  ;;  %v1342_v36 = vadd.f32 %v1321_v9, %v1294_v63  ;;  %v3310_v27 = vld [vmem:[#allocation25_spill] sm:$0xff] }
 0x342   :  { %1397 = vst.msk [vmem:[%s3219_s4 + $0x68] sm:$0xff] %vm955_vm0, %v1369_v25  ;;  %v1479_v19 = vmax.f32 %v1451_v17, 0.0  ;;  %v1480_v23 = vmax.f32 %v1452_v7, 0.0  ;;  %v1481_v39 = vmax.f32 %v1453_v26, 0.0  ;;  %1648 = vst [vmem:[%s3219_s4 + $0x118] sm:$0xff] %v1475_v31  ;;  %v1343_v12 = vadd.f32 %v1321_v9, %v1295_v22  ;;  %v3311_v8 = vld [vmem:[#allocation26_spill] sm:$0xff] }
 0x343   :  { %1649 = vst [vmem:[%s3219_s4 + $0x120] sm:$0xff] %v1476_v52  ;;  %1650 = vst [vmem:[%s3219_s4 + $0x128] sm:$0xff] %v1477_v40  ;;  %v1344_v16 = vadd.f32 %v1321_v9, %v1296_v49  ;;  %v1345_v5 = vadd.f32 %v1321_v9, %v1297_v35  ;;  %v1346_v10 = vadd.f32 %v1321_v9, %v1298_v3  ;;  %v1370_v6 = vmax.f32 %v1342_v36, 0.0  ;;  %v1326_v0 = vpop.permute.xlu1 %1325  ;;  %v3312_v43 = vld [vmem:[#allocation24_spill] sm:$0xff] }
 0x344   :  { %1651 = vst [vmem:[%s3219_s4 + $0x130] sm:$0xff] %v1478_v32  ;;  %v1347_v50 = vadd.f32 %v1321_v9, %v1299_v55  ;;  %1652 = vst [vmem:[%s3219_s4 + $0x138] sm:$0xff] %v1479_v19  ;;  %v1348_v37 = vadd.f32 %v1321_v9, %v1300_v48  ;;  %v1371_v63 = vmax.f32 %v1343_v12, 0.0  ;;  %v1454_v33 = vadd.f32 %v1426_v18, %v1321_v9 }
 0x345   :  { %1653 = vst [vmem:[%s3219_s4 + $0x140] sm:$0xff] %v1480_v23  ;;  %1654 = vst.msk [vmem:[%s3219_s4 + $0x148] sm:$0xff] %vm955_vm0, %v1481_v39  ;;  %v1372_v21 = vmax.f32 %v1344_v16, 0.0  ;;  %v1373_v13 = vmax.f32 %v1345_v5, 0.0  ;;  %v1374_v30 = vmax.f32 %v1346_v10, 0.0  ;;  %v1455_v49 = vadd.f32 %v3016_v42, %v1321_v9 }
 0x346   :  { %v1375_v24 = vmax.f32 %v1347_v50, 0.0  ;;  %v1376_v22 = vmax.f32 %v1348_v37, 0.0  ;;  %1398 = vst [vmem:[%s3219_s4 + $0x70] sm:$0xff] %v1370_v6  ;;  %1399 = vst [vmem:[%s3219_s4 + $0x78] sm:$0xff] %v1371_v63  ;;  %v1456_v35 = vadd.f32 %v3019_v4, %v1321_v9  ;;  %v1457_v38 = vadd.f32 %v3022_v34, %v1321_v9 }
 0x347   :  { %1400 = vst [vmem:[%s3219_s4 + $0x80] sm:$0xff] %v1372_v21  ;;  %1401 = vst [vmem:[%s3219_s4 + $0x88] sm:$0xff] %v1373_v13  ;;  %v1458_v3 = vadd.f32 %v3025_v20, %v1321_v9  ;;  %v1459_v45 = vadd.f32 %v3028_v44, %v1321_v9  ;;  %v1460_v55 = vadd.f32 %v3031_v47, %v1321_v9  ;;  %v1482_v29 = vmax.f32 %v1454_v33, 0.0  ;;  %v3303_v47 = vld [vmem:[#allocation15_spill] sm:$0xff] }
 0x348   :  { %1402 = vst [vmem:[%s3219_s4 + $0x90] sm:$0xff] %v1374_v30  ;;  %1403 = vst [vmem:[%s3219_s4 + $0x98] sm:$0xff] %v1375_v24  ;;  %v1483_v48 = vmax.f32 %v1455_v49, 0.0  ;;  %v1484_v18 = vmax.f32 %v1456_v35, 0.0  ;;  %v1485_v42 = vmax.f32 %v1457_v38, 0.0  ;;  %v1301_v4 = vmul.f32 %v3039_v14, %v2598_v56 }
 0x349   :  { %1404 = vst.msk [vmem:[%s3219_s4 + $0xa0] sm:$0xff] %vm955_vm0, %v1376_v22  ;;  %v1486_v34 = vmax.f32 %v1458_v3, 0.0  ;;  %v1487_v1 = vmax.f32 %v1459_v45, 0.0  ;;  %v1488_v57 = vmax.f32 %v1460_v55, 0.0  ;;  %1655 = vst [vmem:[%s3219_s4 + $0x150] sm:$0xff] %v1482_v29  ;;  %v1302_v20 = vmul.f32 %v3039_v14, %v2601_v58 }
 0x34a   :  { %1656 = vst [vmem:[%s3219_s4 + $0x158] sm:$0xff] %v1483_v48  ;;  %1657 = vst [vmem:[%s3219_s4 + $0x160] sm:$0xff] %v1484_v18  ;;  %v1303_v56 = vmul.f32 %v3039_v14, %v2603_v59  ;;  %v1304_v44 = vmul.f32 %v3039_v14, %v2607_v61  ;;  %v1305_v58 = vmul.f32 %v3039_v14, %v3303_v47  ;;  %v3305_v59 = vld [vmem:[#allocation12_spill] sm:$0xff] }
 0x34b   :  { %1658 = vst [vmem:[%s3219_s4 + $0x168] sm:$0xff] %v1485_v42  ;;  %v1306_v60 = vmul.f32 %v3039_v14, %v3304_v2  ;;  %1659 = vst [vmem:[%s3219_s4 + $0x170] sm:$0xff] %v1486_v34  ;;  %v1307_v61 = vmul.f32 %v3305_v59, %v3039_v14  ;;  %v1433_v28 = vmul.f32 %v3039_v14, %v3306_v46 }
 0x34c   :  { %1660 = vst [vmem:[%s3219_s4 + $0x178] sm:$0xff] %v1487_v1  ;;  %1661 = vst.msk [vmem:[%s3219_s4 + $0x180] sm:$0xff] %vm955_vm0, %v1488_v57  ;;  %v1434_v62 = vmul.f32 %v3039_v14, %v3307_v53  ;;  %v1435_v11 = vmul.f32 %v3039_v14, %v3308_v15  ;;  %v1436_v54 = vmul.f32 %v3039_v14, %v3309_v51 }
 0x34d   :  { %v1437_v25 = vmul.f32 %v3039_v14, %v3310_v27  ;;  %v1438_v41 = vmul.f32 %v3039_v14, %v3311_v8  ;;  %v1439_v17 = vmul.f32 %v3312_v43, %v3039_v14  ;;  %v1349_v7 = vadd.f32 %v1326_v0, %v1301_v4 }
 0x34e   :  { %v1350_v26 = vadd.f32 %v1326_v0, %v1302_v20  ;;  %v1351_v31 = vadd.f32 %v1326_v0, %v1303_v56  ;;  %v1352_v9 = vadd.f32 %v1326_v0, %v1304_v44  ;;  %v1353_v52 = vadd.f32 %v1326_v0, %v1305_v58 }
 0x34f   :  { %v1354_v40 = vadd.f32 %v1326_v0, %v1306_v60  ;;  %v1355_v32 = vadd.f32 %v1326_v0, %v1307_v61  ;;  %v1461_v36 = vadd.f32 %v1433_v28, %v1326_v0  ;;  %v1377_v19 = vmax.f32 %v1349_v7, 0.0 }
 0x350   :  { %v1378_v23 = vmax.f32 %v1350_v26, 0.0  ;;  %v1379_v39 = vmax.f32 %v1351_v31, 0.0  ;;  %v1380_v12 = vmax.f32 %v1352_v9, 0.0  ;;  %v1381_v16 = vmax.f32 %v1353_v52, 0.0 }
 0x351   :  { %v1382_v5 = vmax.f32 %v1354_v40, 0.0  ;;  %v1383_v10 = vmax.f32 %v1355_v32, 0.0  ;;  %v1462_v50 = vadd.f32 %v1434_v62, %v1326_v0  ;;  %1405 = vst [vmem:[%s3219_s4 + $0xa8] sm:$0xff] %v1377_v19  ;;  %v1463_v14 = vadd.f32 %v1435_v11, %v1326_v0 }
 0x352   :  { %1406 = vst [vmem:[%s3219_s4 + $0xb0] sm:$0xff] %v1378_v23  ;;  %1407 = vst [vmem:[%s3219_s4 + $0xb8] sm:$0xff] %v1379_v39  ;;  %v1464_v37 = vadd.f32 %v1436_v54, %v1326_v0  ;;  %v1465_v6 = vadd.f32 %v1437_v25, %v1326_v0  ;;  %v1466_v63 = vadd.f32 %v1438_v41, %v1326_v0  ;;  %v1489_v21 = vmax.f32 %v1461_v36, 0.0 }
 0x353   :  { %1408 = vst [vmem:[%s3219_s4 + $0xc0] sm:$0xff] %v1380_v12  ;;  %1409 = vst [vmem:[%s3219_s4 + $0xc8] sm:$0xff] %v1381_v16  ;;  %v1467_v33 = vadd.f32 %v1439_v17, %v1326_v0  ;;  %v1490_v13 = vmax.f32 %v1462_v50, 0.0  ;;  %v1491_v30 = vmax.f32 %v1463_v14, 0.0 }
 0x354   :  { %1410 = vst [vmem:[%s3219_s4 + $0xd0] sm:$0xff] %v1382_v5  ;;  %1411 = vst.msk [vmem:[%s3219_s4 + $0xd8] sm:$0xff] %vm955_vm0, %v1383_v10  ;;  %v1492_v24 = vmax.f32 %v1464_v37, 0.0  ;;  %v1493_v22 = vmax.f32 %v1465_v6, 0.0  ;;  %v1494_v49 = vmax.f32 %v1466_v63, 0.0 }
 0x355   :  { %v1495_v35 = vmax.f32 %v1467_v33, 0.0  ;;  %1662 = vst [vmem:[%s3219_s4 + $0x188] sm:$0xff] %v1489_v21  ;;  %1663 = vst [vmem:[%s3219_s4 + $0x190] sm:$0xff] %v1490_v13 }
 0x356   :  { %1664 = vst [vmem:[%s3219_s4 + $0x198] sm:$0xff] %v1491_v30  ;;  %1665 = vst [vmem:[%s3219_s4 + $0x1a0] sm:$0xff] %v1492_v24 }
 0x357   :  { %1666 = vst [vmem:[%s3219_s4 + $0x1a8] sm:$0xff] %v1493_v22  ;;  %1667 = vst [vmem:[%s3219_s4 + $0x1b0] sm:$0xff] %v1494_v49 }
 0x358   :  { %1668 = vst.msk [vmem:[%s3219_s4 + $0x1b8] sm:$0xff] %vm955_vm0, %v1495_v35 }

// kernel: net22_2_forward.5
= control target key start
LH: loop header
LB: loop body
LE: loop exit
PB: predicated region body
PF: predicated region fallthrough
CT: control target
= control target key end

     0   :  { %v520_v3 = vlaneseq  ;;  %v8601_v7 = vmov 1983009808   ;;  %s10073_s0 = inlined_call_operand.vmem [shape: f32[2,24960], index: 0, kind: input, shape index: {}]   ;;  %s10074_s1 = inlined_call_operand.vmem [shape: f32[16,24960], index: 1, kind: input, shape index: {}]   ;;  %s10075_s2 = inlined_call_operand.vmem [shape: f32[1,16], index: 2, kind: input, shape index: {}]   ;;  %s10076_s3 = inlined_call_operand.vmem [shape: f32[16,10], index: 3, kind: input, shape index: {}]   ;;  %s10077_s4 = inlined_call_operand.vmem [shape: f32[1,10], index: 4, kind: input, shape index: {}]   ;;  %s10078_s5 = inlined_call_operand.hbm [shape: f32[2,10], index: 5, kind: output, shape index: {}]  }
   0x1   :  { %v266_v0 = vld [vmem:[%s10074_s1 + $0x620] sm:$0xff]  ;;  %v268_v1 = vld [vmem:[%s10074_s1 + $0x630] sm:$0xff]  ;;  %v265_v2 = vld [vmem:[%s10074_s1 + $0x618] sm:$0xff]  ;;  %v518_v8 = vunpack.c.l.s4 %v8601_v7 }
   0x2   :  { %1571 = vmatprep.subr.mxu0 %v266_v0  ;;  %1641 = vmatprep.subr.mxu1 %v268_v1  ;;  %v267_v4 = vld [vmem:[%s10074_s1 + $0x628] sm:$0xff]  ;;  %v73_v6 = vld [vmem:[%s10074_s1 + $0x18] sm:$0xff]  ;;  %v21_v9 = vld [vmem:[%s10073_s0] sm:$0xff]  ;;  %v521_v10 = vshrl.u32 %v520_v3, 7 }
   0x3   :  { %v71_v5 = vld [vmem:[%s10074_s1 + $0x8] sm:$0xff]  ;;  %1572 = vmatpush1.xpose.msra.mxu0 %v265_v2  ;;  %1642 = vmatpush1.xpose.msra.mxu1 %v267_v4  ;;  %v70_v11 = vld [vmem:[%s10074_s1] sm:$0xff]  ;;  %v72_v12 = vld [vmem:[%s10074_s1 + $0x10] sm:$0xff]  ;;  %v519_v13 = vunpack.c.0.s8 %v518_v8  ;;  %v516_v14 = vcombine.high %v21_v9, %v21_v9 }
   0x4   :  { %1573 = vmatprep.subr.mxu0 %v71_v5  ;;  %1643 = vmatprep.subr.mxu1 %v73_v6  ;;  %v270_v15 = vld [vmem:[%s10074_s1 + $0x640] sm:$0xff]  ;;  %v272_v16 = vld [vmem:[%s10074_s1 + $0x650] sm:$0xff]  ;;  %v22_v18 = vld [vmem:[%s10073_s0 + $0x8] sm:$0xff] }
   0x5   :  { %v8668_v17 = vsub.s32 %v519_v13, %v521_v10  ;;  %v533_v19 = vcombine.high %v22_v18, %v22_v18  ;;  %v23_v24 = vld [vmem:[%s10073_s0 + $0x10] sm:$0xff]  ;;  %v269_v27 = vld [vmem:[%s10074_s1 + $0x638] sm:$0xff]  ;;  %v271_v28 = vld [vmem:[%s10074_s1 + $0x648] sm:$0xff] }
   0x6   :  { %v75_v29 = vld [vmem:[%s10074_s1 + $0x28] sm:$0xff]  ;;  %v77_v30 = vld [vmem:[%s10074_s1 + $0x38] sm:$0xff]  ;;  %v550_v33 = vcombine.high %v23_v24, %v23_v24  ;;  %v74_v34 = vld [vmem:[%s10074_s1 + $0x20] sm:$0xff] }
   0x7   :  { %1574 = vmatpush1.xpose.msra.mxu0 %v70_v11  ;;  %1644 = vmatpush1.xpose.msra.mxu1 %v72_v12  ;;  %v523_v20 = vrot.slane %v21_v9, %v8668_v17  ;;  %v530_v21 = vrot.slane %v516_v14, %v8668_v17  ;;  %v540_v22 = vrot.slane %v22_v18, %v8668_v17  ;;  %v76_v35 = vld [vmem:[%s10074_s1 + $0x30] sm:$0xff]  ;;  %v274_v36 = vld [vmem:[%s10074_s1 + $0x660] sm:$0xff]  ;;  %v24_v40 = vld [vmem:[%s10073_s0 + $0x18] sm:$0xff] }
   0x8   :  { %1711 = vmatprep.subr.mxu0 %v270_v15  ;;  %1781 = vmatprep.subr.mxu1 %v272_v16  ;;  %v547_v23 = vrot.slane %v533_v19, %v8668_v17  ;;  %v276_v37 = vld [vmem:[%s10074_s1 + $0x670] sm:$0xff]  ;;  %v557_v38 = vrot.slane %v23_v24, %v8668_v17  ;;  %v564_v39 = vrot.slane %v550_v33, %v8668_v17  ;;  %v273_v41 = vld [vmem:[%s10074_s1 + $0x658] sm:$0xff]  ;;  %v275_v42 = vld [vmem:[%s10074_s1 + $0x668] sm:$0xff] }
   0x9   :  { %v531_v25 = vcombine.high %v523_v20, %v523_v20  ;;  %v532_v26 = vcombine.high %v530_v21, %v530_v21  ;;  %v548_v31 = vcombine.high %v540_v22, %v540_v22  ;;  %v79_v43 = vld [vmem:[%s10074_s1 + $0x48] sm:$0xff]  ;;  %v81_v44 = vld [vmem:[%s10074_s1 + $0x58] sm:$0xff]  ;;  %v567_v47 = vcombine.high %v24_v40, %v24_v40  ;;  %v78_v48 = vld [vmem:[%s10074_s1 + $0x40] sm:$0xff] }
   0xa   :  { %v549_v32 = vcombine.high %v547_v23, %v547_v23  ;;  %v565_v45 = vcombine.high %v557_v38, %v557_v38  ;;  %v566_v46 = vcombine.high %v564_v39, %v564_v39  ;;  %v80_v49 = vld [vmem:[%s10074_s1 + $0x50] sm:$0xff]  ;;  %v278_v50 = vld [vmem:[%s10074_s1 + $0x680] sm:$0xff]  ;;  %v574_v52 = vrot.slane %v24_v40, %v8668_v17  ;;  %v277_v55 = vld [vmem:[%s10074_s1 + $0x678] sm:$0xff] }
   0xb   :  { %1607 = vmatprep.mubr.f32.mxu0 %v531_v25  ;;  %1677 = vmatprep.mubr.f32.mxu1 %v532_v26  ;;  %v280_v51 = vld [vmem:[%s10074_s1 + $0x690] sm:$0xff]  ;;  %v581_v53 = vrot.slane %v567_v47, %v8668_v17  ;;  %v25_v54 = vld [vmem:[%s10073_s0 + $0x20] sm:$0xff]  ;;  %v279_v56 = vld [vmem:[%s10074_s1 + $0x688] sm:$0xff] }
   0xc   :  { %1608 = vmatmul.mubr.f32.vlgmr.msra.gmra.mxu0 %v523_v20  ;;  %1678 = vmatmul.mubr.f32.vlgmr.msra.gmra.mxu1 %v530_v21  ;;  %v83_v57 = vld [vmem:[%s10074_s1 + $0x68] sm:$0xff]  ;;  %v85_v58 = vld [vmem:[%s10074_s1 + $0x78] sm:$0xff]  ;;  %v582_v59 = vcombine.high %v574_v52, %v574_v52  ;;  %v584_v61 = vcombine.high %v25_v54, %v25_v54  ;;  %v82_v62 = vld [vmem:[%s10074_s1 + $0x60] sm:$0xff]  ;;  %v591_v2 = vrot.slane %v25_v54, %v8668_v17 }
   0xd   :  { %1712 = vmatpush1.xpose.msra.mxu0 %v269_v27  ;;  %1782 = vmatpush1.xpose.msra.mxu1 %v271_v28  ;;  %v583_v60 = vcombine.high %v581_v53, %v581_v53  ;;  %v84_v63 = vld [vmem:[%s10074_s1 + $0x70] sm:$0xff]  ;;  %v282_v0 = vld [vmem:[%s10074_s1 + $0x6a0] sm:$0xff]  ;;  %v26_v4 = vld [vmem:[%s10073_s0 + $0x28] sm:$0xff] }
   0xe   :  { %1713 = vmatprep.subr.mxu0 %v75_v29  ;;  %1783 = vmatprep.subr.mxu1 %v77_v30  ;;  %v284_v1 = vld [vmem:[%s10074_s1 + $0x6b0] sm:$0xff]  ;;  %v598_v3 = vrot.slane %v584_v61, %v8668_v17  ;;  %v281_v5 = vld [vmem:[%s10074_s1 + $0x698] sm:$0xff]  ;;  %v283_v6 = vld [vmem:[%s10074_s1 + $0x6a8] sm:$0xff]  ;;  %v599_v9 = vcombine.high %v591_v2, %v591_v2  ;;  %v601_v11 = vcombine.high %v26_v4, %v26_v4 }
   0xf   :  { %1747 = vmatprep.mubr.f32.mxu0 %v548_v31  ;;  %1817 = vmatprep.mubr.f32.mxu1 %v549_v32  ;;  %v87_v7 = vld [vmem:[%s10074_s1 + $0x88] sm:$0xff]  ;;  %v89_v8 = vld [vmem:[%s10074_s1 + $0x98] sm:$0xff]  ;;  %v86_v12 = vld [vmem:[%s10074_s1 + $0x80] sm:$0xff]  ;;  %v608_v16 = vrot.slane %v26_v4, %v8668_v17 }
  0x10   :  { %v600_v10 = vcombine.high %v598_v3, %v598_v3  ;;  %v88_v13 = vld [vmem:[%s10074_s1 + $0x90] sm:$0xff]  ;;  %v286_v14 = vld [vmem:[%s10074_s1 + $0x6c0] sm:$0xff]  ;;  %v615_v18 = vrot.slane %v601_v11, %v8668_v17  ;;  %v285_v20 = vld [vmem:[%s10074_s1 + $0x6b8] sm:$0xff] }
  0x11   :  { %1714 = vmatpush1.xpose.msra.mxu0 %v74_v34  ;;  %1784 = vmatpush1.xpose.msra.mxu1 %v76_v35  ;;  %v288_v15 = vld [vmem:[%s10074_s1 + $0x6d0] sm:$0xff]  ;;  %v287_v21 = vld [vmem:[%s10074_s1 + $0x6c8] sm:$0xff]  ;;  %v616_v24 = vcombine.high %v608_v16, %v608_v16  ;;  %v90_v27 = vld [vmem:[%s10074_s1 + $0xa0] sm:$0xff] }
  0x12   :  { %1851 = vmatprep.subr.mxu0 %v274_v36  ;;  %1921 = vmatprep.subr.mxu1 %v276_v37  ;;  %v27_v19 = vld [vmem:[%s10073_s0 + $0x30] sm:$0xff]  ;;  %v617_v25 = vcombine.high %v615_v18, %v615_v18  ;;  %v290_v29 = vld [vmem:[%s10074_s1 + $0x6e0] sm:$0xff]  ;;  %v28_v33 = vld [vmem:[%s10073_s0 + $0x38] sm:$0xff] }
  0x13   :  { %v618_v26 = vcombine.high %v27_v19, %v27_v19  ;;  %v92_v28 = vld [vmem:[%s10074_s1 + $0xb0] sm:$0xff]  ;;  %v625_v31 = vrot.slane %v27_v19, %v8668_v17  ;;  %v289_v34 = vld [vmem:[%s10074_s1 + $0x6d8] sm:$0xff]  ;;  %v291_v35 = vld [vmem:[%s10074_s1 + $0x6e8] sm:$0xff]  ;;  %v635_v40 = vcombine.high %v28_v33, %v28_v33 }
  0x14   :  { %1748 = vmatmul.mubr.f32.vlgmr.msra.gmra.mxu0 %v540_v22  ;;  %1818 = vmatmul.mubr.f32.vlgmr.msra.gmra.mxu1 %v547_v23  ;;  %v91_v22 = vld [vmem:[%s10074_s1 + $0xa8] sm:$0xff]  ;;  %v93_v23 = vld [vmem:[%s10074_s1 + $0xb8] sm:$0xff]  ;;  %v292_v30 = vld [vmem:[%s10074_s1 + $0x6f0] sm:$0xff] }
  0x15   :  { %1852 = vmatpush1.xpose.msra.mxu0 %v273_v41  ;;  %1922 = vmatpush1.xpose.msra.mxu1 %v275_v42  ;;  %v632_v32 = vrot.slane %v618_v26, %v8668_v17  ;;  %v95_v36 = vld [vmem:[%s10074_s1 + $0xc8] sm:$0xff]  ;;  %v97_v37 = vld [vmem:[%s10074_s1 + $0xd8] sm:$0xff]  ;;  %v94_v41 = vld [vmem:[%s10074_s1 + $0xc0] sm:$0xff] }
  0x16   :  { %1853 = vmatprep.subr.mxu0 %v79_v43  ;;  %1923 = vmatprep.subr.mxu1 %v81_v44  ;;  %v96_v42 = vld [vmem:[%s10074_s1 + $0xd0] sm:$0xff]  ;;  %v294_v43 = vld [vmem:[%s10074_s1 + $0x700] sm:$0xff]  ;;  %v30_v61 = vld [vmem:[%s10073_s0 + $0x48] sm:$0xff] }
  0x17   :  { %1887 = vmatprep.mubr.f32.mxu0 %v565_v45  ;;  %1957 = vmatprep.mubr.f32.mxu1 %v566_v46  ;;  %v296_v44 = vld [vmem:[%s10074_s1 + $0x710] sm:$0xff]  ;;  %v642_v45 = vrot.slane %v28_v33, %v8668_v17  ;;  %v649_v46 = vrot.slane %v635_v40, %v8668_v17  ;;  %v29_v47 = vld [vmem:[%s10073_s0 + $0x40] sm:$0xff]  ;;  %v669_v4 = vcombine.high %v30_v61, %v30_v61 }
  0x18   :  { %v652_v54 = vcombine.high %v29_v47, %v29_v47  ;;  %v31_v11 = vld [vmem:[%s10073_s0 + $0x50] sm:$0xff] }
  0x19   :  { %1854 = vmatpush1.xpose.msra.mxu0 %v78_v48  ;;  %1924 = vmatpush1.xpose.msra.mxu1 %v80_v49  ;;  %v293_v48 = vld [vmem:[%s10074_s1 + $0x6f8] sm:$0xff]  ;;  %v295_v49 = vld [vmem:[%s10074_s1 + $0x708] sm:$0xff]  ;;  %v686_v19 = vcombine.high %v31_v11, %v31_v11 }
  0x1a   :  { %1991 = vmatprep.subr.mxu0 %v278_v50  ;;  %2061 = vmatprep.subr.mxu1 %v280_v51  ;;  %v99_v50 = vld [vmem:[%s10074_s1 + $0xe8] sm:$0xff]  ;;  %v101_v51 = vld [vmem:[%s10074_s1 + $0xf8] sm:$0xff] }
  0x1c   :  { %1888 = vmatmul.mubr.f32.vlgmr.msra.gmra.mxu0 %v557_v38  ;;  %1958 = vmatmul.mubr.f32.vlgmr.msra.gmra.mxu1 %v564_v39  ;;  %v633_v38 = vcombine.high %v625_v31, %v625_v31  ;;  %v634_v39 = vcombine.high %v632_v32, %v632_v32 }
  0x1d   :  { %1992 = vmatpush1.xpose.msra.mxu0 %v277_v55  ;;  %2062 = vmatpush1.xpose.msra.mxu1 %v279_v56  ;;  %v98_v55 = vld [vmem:[%s10074_s1 + $0xe0] sm:$0xff]  ;;  %v100_v56 = vld [vmem:[%s10074_s1 + $0xf0] sm:$0xff] }
  0x1e   :  { %1993 = vmatprep.subr.mxu0 %v83_v57  ;;  %2063 = vmatprep.subr.mxu1 %v85_v58  ;;  %v298_v57 = vld [vmem:[%s10074_s1 + $0x720] sm:$0xff]  ;;  %v300_v58 = vld [vmem:[%s10074_s1 + $0x730] sm:$0xff] }
  0x1f   :  { %2027 = vmatprep.mubr.f32.mxu0 %v582_v59  ;;  %2097 = vmatprep.mubr.f32.mxu1 %v583_v60  ;;  %v659_v59 = vrot.slane %v29_v47, %v8668_v17  ;;  %v666_v60 = vrot.slane %v652_v54, %v8668_v17 }
  0x21   :  { %1994 = vmatpush1.xpose.msra.mxu0 %v82_v62  ;;  %2064 = vmatpush1.xpose.msra.mxu1 %v84_v63  ;;  %v297_v62 = vld [vmem:[%s10074_s1 + $0x718] sm:$0xff]  ;;  %v299_v63 = vld [vmem:[%s10074_s1 + $0x728] sm:$0xff] }
  0x22   :  { %2131 = vmatprep.subr.mxu0 %v282_v0  ;;  %2201 = vmatprep.subr.mxu1 %v284_v1  ;;  %v103_v0 = vld [vmem:[%s10074_s1 + $0x108] sm:$0xff]  ;;  %v105_v1 = vld [vmem:[%s10074_s1 + $0x118] sm:$0xff] }
  0x24   :  { %2028 = vmatmul.mubr.f32.vlgmr.msra.gmra.mxu0 %v574_v52  ;;  %2098 = vmatmul.mubr.f32.vlgmr.msra.gmra.mxu1 %v581_v53  ;;  %v650_v52 = vcombine.high %v642_v45, %v642_v45  ;;  %v651_v53 = vcombine.high %v649_v46, %v649_v46 }
  0x25   :  { %2132 = vmatpush1.xpose.msra.mxu0 %v281_v5  ;;  %2202 = vmatpush1.xpose.msra.mxu1 %v283_v6  ;;  %v102_v5 = vld [vmem:[%s10074_s1 + $0x100] sm:$0xff]  ;;  %v104_v6 = vld [vmem:[%s10074_s1 + $0x110] sm:$0xff] }
  0x26   :  { %2133 = vmatprep.subr.mxu0 %v87_v7  ;;  %2203 = vmatprep.subr.mxu1 %v89_v8  ;;  %v302_v7 = vld [vmem:[%s10074_s1 + $0x740] sm:$0xff]  ;;  %v304_v8 = vld [vmem:[%s10074_s1 + $0x750] sm:$0xff] }
  0x27   :  { %2167 = vmatprep.mubr.f32.mxu0 %v599_v9  ;;  %2237 = vmatprep.mubr.f32.mxu1 %v600_v10  ;;  %v676_v9 = vrot.slane %v30_v61, %v8668_v17  ;;  %v683_v10 = vrot.slane %v669_v4, %v8668_v17 }
  0x29   :  { %2134 = vmatpush1.xpose.msra.mxu0 %v86_v12  ;;  %2204 = vmatpush1.xpose.msra.mxu1 %v88_v13  ;;  %v301_v12 = vld [vmem:[%s10074_s1 + $0x738] sm:$0xff]  ;;  %v303_v13 = vld [vmem:[%s10074_s1 + $0x748] sm:$0xff] }
  0x2a   :  { %2271 = vmatprep.subr.mxu0 %v286_v14  ;;  %2341 = vmatprep.subr.mxu1 %v288_v15  ;;  %v107_v14 = vld [vmem:[%s10074_s1 + $0x128] sm:$0xff]  ;;  %v109_v15 = vld [vmem:[%s10074_s1 + $0x138] sm:$0xff] }
  0x2c   :  { %2168 = vmatmul.mubr.f32.vlgmr.msra.gmra.mxu0 %v591_v2  ;;  %2238 = vmatmul.mubr.f32.vlgmr.msra.gmra.mxu1 %v598_v3  ;;  %v667_v2 = vcombine.high %v659_v59, %v659_v59  ;;  %v668_v3 = vcombine.high %v666_v60, %v666_v60 }
  0x2d   :  { %2272 = vmatpush1.xpose.msra.mxu0 %v285_v20  ;;  %2342 = vmatpush1.xpose.msra.mxu1 %v287_v21 }
  0x2e   :  { %2273 = vmatprep.subr.mxu0 %v91_v22  ;;  %2343 = vmatprep.subr.mxu1 %v93_v23 }
  0x2f   :  { %2307 = vmatprep.mubr.f32.mxu0 %v616_v24  ;;  %2377 = vmatprep.mubr.f32.mxu1 %v617_v25 }
  0x31   :  { %2274 = vmatpush1.xpose.msra.mxu0 %v90_v27  ;;  %2344 = vmatpush1.xpose.msra.mxu1 %v92_v28 }
  0x32   :  { %2411 = vmatprep.subr.mxu0 %v290_v29  ;;  %2481 = vmatprep.subr.mxu1 %v292_v30 }
  0x34   :  { %2308 = vmatmul.mubr.f32.vlgmr.msra.gmra.mxu0 %v608_v16  ;;  %2378 = vmatmul.mubr.f32.vlgmr.msra.gmra.mxu1 %v615_v18  ;;  %v684_v16 = vcombine.high %v676_v9, %v676_v9  ;;  %v685_v18 = vcombine.high %v683_v10, %v683_v10 }
  0x35   :  { %2412 = vmatpush1.xpose.msra.mxu0 %v289_v34  ;;  %2482 = vmatpush1.xpose.msra.mxu1 %v291_v35 }
  0x36   :  { %2413 = vmatprep.subr.mxu0 %v95_v36  ;;  %2483 = vmatprep.subr.mxu1 %v97_v37 }
  0x37   :  { %2447 = vmatprep.mubr.f32.mxu0 %v633_v38  ;;  %2517 = vmatprep.mubr.f32.mxu1 %v634_v39 }
  0x39   :  { %2414 = vmatpush1.xpose.msra.mxu0 %v94_v41  ;;  %2484 = vmatpush1.xpose.msra.mxu1 %v96_v42 }
  0x3a   :  { %2551 = vmatprep.subr.mxu0 %v294_v43  ;;  %2621 = vmatprep.subr.mxu1 %v296_v44 }
  0x3c   :  { %2448 = vmatmul.mubr.f32.vlgmr.msra.gmra.mxu0 %v625_v31  ;;  %2518 = vmatmul.mubr.f32.vlgmr.msra.gmra.mxu1 %v632_v32 }
  0x3d   :  { %2552 = vmatpush1.xpose.msra.mxu0 %v293_v48  ;;  %2622 = vmatpush1.xpose.msra.mxu1 %v295_v49 }
  0x3e   :  { %2553 = vmatprep.subr.mxu0 %v99_v50  ;;  %2623 = vmatprep.subr.mxu1 %v101_v51 }
  0x3f   :  { %2587 = vmatprep.mubr.f32.mxu0 %v650_v52  ;;  %2657 = vmatprep.mubr.f32.mxu1 %v651_v53 }
  0x41   :  { %2554 = vmatpush1.xpose.msra.mxu0 %v98_v55  ;;  %2624 = vmatpush1.xpose.msra.mxu1 %v100_v56 }
  0x42   :  { %2691 = vmatprep.subr.mxu0 %v298_v57  ;;  %2761 = vmatprep.subr.mxu1 %v300_v58 }
  0x44   :  { %2588 = vmatmul.mubr.f32.vlgmr.msra.gmra.mxu0 %v642_v45  ;;  %2658 = vmatmul.mubr.f32.vlgmr.msra.gmra.mxu1 %v649_v46 }
  0x45   :  { %2692 = vmatpush1.xpose.msra.mxu0 %v297_v62  ;;  %2762 = vmatpush1.xpose.msra.mxu1 %v299_v63 }
  0x46   :  { %2693 = vmatprep.subr.mxu0 %v103_v0  ;;  %2763 = vmatprep.subr.mxu1 %v105_v1 }
  0x47   :  { %2727 = vmatprep.mubr.f32.mxu0 %v667_v2  ;;  %2797 = vmatprep.mubr.f32.mxu1 %v668_v3 }
  0x49   :  { %2694 = vmatpush1.xpose.msra.mxu0 %v102_v5  ;;  %2764 = vmatpush1.xpose.msra.mxu1 %v104_v6 }
  0x4a   :  { %2831 = vmatprep.subr.mxu0 %v302_v7  ;;  %2901 = vmatprep.subr.mxu1 %v304_v8 }
  0x4b   :  { %10 = vsyncpa [#allocation3], 0  ;;  %v106_v20 = vld [vmem:[%s10074_s1 + $0x120] sm:$0xff]  ;;  %v108_v21 = vld [vmem:[%s10074_s1 + $0x130] sm:$0xff]  ;;  %v693_v24 = vrot.slane %v31_v11, %v8668_v17  ;;  %v700_v25 = vrot.slane %v686_v19, %v8668_v17  ;;  %vm8603_vm0 = vmmov 0   ;;  %vm8413_vm1 = vcmask 130048  }
  0x4c   :  { %2728 = vmatmul.mubr.f32.vlgmr.msra.gmra.mxu0 %v659_v59  ;;  %2798 = vmatmul.mubr.f32.vlgmr.msra.gmra.mxu1 %v666_v60  ;;  %v306_v22 = vld [vmem:[%s10074_s1 + $0x760] sm:$0xff]  ;;  %v308_v23 = vld [vmem:[%s10074_s1 + $0x770] sm:$0xff]  ;;  %v32_v26 = vld [vmem:[%s10073_s0 + $0x58] sm:$0xff]  ;;  %s8604_s10 = smov [#allocation2]   ;;  %vm8487_vm2 = vcmask 74752  }
  0x4d   :  { %2832 = vmatpush1.xpose.msra.mxu0 %v301_v12  ;;  %2902 = vmatpush1.xpose.msra.mxu1 %v303_v13  ;;  %v305_v27 = vld [vmem:[%s10074_s1 + $0x758] sm:$0xff]  ;;  %v307_v28 = vld [vmem:[%s10074_s1 + $0x768] sm:$0xff]  ;;  %v701_v31 = vcombine.high %v693_v24, %v693_v24  ;;  %v702_v32 = vcombine.high %v700_v25, %v700_v25  ;;  %v703_v33 = vcombine.high %v32_v26, %v32_v26  ;;  %v110_v34 = vld [vmem:[%s10074_s1 + $0x140] sm:$0xff] }
  0x4e   :  { %2833 = vmatprep.subr.mxu0 %v107_v14  ;;  %2903 = vmatprep.subr.mxu1 %v109_v15  ;;  %v111_v29 = vld [vmem:[%s10074_s1 + $0x148] sm:$0xff]  ;;  %v113_v30 = vld [vmem:[%s10074_s1 + $0x158] sm:$0xff]  ;;  %v112_v35 = vld [vmem:[%s10074_s1 + $0x150] sm:$0xff]  ;;  %v710_v38 = vrot.slane %v32_v26, %v8668_v17 }
  0x4f   :  { %2867 = vmatprep.mubr.f32.mxu0 %v684_v16  ;;  %2937 = vmatprep.mubr.f32.mxu1 %v685_v18  ;;  %v310_v36 = vld [vmem:[%s10074_s1 + $0x780] sm:$0xff]  ;;  %v312_v37 = vld [vmem:[%s10074_s1 + $0x790] sm:$0xff]  ;;  %v717_v39 = vrot.slane %v703_v33, %v8668_v17  ;;  %v309_v41 = vld [vmem:[%s10074_s1 + $0x778] sm:$0xff] }
  0x50   :  { %v33_v40 = vld [vmem:[%s10073_s0 + $0x60] sm:$0xff]  ;;  %v311_v42 = vld [vmem:[%s10074_s1 + $0x788] sm:$0xff]  ;;  %v117_v44 = vld [vmem:[%s10074_s1 + $0x178] sm:$0xff]  ;;  %v718_v45 = vcombine.high %v710_v38, %v710_v38 }
  0x51   :  { %2834 = vmatpush1.xpose.msra.mxu0 %v106_v20  ;;  %2904 = vmatpush1.xpose.msra.mxu1 %v108_v21  ;;  %v115_v43 = vld [vmem:[%s10074_s1 + $0x168] sm:$0xff]  ;;  %v719_v46 = vcombine.high %v717_v39, %v717_v39  ;;  %v720_v47 = vcombine.high %v33_v40, %v33_v40  ;;  %v114_v48 = vld [vmem:[%s10074_s1 + $0x160] sm:$0xff]  ;;  %v116_v49 = vld [vmem:[%s10074_s1 + $0x170] sm:$0xff]  ;;  %v727_v52 = vrot.slane %v33_v40, %v8668_v17 }
  0x52   :  { %2971 = vmatprep.subr.mxu0 %v306_v22  ;;  %3041 = vmatprep.subr.mxu1 %v308_v23  ;;  %v314_v50 = vld [vmem:[%s10074_s1 + $0x7a0] sm:$0xff]  ;;  %v316_v51 = vld [vmem:[%s10074_s1 + $0x7b0] sm:$0xff]  ;;  %v34_v54 = vld [vmem:[%s10073_s0 + $0x68] sm:$0xff] }
  0x53   :  { %v734_v53 = vrot.slane %v720_v47, %v8668_v17  ;;  %v313_v55 = vld [vmem:[%s10074_s1 + $0x798] sm:$0xff]  ;;  %v315_v56 = vld [vmem:[%s10074_s1 + $0x7a8] sm:$0xff]  ;;  %v735_v59 = vcombine.high %v727_v52, %v727_v52  ;;  %v737_v61 = vcombine.high %v34_v54, %v34_v54  ;;  %v118_v62 = vld [vmem:[%s10074_s1 + $0x180] sm:$0xff]  ;;  %v744_v2 = vrot.slane %v34_v54, %v8668_v17 }
  0x54   :  { %2868 = vmatmul.mubr.f32.vlgmr.msra.gmra.mxu0 %v676_v9  ;;  %2938 = vmatmul.mubr.f32.vlgmr.msra.gmra.mxu1 %v683_v10  ;;  %v119_v57 = vld [vmem:[%s10074_s1 + $0x188] sm:$0xff]  ;;  %v121_v58 = vld [vmem:[%s10074_s1 + $0x198] sm:$0xff]  ;;  %v120_v63 = vld [vmem:[%s10074_s1 + $0x190] sm:$0xff] }
  0x55   :  { %2972 = vmatpush1.xpose.msra.mxu0 %v305_v27  ;;  %3042 = vmatpush1.xpose.msra.mxu1 %v307_v28  ;;  %v736_v60 = vcombine.high %v734_v53, %v734_v53  ;;  %v318_v0 = vld [vmem:[%s10074_s1 + $0x7c0] sm:$0xff]  ;;  %v320_v1 = vld [vmem:[%s10074_s1 + $0x7d0] sm:$0xff]  ;;  %v751_v3 = vrot.slane %v737_v61, %v8668_v17  ;;  %v317_v5 = vld [vmem:[%s10074_s1 + $0x7b8] sm:$0xff]  ;;  %v752_v9 = vcombine.high %v744_v2, %v744_v2 }
  0x56   :  { %2973 = vmatprep.subr.mxu0 %v111_v29  ;;  %3043 = vmatprep.subr.mxu1 %v113_v30  ;;  %v35_v4 = vld [vmem:[%s10073_s0 + $0x70] sm:$0xff]  ;;  %v319_v6 = vld [vmem:[%s10074_s1 + $0x7c8] sm:$0xff]  ;;  %v125_v8 = vld [vmem:[%s10074_s1 + $0x1b8] sm:$0xff] }
  0x57   :  { %3007 = vmatprep.mubr.f32.mxu0 %v701_v31  ;;  %3077 = vmatprep.mubr.f32.mxu1 %v702_v32  ;;  %v123_v7 = vld [vmem:[%s10074_s1 + $0x1a8] sm:$0xff]  ;;  %v753_v10 = vcombine.high %v751_v3, %v751_v3  ;;  %v754_v11 = vcombine.high %v35_v4, %v35_v4  ;;  %v122_v12 = vld [vmem:[%s10074_s1 + $0x1a0] sm:$0xff]  ;;  %v124_v13 = vld [vmem:[%s10074_s1 + $0x1b0] sm:$0xff]  ;;  %v761_v16 = vrot.slane %v35_v4, %v8668_v17 }
  0x58   :  { %v322_v14 = vld [vmem:[%s10074_s1 + $0x7e0] sm:$0xff]  ;;  %v324_v15 = vld [vmem:[%s10074_s1 + $0x7f0] sm:$0xff]  ;;  %v36_v19 = vld [vmem:[%s10073_s0 + $0x78] sm:$0xff] }
  0x59   :  { %2974 = vmatpush1.xpose.msra.mxu0 %v110_v34  ;;  %3044 = vmatpush1.xpose.msra.mxu1 %v112_v35  ;;  %v768_v18 = vrot.slane %v754_v11, %v8668_v17  ;;  %v321_v20 = vld [vmem:[%s10074_s1 + $0x7d8] sm:$0xff]  ;;  %v323_v21 = vld [vmem:[%s10074_s1 + $0x7e8] sm:$0xff]  ;;  %v771_v26 = vcombine.high %v36_v19, %v36_v19  ;;  %v126_v27 = vld [vmem:[%s10074_s1 + $0x1c0] sm:$0xff]  ;;  %v778_v31 = vrot.slane %v36_v19, %v8668_v17 }
  0x5a   :  { %3111 = vmatprep.subr.mxu0 %v310_v36  ;;  %3181 = vmatprep.subr.mxu1 %v312_v37  ;;  %v127_v22 = vld [vmem:[%s10074_s1 + $0x1c8] sm:$0xff]  ;;  %v129_v23 = vld [vmem:[%s10074_s1 + $0x1d8] sm:$0xff]  ;;  %v128_v28 = vld [vmem:[%s10074_s1 + $0x1d0] sm:$0xff] }
  0x5b   :  { %v326_v29 = vld [vmem:[%s10074_s1 + $0x800] sm:$0xff]  ;;  %v328_v30 = vld [vmem:[%s10074_s1 + $0x810] sm:$0xff]  ;;  %v785_v32 = vrot.slane %v771_v26, %v8668_v17  ;;  %v325_v34 = vld [vmem:[%s10074_s1 + $0x7f8] sm:$0xff] }
  0x5c   :  { %3008 = vmatmul.mubr.f32.vlgmr.msra.gmra.mxu0 %v693_v24  ;;  %3078 = vmatmul.mubr.f32.vlgmr.msra.gmra.mxu1 %v700_v25  ;;  %v769_v24 = vcombine.high %v761_v16, %v761_v16  ;;  %v770_v25 = vcombine.high %v768_v18, %v768_v18  ;;  %v37_v33 = vld [vmem:[%s10073_s0 + $0x80] sm:$0xff]  ;;  %v327_v35 = vld [vmem:[%s10074_s1 + $0x808] sm:$0xff]  ;;  %v133_v37 = vld [vmem:[%s10074_s1 + $0x1f8] sm:$0xff] }
  0x5d   :  { %3112 = vmatpush1.xpose.msra.mxu0 %v309_v41  ;;  %3182 = vmatpush1.xpose.msra.mxu1 %v311_v42  ;;  %v131_v36 = vld [vmem:[%s10074_s1 + $0x1e8] sm:$0xff]  ;;  %v788_v40 = vcombine.high %v37_v33, %v37_v33  ;;  %v130_v41 = vld [vmem:[%s10074_s1 + $0x1e0] sm:$0xff]  ;;  %v132_v42 = vld [vmem:[%s10074_s1 + $0x1f0] sm:$0xff] }
  0x5e   :  { %3113 = vmatprep.subr.mxu0 %v115_v43  ;;  %3183 = vmatprep.subr.mxu1 %v117_v44  ;;  %v330_v43 = vld [vmem:[%s10074_s1 + $0x820] sm:$0xff]  ;;  %v332_v44 = vld [vmem:[%s10074_s1 + $0x830] sm:$0xff]  ;;  %v38_v47 = vld [vmem:[%s10073_s0 + $0x88] sm:$0xff] }
  0x5f   :  { %3147 = vmatprep.mubr.f32.mxu0 %v718_v45  ;;  %3217 = vmatprep.mubr.f32.mxu1 %v719_v46  ;;  %v795_v45 = vrot.slane %v37_v33, %v8668_v17  ;;  %v802_v46 = vrot.slane %v788_v40, %v8668_v17  ;;  %v805_v54 = vcombine.high %v38_v47, %v38_v47  ;;  %v39_v61 = vld [vmem:[%s10073_s0 + $0x90] sm:$0xff]  ;;  %v40_v11 = vld [vmem:[%s10073_s0 + $0x98] sm:$0xff]  ;;  %v41_v26 = vld [vmem:[%s10073_s0 + $0xa0] sm:$0xff] }
  0x60   :  { %v822_v4 = vcombine.high %v39_v61, %v39_v61  ;;  %v839_v19 = vcombine.high %v40_v11, %v40_v11  ;;  %v856_v33 = vcombine.high %v41_v26, %v41_v26  ;;  %v42_v40 = vld [vmem:[%s10073_s0 + $0xa8] sm:$0xff] }
  0x61   :  { %3114 = vmatpush1.xpose.msra.mxu0 %v114_v48  ;;  %3184 = vmatpush1.xpose.msra.mxu1 %v116_v49  ;;  %v329_v48 = vld [vmem:[%s10074_s1 + $0x818] sm:$0xff]  ;;  %v331_v49 = vld [vmem:[%s10074_s1 + $0x828] sm:$0xff] }
  0x62   :  { %3251 = vmatprep.subr.mxu0 %v314_v50  ;;  %3321 = vmatprep.subr.mxu1 %v316_v51  ;;  %v135_v50 = vld [vmem:[%s10074_s1 + $0x208] sm:$0xff]  ;;  %v137_v51 = vld [vmem:[%s10074_s1 + $0x218] sm:$0xff] }
  0x64   :  { %3148 = vmatmul.mubr.f32.vlgmr.msra.gmra.mxu0 %v710_v38  ;;  %3218 = vmatmul.mubr.f32.vlgmr.msra.gmra.mxu1 %v717_v39  ;;  %v786_v38 = vcombine.high %v778_v31, %v778_v31  ;;  %v787_v39 = vcombine.high %v785_v32, %v785_v32 }
  0x65   :  { %3252 = vmatpush1.xpose.msra.mxu0 %v313_v55  ;;  %3322 = vmatpush1.xpose.msra.mxu1 %v315_v56  ;;  %v134_v55 = vld [vmem:[%s10074_s1 + $0x200] sm:$0xff]  ;;  %v136_v56 = vld [vmem:[%s10074_s1 + $0x210] sm:$0xff] }
  0x66   :  { %3253 = vmatprep.subr.mxu0 %v119_v57  ;;  %3323 = vmatprep.subr.mxu1 %v121_v58  ;;  %v334_v57 = vld [vmem:[%s10074_s1 + $0x840] sm:$0xff]  ;;  %v336_v58 = vld [vmem:[%s10074_s1 + $0x850] sm:$0xff] }
  0x67   :  { %3287 = vmatprep.mubr.f32.mxu0 %v735_v59  ;;  %3357 = vmatprep.mubr.f32.mxu1 %v736_v60  ;;  %v812_v59 = vrot.slane %v38_v47, %v8668_v17  ;;  %v819_v60 = vrot.slane %v805_v54, %v8668_v17  ;;  %v873_v47 = vcombine.high %v42_v40, %v42_v40  ;;  %v43_v54 = vld [vmem:[%s10073_s0 + $0xb0] sm:$0xff] }
  0x69   :  { %3254 = vmatpush1.xpose.msra.mxu0 %v118_v62  ;;  %3324 = vmatpush1.xpose.msra.mxu1 %v120_v63  ;;  %v333_v62 = vld [vmem:[%s10074_s1 + $0x838] sm:$0xff]  ;;  %v335_v63 = vld [vmem:[%s10074_s1 + $0x848] sm:$0xff] }
  0x6a   :  { %3391 = vmatprep.subr.mxu0 %v318_v0  ;;  %3461 = vmatprep.subr.mxu1 %v320_v1  ;;  %v139_v0 = vld [vmem:[%s10074_s1 + $0x228] sm:$0xff]  ;;  %v141_v1 = vld [vmem:[%s10074_s1 + $0x238] sm:$0xff] }
  0x6c   :  { %3288 = vmatmul.mubr.f32.vlgmr.msra.gmra.mxu0 %v727_v52  ;;  %3358 = vmatmul.mubr.f32.vlgmr.msra.gmra.mxu1 %v734_v53  ;;  %v803_v52 = vcombine.high %v795_v45, %v795_v45  ;;  %v804_v53 = vcombine.high %v802_v46, %v802_v46 }
  0x6d   :  { %3392 = vmatpush1.xpose.msra.mxu0 %v317_v5  ;;  %3462 = vmatpush1.xpose.msra.mxu1 %v319_v6  ;;  %v138_v5 = vld [vmem:[%s10074_s1 + $0x220] sm:$0xff]  ;;  %v140_v6 = vld [vmem:[%s10074_s1 + $0x230] sm:$0xff] }
  0x6e   :  { %3393 = vmatprep.subr.mxu0 %v123_v7  ;;  %3463 = vmatprep.subr.mxu1 %v125_v8  ;;  %v338_v7 = vld [vmem:[%s10074_s1 + $0x860] sm:$0xff]  ;;  %v340_v8 = vld [vmem:[%s10074_s1 + $0x870] sm:$0xff] }
  0x6f   :  { %3427 = vmatprep.mubr.f32.mxu0 %v752_v9  ;;  %3497 = vmatprep.mubr.f32.mxu1 %v753_v10  ;;  %v829_v9 = vrot.slane %v39_v61, %v8668_v17  ;;  %v836_v10 = vrot.slane %v822_v4, %v8668_v17  ;;  %v890_v61 = vcombine.high %v43_v54, %v43_v54  ;;  %v44_v4 = vld [vmem:[%s10073_s0 + $0xb8] sm:$0xff] }
  0x71   :  { %3394 = vmatpush1.xpose.msra.mxu0 %v122_v12  ;;  %3464 = vmatpush1.xpose.msra.mxu1 %v124_v13  ;;  %v337_v12 = vld [vmem:[%s10074_s1 + $0x858] sm:$0xff]  ;;  %v339_v13 = vld [vmem:[%s10074_s1 + $0x868] sm:$0xff] }
  0x72   :  { %3531 = vmatprep.subr.mxu0 %v322_v14  ;;  %3601 = vmatprep.subr.mxu1 %v324_v15  ;;  %v143_v14 = vld [vmem:[%s10074_s1 + $0x248] sm:$0xff]  ;;  %v145_v15 = vld [vmem:[%s10074_s1 + $0x258] sm:$0xff] }
  0x74   :  { %3428 = vmatmul.mubr.f32.vlgmr.msra.gmra.mxu0 %v744_v2  ;;  %3498 = vmatmul.mubr.f32.vlgmr.msra.gmra.mxu1 %v751_v3  ;;  %v820_v2 = vcombine.high %v812_v59, %v812_v59  ;;  %v821_v3 = vcombine.high %v819_v60, %v819_v60 }
  0x75   :  { %3532 = vmatpush1.xpose.msra.mxu0 %v321_v20  ;;  %3602 = vmatpush1.xpose.msra.mxu1 %v323_v21  ;;  %v142_v20 = vld [vmem:[%s10074_s1 + $0x240] sm:$0xff]  ;;  %v144_v21 = vld [vmem:[%s10074_s1 + $0x250] sm:$0xff] }
  0x76   :  { %3533 = vmatprep.subr.mxu0 %v127_v22  ;;  %3603 = vmatprep.subr.mxu1 %v129_v23  ;;  %v342_v22 = vld [vmem:[%s10074_s1 + $0x880] sm:$0xff]  ;;  %v344_v23 = vld [vmem:[%s10074_s1 + $0x890] sm:$0xff] }
  0x77   :  { %3567 = vmatprep.mubr.f32.mxu0 %v769_v24  ;;  %3637 = vmatprep.mubr.f32.mxu1 %v770_v25  ;;  %v846_v24 = vrot.slane %v40_v11, %v8668_v17  ;;  %v853_v25 = vrot.slane %v839_v19, %v8668_v17  ;;  %v907_v11 = vcombine.high %v44_v4, %v44_v4  ;;  %v45_v19 = vld [vmem:[%s10073_s0 + $0xc0] sm:$0xff] }
  0x79   :  { %3534 = vmatpush1.xpose.msra.mxu0 %v126_v27  ;;  %3604 = vmatpush1.xpose.msra.mxu1 %v128_v28  ;;  %v341_v27 = vld [vmem:[%s10074_s1 + $0x878] sm:$0xff]  ;;  %v343_v28 = vld [vmem:[%s10074_s1 + $0x888] sm:$0xff] }
  0x7a   :  { %3671 = vmatprep.subr.mxu0 %v326_v29  ;;  %3741 = vmatprep.subr.mxu1 %v328_v30  ;;  %v147_v29 = vld [vmem:[%s10074_s1 + $0x268] sm:$0xff]  ;;  %v149_v30 = vld [vmem:[%s10074_s1 + $0x278] sm:$0xff] }
  0x7c   :  { %3568 = vmatmul.mubr.f32.vlgmr.msra.gmra.mxu0 %v761_v16  ;;  %3638 = vmatmul.mubr.f32.vlgmr.msra.gmra.mxu1 %v768_v18  ;;  %v837_v16 = vcombine.high %v829_v9, %v829_v9  ;;  %v838_v18 = vcombine.high %v836_v10, %v836_v10 }
  0x7d   :  { %3672 = vmatpush1.xpose.msra.mxu0 %v325_v34  ;;  %3742 = vmatpush1.xpose.msra.mxu1 %v327_v35  ;;  %v146_v34 = vld [vmem:[%s10074_s1 + $0x260] sm:$0xff]  ;;  %v148_v35 = vld [vmem:[%s10074_s1 + $0x270] sm:$0xff] }
  0x7e   :  { %3673 = vmatprep.subr.mxu0 %v131_v36  ;;  %3743 = vmatprep.subr.mxu1 %v133_v37  ;;  %v346_v36 = vld [vmem:[%s10074_s1 + $0x8a0] sm:$0xff]  ;;  %v348_v37 = vld [vmem:[%s10074_s1 + $0x8b0] sm:$0xff] }
  0x7f   :  { %3707 = vmatprep.mubr.f32.mxu0 %v786_v38  ;;  %3777 = vmatprep.mubr.f32.mxu1 %v787_v39  ;;  %v863_v38 = vrot.slane %v41_v26, %v8668_v17  ;;  %v870_v39 = vrot.slane %v856_v33, %v8668_v17  ;;  %v924_v26 = vcombine.high %v45_v19, %v45_v19  ;;  %v46_v33 = vld [vmem:[%s10073_s0 + $0xc8] sm:$0xff] }
  0x81   :  { %3674 = vmatpush1.xpose.msra.mxu0 %v130_v41  ;;  %3744 = vmatpush1.xpose.msra.mxu1 %v132_v42  ;;  %v345_v41 = vld [vmem:[%s10074_s1 + $0x898] sm:$0xff]  ;;  %v347_v42 = vld [vmem:[%s10074_s1 + $0x8a8] sm:$0xff] }
  0x82   :  { %3811 = vmatprep.subr.mxu0 %v330_v43  ;;  %3881 = vmatprep.subr.mxu1 %v332_v44  ;;  %v151_v43 = vld [vmem:[%s10074_s1 + $0x288] sm:$0xff]  ;;  %v153_v44 = vld [vmem:[%s10074_s1 + $0x298] sm:$0xff] }
  0x84   :  { %3708 = vmatmul.mubr.f32.vlgmr.msra.gmra.mxu0 %v778_v31  ;;  %3778 = vmatmul.mubr.f32.vlgmr.msra.gmra.mxu1 %v785_v32  ;;  %v854_v31 = vcombine.high %v846_v24, %v846_v24  ;;  %v855_v32 = vcombine.high %v853_v25, %v853_v25 }
  0x85   :  { %3812 = vmatpush1.xpose.msra.mxu0 %v329_v48  ;;  %3882 = vmatpush1.xpose.msra.mxu1 %v331_v49  ;;  %v150_v48 = vld [vmem:[%s10074_s1 + $0x280] sm:$0xff]  ;;  %v152_v49 = vld [vmem:[%s10074_s1 + $0x290] sm:$0xff] }
  0x86   :  { %3813 = vmatprep.subr.mxu0 %v135_v50  ;;  %3883 = vmatprep.subr.mxu1 %v137_v51  ;;  %v350_v50 = vld [vmem:[%s10074_s1 + $0x8c0] sm:$0xff]  ;;  %v352_v51 = vld [vmem:[%s10074_s1 + $0x8d0] sm:$0xff] }
  0x87   :  { %3847 = vmatprep.mubr.f32.mxu0 %v803_v52  ;;  %3917 = vmatprep.mubr.f32.mxu1 %v804_v53  ;;  %v880_v52 = vrot.slane %v42_v40, %v8668_v17  ;;  %v887_v53 = vrot.slane %v873_v47, %v8668_v17  ;;  %v941_v40 = vcombine.high %v46_v33, %v46_v33  ;;  %v47_v47 = vld [vmem:[%s10073_s0 + $0xd0] sm:$0xff] }
  0x89   :  { %3814 = vmatpush1.xpose.msra.mxu0 %v134_v55  ;;  %3884 = vmatpush1.xpose.msra.mxu1 %v136_v56  ;;  %v349_v55 = vld [vmem:[%s10074_s1 + $0x8b8] sm:$0xff]  ;;  %v351_v56 = vld [vmem:[%s10074_s1 + $0x8c8] sm:$0xff] }
  0x8a   :  { %3951 = vmatprep.subr.mxu0 %v334_v57  ;;  %4021 = vmatprep.subr.mxu1 %v336_v58  ;;  %v155_v57 = vld [vmem:[%s10074_s1 + $0x2a8] sm:$0xff]  ;;  %v157_v58 = vld [vmem:[%s10074_s1 + $0x2b8] sm:$0xff] }
  0x8c   :  { %3848 = vmatmul.mubr.f32.vlgmr.msra.gmra.mxu0 %v795_v45  ;;  %3918 = vmatmul.mubr.f32.vlgmr.msra.gmra.mxu1 %v802_v46  ;;  %v871_v45 = vcombine.high %v863_v38, %v863_v38  ;;  %v872_v46 = vcombine.high %v870_v39, %v870_v39 }
  0x8d   :  { %3952 = vmatpush1.xpose.msra.mxu0 %v333_v62  ;;  %4022 = vmatpush1.xpose.msra.mxu1 %v335_v63  ;;  %v154_v62 = vld [vmem:[%s10074_s1 + $0x2a0] sm:$0xff]  ;;  %v156_v63 = vld [vmem:[%s10074_s1 + $0x2b0] sm:$0xff] }
  0x8e   :  { %3953 = vmatprep.subr.mxu0 %v139_v0  ;;  %4023 = vmatprep.subr.mxu1 %v141_v1  ;;  %v354_v0 = vld [vmem:[%s10074_s1 + $0x8e0] sm:$0xff]  ;;  %v356_v1 = vld [vmem:[%s10074_s1 + $0x8f0] sm:$0xff] }
  0x8f   :  { %3987 = vmatprep.mubr.f32.mxu0 %v820_v2  ;;  %4057 = vmatprep.mubr.f32.mxu1 %v821_v3  ;;  %v897_v2 = vrot.slane %v43_v54, %v8668_v17  ;;  %v904_v3 = vrot.slane %v890_v61, %v8668_v17  ;;  %v170_v61 = vld [vmem:[%s10074_s1 + $0x320] sm:$0xff] }
  0x91   :  { %3954 = vmatpush1.xpose.msra.mxu0 %v138_v5  ;;  %4024 = vmatpush1.xpose.msra.mxu1 %v140_v6  ;;  %v353_v5 = vld [vmem:[%s10074_s1 + $0x8d8] sm:$0xff]  ;;  %v355_v6 = vld [vmem:[%s10074_s1 + $0x8e8] sm:$0xff] }
  0x92   :  { %4091 = vmatprep.subr.mxu0 %v338_v7  ;;  %4161 = vmatprep.subr.mxu1 %v340_v8  ;;  %v159_v7 = vld [vmem:[%s10074_s1 + $0x2c8] sm:$0xff]  ;;  %v161_v8 = vld [vmem:[%s10074_s1 + $0x2d8] sm:$0xff] }
  0x94   :  { %3988 = vmatmul.mubr.f32.vlgmr.msra.gmra.mxu0 %v812_v59  ;;  %4058 = vmatmul.mubr.f32.vlgmr.msra.gmra.mxu1 %v819_v60  ;;  %v888_v59 = vcombine.high %v880_v52, %v880_v52  ;;  %v889_v60 = vcombine.high %v887_v53, %v887_v53 }
  0x95   :  { %4092 = vmatpush1.xpose.msra.mxu0 %v337_v12  ;;  %4162 = vmatpush1.xpose.msra.mxu1 %v339_v13  ;;  %v158_v12 = vld [vmem:[%s10074_s1 + $0x2c0] sm:$0xff]  ;;  %v160_v13 = vld [vmem:[%s10074_s1 + $0x2d0] sm:$0xff] }
  0x96   :  { %4093 = vmatprep.subr.mxu0 %v143_v14  ;;  %4163 = vmatprep.subr.mxu1 %v145_v15  ;;  %v358_v14 = vld [vmem:[%s10074_s1 + $0x900] sm:$0xff]  ;;  %v360_v15 = vld [vmem:[%s10074_s1 + $0x910] sm:$0xff] }
  0x97   :  { %4127 = vmatprep.mubr.f32.mxu0 %v837_v16  ;;  %4197 = vmatprep.mubr.f32.mxu1 %v838_v18  ;;  %v914_v16 = vrot.slane %v44_v4, %v8668_v17  ;;  %v921_v18 = vrot.slane %v907_v11, %v8668_v17  ;;  %v48_v4 = vld [vmem:[%s10073_s0 + $0xd8] sm:$0xff] }
  0x98   :  { %v975_v11 = vcombine.high %v48_v4, %v48_v4 }
  0x99   :  { %4094 = vmatpush1.xpose.msra.mxu0 %v142_v20  ;;  %4164 = vmatpush1.xpose.msra.mxu1 %v144_v21  ;;  %v357_v20 = vld [vmem:[%s10074_s1 + $0x8f8] sm:$0xff]  ;;  %v359_v21 = vld [vmem:[%s10074_s1 + $0x908] sm:$0xff] }
  0x9a   :  { %4231 = vmatprep.subr.mxu0 %v342_v22  ;;  %4301 = vmatprep.subr.mxu1 %v344_v23  ;;  %v163_v22 = vld [vmem:[%s10074_s1 + $0x2e8] sm:$0xff]  ;;  %v165_v23 = vld [vmem:[%s10074_s1 + $0x2f8] sm:$0xff] }
  0x9c   :  { %4128 = vmatmul.mubr.f32.vlgmr.msra.gmra.mxu0 %v829_v9  ;;  %4198 = vmatmul.mubr.f32.vlgmr.msra.gmra.mxu1 %v836_v10  ;;  %v905_v9 = vcombine.high %v897_v2, %v897_v2  ;;  %v906_v10 = vcombine.high %v904_v3, %v904_v3 }
  0x9d   :  { %4232 = vmatpush1.xpose.msra.mxu0 %v341_v27  ;;  %4302 = vmatpush1.xpose.msra.mxu1 %v343_v28  ;;  %v162_v27 = vld [vmem:[%s10074_s1 + $0x2e0] sm:$0xff]  ;;  %v164_v28 = vld [vmem:[%s10074_s1 + $0x2f0] sm:$0xff] }
  0x9e   :  { %4233 = vmatprep.subr.mxu0 %v147_v29  ;;  %4303 = vmatprep.subr.mxu1 %v149_v30  ;;  %v362_v29 = vld [vmem:[%s10074_s1 + $0x920] sm:$0xff]  ;;  %v364_v30 = vld [vmem:[%s10074_s1 + $0x930] sm:$0xff] }
  0x9f   :  { %4267 = vmatprep.mubr.f32.mxu0 %v854_v31  ;;  %4337 = vmatprep.mubr.f32.mxu1 %v855_v32  ;;  %v931_v31 = vrot.slane %v45_v19, %v8668_v17  ;;  %v938_v32 = vrot.slane %v924_v26, %v8668_v17  ;;  %v176_v19 = vld [vmem:[%s10074_s1 + $0x350] sm:$0xff]  ;;  %v373_v26 = vld [vmem:[%s10074_s1 + $0x978] sm:$0xff] }
  0xa1   :  { %4234 = vmatpush1.xpose.msra.mxu0 %v146_v34  ;;  %4304 = vmatpush1.xpose.msra.mxu1 %v148_v35  ;;  %v361_v34 = vld [vmem:[%s10074_s1 + $0x918] sm:$0xff]  ;;  %v363_v35 = vld [vmem:[%s10074_s1 + $0x928] sm:$0xff] }
  0xa2   :  { %4371 = vmatprep.subr.mxu0 %v346_v36  ;;  %4441 = vmatprep.subr.mxu1 %v348_v37  ;;  %v167_v36 = vld [vmem:[%s10074_s1 + $0x308] sm:$0xff]  ;;  %v169_v37 = vld [vmem:[%s10074_s1 + $0x318] sm:$0xff] }
  0xa4   :  { %4268 = vmatmul.mubr.f32.vlgmr.msra.gmra.mxu0 %v846_v24  ;;  %4338 = vmatmul.mubr.f32.vlgmr.msra.gmra.mxu1 %v853_v25  ;;  %v922_v24 = vcombine.high %v914_v16, %v914_v16  ;;  %v923_v25 = vcombine.high %v921_v18, %v921_v18 }
  0xa5   :  { %4372 = vmatpush1.xpose.msra.mxu0 %v345_v41  ;;  %4442 = vmatpush1.xpose.msra.mxu1 %v347_v42  ;;  %v166_v41 = vld [vmem:[%s10074_s1 + $0x300] sm:$0xff]  ;;  %v168_v42 = vld [vmem:[%s10074_s1 + $0x310] sm:$0xff] }
  0xa6   :  { %4373 = vmatprep.subr.mxu0 %v151_v43  ;;  %4443 = vmatprep.subr.mxu1 %v153_v44  ;;  %v366_v43 = vld [vmem:[%s10074_s1 + $0x940] sm:$0xff]  ;;  %v368_v44 = vld [vmem:[%s10074_s1 + $0x950] sm:$0xff] }
  0xa7   :  { %4407 = vmatprep.mubr.f32.mxu0 %v871_v45  ;;  %4477 = vmatprep.mubr.f32.mxu1 %v872_v46  ;;  %v948_v45 = vrot.slane %v46_v33, %v8668_v17  ;;  %v955_v46 = vrot.slane %v941_v40, %v8668_v17 }
  0xa9   :  { %4374 = vmatpush1.xpose.msra.mxu0 %v150_v48  ;;  %4444 = vmatpush1.xpose.msra.mxu1 %v152_v49  ;;  %v8503_v48 = vld [vmem:[%s10075_s2] ss:$0 sm:$0xff]  ;;  %v365_v49 = vld [vmem:[%s10074_s1 + $0x938] sm:$0xff]  ;;  %v957_v54 = vcombine.high %v955_v46, %v955_v46  ;;  %s8495_s2 = sshll.u32 %s8604_s10, 4  ;;  %s8496_s2 = int_to_ptr.vmem [resolvable:$true] %s8495_s2 }
  0xaa   :  { %4511 = vmatprep.subr.mxu0 %v350_v50  ;;  %4581 = vmatprep.subr.mxu1 %v352_v51  ;;  %v367_v50 = vld [vmem:[%s10074_s1 + $0x948] sm:$0xff]  ;;  %s8579_s11 = scalar_lea.vmem %s8496_s2, 32  ;;  %p8584_p1 = scmp.lt.s32.totalorder %s8496_s2, %s8496_s2 }
  0xab   :  { %v171_v51 = vld [vmem:[%s10074_s1 + $0x328] sm:$0xff]  ;;  %p8580_p0 = scmp.ne.s32.totalorder %s8496_s2, %s8579_s11  ;;  %p8585_p2 = scmp.lt.s32.totalorder %s8579_s11, %s8579_s11 }
  0xac   :  { %4408 = vmatmul.mubr.f32.vlgmr.msra.gmra.mxu0 %v863_v38  ;;  %4478 = vmatmul.mubr.f32.vlgmr.msra.gmra.mxu1 %v870_v39  ;;  %v939_v38 = vcombine.high %v931_v31, %v931_v31  ;;  %v940_v39 = vcombine.high %v938_v32, %v938_v32 }
  0xad   :  { %4512 = vmatpush1.xpose.msra.mxu0 %v349_v55  ;;  %4582 = vmatpush1.xpose.msra.mxu1 %v351_v56  ;;  %v958_v55 = vcombine.high %v47_v47, %v47_v47  ;;  %p8586_p3 = por %p8585_p2, %p8584_p1 }
  0xae   :  { %4513 = vmatprep.subr.mxu0 %v155_v57  ;;  %4583 = vmatprep.subr.mxu1 %v157_v58 }
  0xaf   :  { %4547 = vmatprep.mubr.f32.mxu0 %v888_v59  ;;  %4617 = vmatprep.mubr.f32.mxu1 %v889_v60  ;;  %p8587_p4 = pnand %p8586_p3, %p8580_p0 }
  0xb1   :  { %4514 = vmatpush1.xpose.msra.mxu0 %v154_v62  ;;  %4584 = vmatpush1.xpose.msra.mxu1 %v156_v63  ;;  %v172_v62 = vld [vmem:[%s10074_s1 + $0x330] sm:$0xff] }
  0xb2   :  { %4651 = vmatprep.subr.mxu0 %v354_v0  ;;  %4721 = vmatprep.subr.mxu1 %v356_v1  ;;  %v370_v0 = vld [vmem:[%s10074_s1 + $0x960] sm:$0xff]  ;;  %v372_v1 = vld [vmem:[%s10074_s1 + $0x970] sm:$0xff] }
  0xb4   :  { %4548 = vmatmul.mubr.f32.vlgmr.msra.gmra.mxu0 %v880_v52  ;;  %4618 = vmatmul.mubr.f32.vlgmr.msra.gmra.mxu1 %v887_v53  ;;  %v173_v52 = vld [vmem:[%s10074_s1 + $0x338] sm:$0xff]  ;;  %v956_v53 = vcombine.high %v948_v45, %v948_v45 }
  0xb5   :  { %4652 = vmatpush1.xpose.msra.mxu0 %v353_v5  ;;  %4722 = vmatpush1.xpose.msra.mxu1 %v355_v6  ;;  %v369_v5 = vld [vmem:[%s10074_s1 + $0x958] sm:$0xff]  ;;  %v371_v6 = vld [vmem:[%s10074_s1 + $0x968] sm:$0xff] }
  0xb6   :  { %4653 = vmatprep.subr.mxu0 %v159_v7  ;;  %4723 = vmatprep.subr.mxu1 %v161_v8  ;;  %v175_v7 = vld [vmem:[%s10074_s1 + $0x348] sm:$0xff]  ;;  %v177_v8 = vld [vmem:[%s10074_s1 + $0x358] sm:$0xff] }
  0xb7   :  { %4687 = vmatprep.mubr.f32.mxu0 %v905_v9  ;;  %4757 = vmatprep.mubr.f32.mxu1 %v906_v10 }
  0xb9   :  { %4654 = vmatpush1.xpose.msra.mxu0 %v158_v12  ;;  %4724 = vmatpush1.xpose.msra.mxu1 %v160_v13 }
  0xba   :  { %4791 = vmatprep.subr.mxu0 %v358_v14  ;;  %4861 = vmatprep.subr.mxu1 %v360_v15 }
  0xbc   :  { %4688 = vmatmul.mubr.f32.vlgmr.msra.gmra.mxu0 %v897_v2  ;;  %4758 = vmatmul.mubr.f32.vlgmr.msra.gmra.mxu1 %v904_v3  ;;  %v965_v2 = vrot.slane %v47_v47, %v8668_v17  ;;  %v972_v3 = vrot.slane %v958_v55, %v8668_v17  ;;  %v379_v47 = vld [vmem:[%s10074_s1 + $0x9a8] sm:$0xff] }
  0xbd   :  { %4792 = vmatpush1.xpose.msra.mxu0 %v357_v20  ;;  %4862 = vmatpush1.xpose.msra.mxu1 %v359_v21  ;;  %v374_v21 = vld [vmem:[%s10074_s1 + $0x980] sm:$0xff] }
  0xbe   :  { %4793 = vmatprep.subr.mxu0 %v163_v22  ;;  %4863 = vmatprep.subr.mxu1 %v165_v23  ;;  %v973_v9 = vcombine.high %v965_v2, %v965_v2  ;;  %v974_v10 = vcombine.high %v972_v3, %v972_v3  ;;  %v376_v22 = vld [vmem:[%s10074_s1 + $0x990] sm:$0xff]  ;;  %v982_v23 = vrot.slane %v48_v4, %v8668_v17  ;;  %v187_v4 = vld [vmem:[%s10074_s1 + $0x3a8] sm:$0xff] }
  0xbf   :  { %4827 = vmatprep.mubr.f32.mxu0 %v922_v24  ;;  %4897 = vmatprep.mubr.f32.mxu1 %v923_v25  ;;  %v989_v24 = vrot.slane %v975_v11, %v8668_v17  ;;  %v49_v25 = vld [vmem:[%s10073_s0 + $0xe0] sm:$0xff] }
  0xc1   :  { %4794 = vmatpush1.xpose.msra.mxu0 %v162_v27  ;;  %4864 = vmatpush1.xpose.msra.mxu1 %v164_v28  ;;  %v375_v27 = vld [vmem:[%s10074_s1 + $0x988] sm:$0xff] }
  0xc2   :  { %4931 = vmatprep.subr.mxu0 %v362_v29  ;;  %5001 = vmatprep.subr.mxu1 %v364_v30  ;;  %v179_v28 = vld [vmem:[%s10074_s1 + $0x368] sm:$0xff]  ;;  %v181_v29 = vld [vmem:[%s10074_s1 + $0x378] sm:$0xff]  ;;  %v990_v30 = vcombine.high %v982_v23, %v982_v23 }
  0xc4   :  { %4828 = vmatmul.mubr.f32.vlgmr.msra.gmra.mxu0 %v914_v16  ;;  %4898 = vmatmul.mubr.f32.vlgmr.msra.gmra.mxu1 %v921_v18  ;;  %v174_v18 = vld [vmem:[%s10074_s1 + $0x340] sm:$0xff] }
  0xc5   :  { %4932 = vmatpush1.xpose.msra.mxu0 %v361_v34  ;;  %5002 = vmatpush1.xpose.msra.mxu1 %v363_v35 }
  0xc6   :  { %4933 = vmatprep.subr.mxu0 %v167_v36  ;;  %5003 = vmatprep.subr.mxu1 %v169_v37 }
  0xc7   :  { %4967 = vmatprep.mubr.f32.mxu0 %v939_v38  ;;  %5037 = vmatprep.mubr.f32.mxu1 %v940_v39  ;;  %v178_v38 = vld [vmem:[%s10074_s1 + $0x360] sm:$0xff]  ;;  %v180_v39 = vld [vmem:[%s10074_s1 + $0x370] sm:$0xff] }
  0xc9   :  { %4934 = vmatpush1.xpose.msra.mxu0 %v166_v41  ;;  %5004 = vmatpush1.xpose.msra.mxu1 %v168_v42  ;;  %v378_v41 = vld [vmem:[%s10074_s1 + $0x9a0] sm:$0xff]  ;;  %v380_v42 = vld [vmem:[%s10074_s1 + $0x9b0] sm:$0xff] }
  0xca   :  { %5071 = vmatprep.subr.mxu0 %v366_v43  ;;  %5141 = vmatprep.subr.mxu1 %v368_v44  ;;  %v999_v43 = vrot.slane %v49_v25, %v8668_v17 }
  0xcc   :  { %4968 = vmatmul.mubr.f32.vlgmr.msra.gmra.mxu0 %v931_v31  ;;  %v1609_v56 = vpop.f32.mrf.mxu0  ;;  %v1679_v57 = vpop.f32.mrf.mxu1  ;;  %5038 = vmatmul.mubr.f32.vlgmr.msra.gmra.mxu1 %v938_v32  ;;  %v991_v31 = vcombine.high %v989_v24, %v989_v24  ;;  %v992_v32 = vcombine.high %v49_v25, %v49_v25  ;;  %v191_v25 = vld [vmem:[%s10074_s1 + $0x3c8] sm:$0xff] }
  0xcd   :  { %v1610_v58 = vadd.f32 %v8503_v48, %v1609_v56  ;;  %5072 = vmatpush1.xpose.msra.mxu0 %v365_v49  ;;  %5142 = vmatpush1.xpose.msra.mxu1 %v367_v50  ;;  %v183_v48 = vld [vmem:[%s10074_s1 + $0x388] sm:$0xff]  ;;  %v185_v49 = vld [vmem:[%s10074_s1 + $0x398] sm:$0xff]  ;;  %v1007_v50 = vcombine.high %v999_v43, %v999_v43 }
  0xce   :  { %v1611_v59 = vpop.f32.mrf.mxu0  ;;  %v1681_v60 = vpop.f32.mrf.mxu1  ;;  %5073 = vmatprep.subr.mxu0 %v171_v51  ;;  %5143 = vmatprep.subr.mxu1 %v173_v52  ;;  %v1006_v44 = vrot.slane %v992_v32, %v8668_v17 }
  0xcf   :  { %v1680_v63 = vadd.f32 %v1679_v57, %v1610_v58  ;;  %5107 = vmatprep.mubr.f32.mxu0 %v956_v53  ;;  %5177 = vmatprep.mubr.f32.mxu1 %v957_v54  ;;  %v182_v58 = vld [vmem:[%s10074_s1 + $0x380] sm:$0xff]  ;;  %v184_v59 = vld [vmem:[%s10074_s1 + $0x390] sm:$0xff] }
  0xd0   :  { %v1008_v51 = vcombine.high %v1006_v44, %v1006_v44 }
  0xd1   :  { %5074 = vmatpush1.xpose.msra.mxu0 %v170_v61  ;;  %5144 = vmatpush1.xpose.msra.mxu1 %v172_v62  ;;  %v382_v61 = vld [vmem:[%s10074_s1 + $0x9c0] sm:$0xff]  ;;  %v384_v62 = vld [vmem:[%s10074_s1 + $0x9d0] sm:$0xff] }
  0xd2   :  { %5211 = vmatprep.subr.mxu0 %v370_v0  ;;  %5281 = vmatprep.subr.mxu1 %v372_v1  ;;  %v51_v1 = vld [vmem:[%s10073_s0 + $0xf0] sm:$0xff] }
  0xd4   :  { %v1749_v12 = vpop.f32.mrf.mxu0  ;;  %5108 = vmatmul.mubr.f32.vlgmr.msra.gmra.mxu0 %v948_v45  ;;  %v1819_v13 = vpop.f32.mrf.mxu1  ;;  %5178 = vmatmul.mubr.f32.vlgmr.msra.gmra.mxu1 %v955_v46  ;;  %v50_v45 = vld [vmem:[%s10073_s0 + $0xe8] sm:$0xff]  ;;  %v377_v46 = vld [vmem:[%s10074_s1 + $0x998] sm:$0xff] }
  0xd5   :  { %v1750_v14 = vadd.f32 %v1749_v12, %v1680_v63  ;;  %5212 = vmatpush1.xpose.msra.mxu0 %v369_v5  ;;  %5282 = vmatpush1.xpose.msra.mxu1 %v371_v6  ;;  %v1009_v52 = vcombine.high %v50_v45, %v50_v45  ;;  %v1016_v63 = vrot.slane %v50_v45, %v8668_v17  ;;  %v189_v5 = vld [vmem:[%s10074_s1 + $0x3b8] sm:$0xff]  ;;  %v195_v45 = vld [vmem:[%s10074_s1 + $0x3e8] sm:$0xff] }
  0xd6   :  { %v1751_v15 = vpop.f32.mrf.mxu0  ;;  %v1821_v16 = vpop.f32.mrf.mxu1  ;;  %5213 = vmatprep.subr.mxu0 %v175_v7  ;;  %5283 = vmatprep.subr.mxu1 %v177_v8  ;;  %v1026_v8 = vcombine.high %v51_v1, %v51_v1 }
  0xd7   :  { %v1820_v20 = vadd.f32 %v1819_v13, %v1750_v14  ;;  %5247 = vmatprep.mubr.f32.mxu0 %v973_v9  ;;  %5317 = vmatprep.mubr.f32.mxu1 %v974_v10  ;;  %v1023_v0 = vrot.slane %v1009_v52, %v8668_v17  ;;  %v1024_v6 = vcombine.high %v1016_v63, %v1016_v63  ;;  %v186_v14 = vld [vmem:[%s10074_s1 + $0x3a0] sm:$0xff]  ;;  %v188_v15 = vld [vmem:[%s10074_s1 + $0x3b0] sm:$0xff] }
  0xd9   :  { %5214 = vmatpush1.xpose.msra.mxu0 %v174_v18  ;;  %5284 = vmatpush1.xpose.msra.mxu1 %v176_v19  ;;  %v1025_v7 = vcombine.high %v1023_v0, %v1023_v0  ;;  %v386_v18 = vld [vmem:[%s10074_s1 + $0x9e0] sm:$0xff]  ;;  %v388_v19 = vld [vmem:[%s10074_s1 + $0x9f0] sm:$0xff] }
  0xda   :  { %5351 = vmatprep.subr.mxu0 %v374_v21  ;;  %5421 = vmatprep.subr.mxu1 %v376_v22  ;;  %v1040_v21 = vrot.slane %v1026_v8, %v8668_v17  ;;  %v52_v22 = vld [vmem:[%s10073_s0 + $0xf8] sm:$0xff] }
  0xdc   :  { %v1889_v33 = vpop.f32.mrf.mxu0  ;;  %5248 = vmatmul.mubr.f32.vlgmr.msra.gmra.mxu0 %v965_v2  ;;  %v1959_v34 = vpop.f32.mrf.mxu1  ;;  %5318 = vmatmul.mubr.f32.vlgmr.msra.gmra.mxu1 %v972_v3  ;;  %v381_v2 = vld [vmem:[%s10074_s1 + $0x9b8] sm:$0xff]  ;;  %v383_v3 = vld [vmem:[%s10074_s1 + $0x9c8] sm:$0xff] }
  0xdd   :  { %v1890_v35 = vadd.f32 %v1889_v33, %v1820_v20  ;;  %5352 = vmatpush1.xpose.msra.mxu0 %v373_v26  ;;  %5422 = vmatpush1.xpose.msra.mxu1 %v375_v27  ;;  %v1033_v20 = vrot.slane %v51_v1, %v8668_v17  ;;  %v193_v26 = vld [vmem:[%s10074_s1 + $0x3d8] sm:$0xff]  ;;  %v199_v1 = vld [vmem:[%s10074_s1 + $0x408] sm:$0xff] }
  0xde   :  { %v1891_v36 = vpop.f32.mrf.mxu0  ;;  %v1961_v37 = vpop.f32.mrf.mxu1  ;;  %5353 = vmatprep.subr.mxu0 %v179_v28  ;;  %5423 = vmatprep.subr.mxu1 %v181_v29  ;;  %v1042_v28 = vcombine.high %v1040_v21, %v1040_v21  ;;  %v1043_v29 = vcombine.high %v52_v22, %v52_v22 }
  0xdf   :  { %v1960_v40 = vadd.f32 %v1959_v34, %v1890_v35  ;;  %5387 = vmatprep.mubr.f32.mxu0 %v990_v30  ;;  %5457 = vmatprep.mubr.f32.mxu1 %v991_v31  ;;  %v1041_v27 = vcombine.high %v1033_v20, %v1033_v20  ;;  %v190_v35 = vld [vmem:[%s10074_s1 + $0x3c0] sm:$0xff]  ;;  %v192_v36 = vld [vmem:[%s10074_s1 + $0x3d0] sm:$0xff] }
  0xe1   :  { %5354 = vmatpush1.xpose.msra.mxu0 %v178_v38  ;;  %5424 = vmatpush1.xpose.msra.mxu1 %v180_v39  ;;  %v390_v38 = vld [vmem:[%s10074_s1 + $0xa00] sm:$0xff]  ;;  %v392_v39 = vld [vmem:[%s10074_s1 + $0xa10] sm:$0xff] }
  0xe2   :  { %5491 = vmatprep.subr.mxu0 %v378_v41  ;;  %5561 = vmatprep.subr.mxu1 %v380_v42  ;;  %v1057_v41 = vrot.slane %v1043_v29, %v8668_v17  ;;  %v53_v42 = vld [vmem:[%s10073_s0 + $0x100] sm:$0xff] }
  0xe4   :  { %v2029_v53 = vpop.f32.mrf.mxu0  ;;  %5388 = vmatmul.mubr.f32.vlgmr.msra.gmra.mxu0 %v982_v23  ;;  %v2099_v54 = vpop.f32.mrf.mxu1  ;;  %5458 = vmatmul.mubr.f32.vlgmr.msra.gmra.mxu1 %v989_v24  ;;  %v385_v23 = vld [vmem:[%s10074_s1 + $0x9d8] sm:$0xff]  ;;  %v387_v24 = vld [vmem:[%s10074_s1 + $0x9e8] sm:$0xff] }
  0xe5   :  { %v2030_v55 = vadd.f32 %v2029_v53, %v1960_v40  ;;  %5492 = vmatpush1.xpose.msra.mxu0 %v377_v46  ;;  %5562 = vmatpush1.xpose.msra.mxu1 %v379_v47  ;;  %v1050_v40 = vrot.slane %v52_v22, %v8668_v17  ;;  %v197_v46 = vld [vmem:[%s10074_s1 + $0x3f8] sm:$0xff]  ;;  %v203_v22 = vld [vmem:[%s10074_s1 + $0x428] sm:$0xff] }
  0xe6   :  { %v2031_v56 = vpop.f32.mrf.mxu0  ;;  %v2101_v57 = vpop.f32.mrf.mxu1  ;;  %5493 = vmatprep.subr.mxu0 %v183_v48  ;;  %5563 = vmatprep.subr.mxu1 %v185_v49  ;;  %v1059_v48 = vcombine.high %v1057_v41, %v1057_v41  ;;  %v1060_v49 = vcombine.high %v53_v42, %v53_v42 }
  0xe7   :  { %v2100_v60 = vadd.f32 %v2099_v54, %v2030_v55  ;;  %5527 = vmatprep.mubr.f32.mxu0 %v1007_v50  ;;  %5597 = vmatprep.mubr.f32.mxu1 %v1008_v51  ;;  %v1058_v47 = vcombine.high %v1050_v40, %v1050_v40  ;;  %v194_v55 = vld [vmem:[%s10074_s1 + $0x3e0] sm:$0xff]  ;;  %v196_v56 = vld [vmem:[%s10074_s1 + $0x3f0] sm:$0xff] }
  0xe9   :  { %5494 = vmatpush1.xpose.msra.mxu0 %v182_v58  ;;  %5564 = vmatpush1.xpose.msra.mxu1 %v184_v59  ;;  %v394_v58 = vld [vmem:[%s10074_s1 + $0xa20] sm:$0xff]  ;;  %v396_v59 = vld [vmem:[%s10074_s1 + $0xa30] sm:$0xff] }
  0xea   :  { %5631 = vmatprep.subr.mxu0 %v382_v61  ;;  %5701 = vmatprep.subr.mxu1 %v384_v62  ;;  %v1074_v61 = vrot.slane %v1060_v49, %v8668_v17  ;;  %v54_v62 = vld [vmem:[%s10073_s0 + $0x108] sm:$0xff] }
  0xec   :  { %v2169_v9 = vpop.f32.mrf.mxu0  ;;  %5528 = vmatmul.mubr.f32.vlgmr.msra.gmra.mxu0 %v999_v43  ;;  %v2239_v10 = vpop.f32.mrf.mxu1  ;;  %5598 = vmatmul.mubr.f32.vlgmr.msra.gmra.mxu1 %v1006_v44  ;;  %v389_v43 = vld [vmem:[%s10074_s1 + $0x9f8] sm:$0xff]  ;;  %v391_v44 = vld [vmem:[%s10074_s1 + $0xa08] sm:$0xff] }
  0xed   :  { %v2170_v11 = vadd.f32 %v2169_v9, %v2100_v60  ;;  %5632 = vmatpush1.xpose.msra.mxu0 %v381_v2  ;;  %5702 = vmatpush1.xpose.msra.mxu1 %v383_v3  ;;  %v1067_v60 = vrot.slane %v53_v42, %v8668_v17  ;;  %v201_v2 = vld [vmem:[%s10074_s1 + $0x418] sm:$0xff]  ;;  %v207_v42 = vld [vmem:[%s10074_s1 + $0x448] sm:$0xff] }
  0xee   :  { %v2171_v12 = vpop.f32.mrf.mxu0  ;;  %v2241_v13 = vpop.f32.mrf.mxu1  ;;  %5633 = vmatprep.subr.mxu0 %v187_v4  ;;  %5703 = vmatprep.subr.mxu1 %v189_v5  ;;  %v1076_v4 = vcombine.high %v1074_v61, %v1074_v61  ;;  %v1077_v5 = vcombine.high %v54_v62, %v54_v62 }
  0xef   :  { %v2240_v16 = vadd.f32 %v2239_v10, %v2170_v11  ;;  %5667 = vmatprep.mubr.f32.mxu0 %v1024_v6  ;;  %5737 = vmatprep.mubr.f32.mxu1 %v1025_v7  ;;  %v1075_v3 = vcombine.high %v1067_v60, %v1067_v60  ;;  %v198_v11 = vld [vmem:[%s10074_s1 + $0x400] sm:$0xff]  ;;  %v200_v12 = vld [vmem:[%s10074_s1 + $0x410] sm:$0xff] }
  0xf1   :  { %5634 = vmatpush1.xpose.msra.mxu0 %v186_v14  ;;  %5704 = vmatpush1.xpose.msra.mxu1 %v188_v15  ;;  %v398_v14 = vld [vmem:[%s10074_s1 + $0xa40] sm:$0xff]  ;;  %v400_v15 = vld [vmem:[%s10074_s1 + $0xa50] sm:$0xff] }
  0xf2   :  { %5771 = vmatprep.subr.mxu0 %v386_v18  ;;  %5841 = vmatprep.subr.mxu1 %v388_v19  ;;  %v1091_v18 = vrot.slane %v1077_v5, %v8668_v17  ;;  %v55_v19 = vld [vmem:[%s10073_s0 + $0x110] sm:$0xff] }
  0xf4   :  { %v2309_v30 = vpop.f32.mrf.mxu0  ;;  %5668 = vmatmul.mubr.f32.vlgmr.msra.gmra.mxu0 %v1016_v63  ;;  %v2379_v31 = vpop.f32.mrf.mxu1  ;;  %5738 = vmatmul.mubr.f32.vlgmr.msra.gmra.mxu1 %v1023_v0  ;;  %v393_v63 = vld [vmem:[%s10074_s1 + $0xa18] sm:$0xff]  ;;  %v395_v0 = vld [vmem:[%s10074_s1 + $0xa28] sm:$0xff] }
  0xf5   :  { %v2310_v32 = vadd.f32 %v2309_v30, %v2240_v16  ;;  %5772 = vmatpush1.xpose.msra.mxu0 %v385_v23  ;;  %5842 = vmatpush1.xpose.msra.mxu1 %v387_v24  ;;  %v1084_v16 = vrot.slane %v54_v62, %v8668_v17  ;;  %v205_v23 = vld [vmem:[%s10074_s1 + $0x438] sm:$0xff]  ;;  %v211_v62 = vld [vmem:[%s10074_s1 + $0x468] sm:$0xff] }
  0xf6   :  { %v2311_v33 = vpop.f32.mrf.mxu0  ;;  %v2381_v34 = vpop.f32.mrf.mxu1  ;;  %5773 = vmatprep.subr.mxu0 %v191_v25  ;;  %5843 = vmatprep.subr.mxu1 %v193_v26  ;;  %v1093_v25 = vcombine.high %v1091_v18, %v1091_v18  ;;  %v1094_v26 = vcombine.high %v55_v19, %v55_v19 }
  0xf7   :  { %v2380_v37 = vadd.f32 %v2379_v31, %v2310_v32  ;;  %5807 = vmatprep.mubr.f32.mxu0 %v1041_v27  ;;  %5877 = vmatprep.mubr.f32.mxu1 %v1042_v28  ;;  %v1092_v24 = vcombine.high %v1084_v16, %v1084_v16  ;;  %v202_v32 = vld [vmem:[%s10074_s1 + $0x420] sm:$0xff]  ;;  %v204_v33 = vld [vmem:[%s10074_s1 + $0x430] sm:$0xff] }
  0xf9   :  { %5774 = vmatpush1.xpose.msra.mxu0 %v190_v35  ;;  %5844 = vmatpush1.xpose.msra.mxu1 %v192_v36  ;;  %v402_v35 = vld [vmem:[%s10074_s1 + $0xa60] sm:$0xff]  ;;  %v404_v36 = vld [vmem:[%s10074_s1 + $0xa70] sm:$0xff] }
  0xfa   :  { %5911 = vmatprep.subr.mxu0 %v390_v38  ;;  %5981 = vmatprep.subr.mxu1 %v392_v39  ;;  %v1108_v38 = vrot.slane %v1094_v26, %v8668_v17  ;;  %v56_v39 = vld [vmem:[%s10073_s0 + $0x118] sm:$0xff] }
  0xfc   :  { %v2449_v50 = vpop.f32.mrf.mxu0  ;;  %5808 = vmatmul.mubr.f32.vlgmr.msra.gmra.mxu0 %v1033_v20  ;;  %v2519_v51 = vpop.f32.mrf.mxu1  ;;  %5878 = vmatmul.mubr.f32.vlgmr.msra.gmra.mxu1 %v1040_v21  ;;  %v397_v20 = vld [vmem:[%s10074_s1 + $0xa38] sm:$0xff]  ;;  %v399_v21 = vld [vmem:[%s10074_s1 + $0xa48] sm:$0xff] }
  0xfd   :  { %v2450_v52 = vadd.f32 %v2449_v50, %v2380_v37  ;;  %5912 = vmatpush1.xpose.msra.mxu0 %v389_v43  ;;  %5982 = vmatpush1.xpose.msra.mxu1 %v391_v44  ;;  %v1101_v37 = vrot.slane %v55_v19, %v8668_v17  ;;  %v209_v43 = vld [vmem:[%s10074_s1 + $0x458] sm:$0xff]  ;;  %v215_v19 = vld [vmem:[%s10074_s1 + $0x488] sm:$0xff] }
  0xfe   :  { %v2451_v53 = vpop.f32.mrf.mxu0  ;;  %v2521_v54 = vpop.f32.mrf.mxu1  ;;  %5913 = vmatprep.subr.mxu0 %v195_v45  ;;  %5983 = vmatprep.subr.mxu1 %v197_v46  ;;  %v1110_v45 = vcombine.high %v1108_v38, %v1108_v38  ;;  %v1111_v46 = vcombine.high %v56_v39, %v56_v39 }
  0xff   :  { %v2520_v57 = vadd.f32 %v2519_v51, %v2450_v52  ;;  %5947 = vmatprep.mubr.f32.mxu0 %v1058_v47  ;;  %6017 = vmatprep.mubr.f32.mxu1 %v1059_v48  ;;  %v1109_v44 = vcombine.high %v1101_v37, %v1101_v37  ;;  %v206_v52 = vld [vmem:[%s10074_s1 + $0x440] sm:$0xff]  ;;  %v208_v53 = vld [vmem:[%s10074_s1 + $0x450] sm:$0xff] }
 0x101   :  { %5914 = vmatpush1.xpose.msra.mxu0 %v194_v55  ;;  %5984 = vmatpush1.xpose.msra.mxu1 %v196_v56  ;;  %v406_v55 = vld [vmem:[%s10074_s1 + $0xa80] sm:$0xff]  ;;  %v408_v56 = vld [vmem:[%s10074_s1 + $0xa90] sm:$0xff] }
 0x102   :  { %6051 = vmatprep.subr.mxu0 %v394_v58  ;;  %6121 = vmatprep.subr.mxu1 %v396_v59  ;;  %v1125_v58 = vrot.slane %v1111_v46, %v8668_v17  ;;  %v57_v59 = vld [vmem:[%s10073_s0 + $0x120] sm:$0xff] }
 0x104   :  { %v2589_v6 = vpop.f32.mrf.mxu0  ;;  %5948 = vmatmul.mubr.f32.vlgmr.msra.gmra.mxu0 %v1050_v40  ;;  %v2659_v7 = vpop.f32.mrf.mxu1  ;;  %6018 = vmatmul.mubr.f32.vlgmr.msra.gmra.mxu1 %v1057_v41  ;;  %v401_v40 = vld [vmem:[%s10074_s1 + $0xa58] sm:$0xff]  ;;  %v403_v41 = vld [vmem:[%s10074_s1 + $0xa68] sm:$0xff] }
 0x105   :  { %v2590_v8 = vadd.f32 %v2589_v6, %v2520_v57  ;;  %6052 = vmatpush1.xpose.msra.mxu0 %v393_v63  ;;  %6122 = vmatpush1.xpose.msra.mxu1 %v395_v0  ;;  %v1118_v57 = vrot.slane %v56_v39, %v8668_v17  ;;  %v213_v63 = vld [vmem:[%s10074_s1 + $0x478] sm:$0xff]  ;;  %v219_v39 = vld [vmem:[%s10074_s1 + $0x4a8] sm:$0xff] }
 0x106   :  { %v2591_v9 = vpop.f32.mrf.mxu0  ;;  %v2661_v10 = vpop.f32.mrf.mxu1  ;;  %6053 = vmatprep.subr.mxu0 %v199_v1  ;;  %6123 = vmatprep.subr.mxu1 %v201_v2  ;;  %v1127_v1 = vcombine.high %v1125_v58, %v1125_v58  ;;  %v1128_v2 = vcombine.high %v57_v59, %v57_v59 }
 0x107   :  { %v2660_v13 = vadd.f32 %v2659_v7, %v2590_v8  ;;  %6087 = vmatprep.mubr.f32.mxu0 %v1075_v3  ;;  %6157 = vmatprep.mubr.f32.mxu1 %v1076_v4  ;;  %v1126_v0 = vcombine.high %v1118_v57, %v1118_v57  ;;  %v210_v8 = vld [vmem:[%s10074_s1 + $0x460] sm:$0xff]  ;;  %v212_v9 = vld [vmem:[%s10074_s1 + $0x470] sm:$0xff] }
 0x109   :  { %6054 = vmatpush1.xpose.msra.mxu0 %v198_v11  ;;  %6124 = vmatpush1.xpose.msra.mxu1 %v200_v12  ;;  %v410_v11 = vld [vmem:[%s10074_s1 + $0xaa0] sm:$0xff]  ;;  %v412_v12 = vld [vmem:[%s10074_s1 + $0xab0] sm:$0xff] }
 0x10a   :  { %6191 = vmatprep.subr.mxu0 %v398_v14  ;;  %6261 = vmatprep.subr.mxu1 %v400_v15  ;;  %v1142_v14 = vrot.slane %v1128_v2, %v8668_v17  ;;  %v58_v15 = vld [vmem:[%s10073_s0 + $0x128] sm:$0xff] }
 0x10c   :  { %v2729_v27 = vpop.f32.mrf.mxu0  ;;  %6088 = vmatmul.mubr.f32.vlgmr.msra.gmra.mxu0 %v1067_v60  ;;  %v2799_v28 = vpop.f32.mrf.mxu1  ;;  %6158 = vmatmul.mubr.f32.vlgmr.msra.gmra.mxu1 %v1074_v61  ;;  %v405_v60 = vld [vmem:[%s10074_s1 + $0xa78] sm:$0xff]  ;;  %v407_v61 = vld [vmem:[%s10074_s1 + $0xa88] sm:$0xff] }
 0x10d   :  { %v2730_v29 = vadd.f32 %v2729_v27, %v2660_v13  ;;  %6192 = vmatpush1.xpose.msra.mxu0 %v397_v20  ;;  %6262 = vmatpush1.xpose.msra.mxu1 %v399_v21  ;;  %v1135_v13 = vrot.slane %v57_v59, %v8668_v17  ;;  %v217_v20 = vld [vmem:[%s10074_s1 + $0x498] sm:$0xff]  ;;  %v223_v59 = vld [vmem:[%s10074_s1 + $0x4c8] sm:$0xff] }
 0x10e   :  { %v2731_v30 = vpop.f32.mrf.mxu0  ;;  %v2801_v31 = vpop.f32.mrf.mxu1  ;;  %6193 = vmatprep.subr.mxu0 %v203_v22  ;;  %6263 = vmatprep.subr.mxu1 %v205_v23  ;;  %v1144_v22 = vcombine.high %v1142_v14, %v1142_v14  ;;  %v1145_v23 = vcombine.high %v58_v15, %v58_v15 }
 0x10f   :  { %v2800_v34 = vadd.f32 %v2799_v28, %v2730_v29  ;;  %6227 = vmatprep.mubr.f32.mxu0 %v1092_v24  ;;  %6297 = vmatprep.mubr.f32.mxu1 %v1093_v25  ;;  %v1143_v21 = vcombine.high %v1135_v13, %v1135_v13  ;;  %v214_v29 = vld [vmem:[%s10074_s1 + $0x480] sm:$0xff]  ;;  %v216_v30 = vld [vmem:[%s10074_s1 + $0x490] sm:$0xff] }
 0x111   :  { %6194 = vmatpush1.xpose.msra.mxu0 %v202_v32  ;;  %6264 = vmatpush1.xpose.msra.mxu1 %v204_v33  ;;  %v414_v32 = vld [vmem:[%s10074_s1 + $0xac0] sm:$0xff]  ;;  %v416_v33 = vld [vmem:[%s10074_s1 + $0xad0] sm:$0xff] }
 0x112   :  { %6331 = vmatprep.subr.mxu0 %v402_v35  ;;  %6401 = vmatprep.subr.mxu1 %v404_v36  ;;  %v1159_v35 = vrot.slane %v1145_v23, %v8668_v17  ;;  %v59_v36 = vld [vmem:[%s10073_s0 + $0x130] sm:$0xff] }
 0x114   :  { %v2869_v47 = vpop.f32.mrf.mxu0  ;;  %6228 = vmatmul.mubr.f32.vlgmr.msra.gmra.mxu0 %v1084_v16  ;;  %v2939_v48 = vpop.f32.mrf.mxu1  ;;  %6298 = vmatmul.mubr.f32.vlgmr.msra.gmra.mxu1 %v1091_v18  ;;  %v409_v16 = vld [vmem:[%s10074_s1 + $0xa98] sm:$0xff]  ;;  %v411_v18 = vld [vmem:[%s10074_s1 + $0xaa8] sm:$0xff] }
 0x115   :  { %v2870_v49 = vadd.f32 %v2869_v47, %v2800_v34  ;;  %6332 = vmatpush1.xpose.msra.mxu0 %v401_v40  ;;  %6402 = vmatpush1.xpose.msra.mxu1 %v403_v41  ;;  %v1152_v34 = vrot.slane %v58_v15, %v8668_v17  ;;  %v221_v40 = vld [vmem:[%s10074_s1 + $0x4b8] sm:$0xff]  ;;  %v227_v15 = vld [vmem:[%s10074_s1 + $0x4e8] sm:$0xff] }
 0x116   :  { %v2871_v50 = vpop.f32.mrf.mxu0  ;;  %v2941_v51 = vpop.f32.mrf.mxu1  ;;  %6333 = vmatprep.subr.mxu0 %v207_v42  ;;  %6403 = vmatprep.subr.mxu1 %v209_v43  ;;  %v1161_v42 = vcombine.high %v1159_v35, %v1159_v35  ;;  %v1162_v43 = vcombine.high %v59_v36, %v59_v36 }
 0x117   :  { %v2940_v54 = vadd.f32 %v2939_v48, %v2870_v49  ;;  %6367 = vmatprep.mubr.f32.mxu0 %v1109_v44  ;;  %6437 = vmatprep.mubr.f32.mxu1 %v1110_v45  ;;  %v1160_v41 = vcombine.high %v1152_v34, %v1152_v34  ;;  %v218_v49 = vld [vmem:[%s10074_s1 + $0x4a0] sm:$0xff]  ;;  %v220_v50 = vld [vmem:[%s10074_s1 + $0x4b0] sm:$0xff] }
 0x119   :  { %6334 = vmatpush1.xpose.msra.mxu0 %v206_v52  ;;  %6404 = vmatpush1.xpose.msra.mxu1 %v208_v53  ;;  %v418_v52 = vld [vmem:[%s10074_s1 + $0xae0] sm:$0xff]  ;;  %v420_v53 = vld [vmem:[%s10074_s1 + $0xaf0] sm:$0xff] }
 0x11a   :  { %6471 = vmatprep.subr.mxu0 %v406_v55  ;;  %6541 = vmatprep.subr.mxu1 %v408_v56  ;;  %v1176_v55 = vrot.slane %v1162_v43, %v8668_v17  ;;  %v60_v56 = vld [vmem:[%s10073_s0 + $0x138] sm:$0xff] }
 0x11c   :  { %v3009_v3 = vpop.f32.mrf.mxu0  ;;  %6368 = vmatmul.mubr.f32.vlgmr.msra.gmra.mxu0 %v1101_v37  ;;  %v3079_v4 = vpop.f32.mrf.mxu1  ;;  %6438 = vmatmul.mubr.f32.vlgmr.msra.gmra.mxu1 %v1108_v38  ;;  %v413_v37 = vld [vmem:[%s10074_s1 + $0xab8] sm:$0xff]  ;;  %v415_v38 = vld [vmem:[%s10074_s1 + $0xac8] sm:$0xff] }
 0x11d   :  { %v3010_v5 = vadd.f32 %v3009_v3, %v2940_v54  ;;  %6472 = vmatpush1.xpose.msra.mxu0 %v405_v60  ;;  %6542 = vmatpush1.xpose.msra.mxu1 %v407_v61  ;;  %v1169_v54 = vrot.slane %v59_v36, %v8668_v17  ;;  %v225_v60 = vld [vmem:[%s10074_s1 + $0x4d8] sm:$0xff]  ;;  %v231_v36 = vld [vmem:[%s10074_s1 + $0x508] sm:$0xff] }
 0x11e   :  { %v3011_v6 = vpop.f32.mrf.mxu0  ;;  %v3081_v7 = vpop.f32.mrf.mxu1  ;;  %6473 = vmatprep.subr.mxu0 %v211_v62  ;;  %6543 = vmatprep.subr.mxu1 %v213_v63  ;;  %v1178_v62 = vcombine.high %v1176_v55, %v1176_v55  ;;  %v1179_v63 = vcombine.high %v60_v56, %v60_v56 }
 0x11f   :  { %v3080_v10 = vadd.f32 %v3079_v4, %v3010_v5  ;;  %6507 = vmatprep.mubr.f32.mxu0 %v1126_v0  ;;  %6577 = vmatprep.mubr.f32.mxu1 %v1127_v1  ;;  %v1177_v61 = vcombine.high %v1169_v54, %v1169_v54  ;;  %v222_v5 = vld [vmem:[%s10074_s1 + $0x4c0] sm:$0xff]  ;;  %v224_v6 = vld [vmem:[%s10074_s1 + $0x4d0] sm:$0xff] }
 0x121   :  { %6474 = vmatpush1.xpose.msra.mxu0 %v210_v8  ;;  %6544 = vmatpush1.xpose.msra.mxu1 %v212_v9  ;;  %v422_v8 = vld [vmem:[%s10074_s1 + $0xb00] sm:$0xff]  ;;  %v424_v9 = vld [vmem:[%s10074_s1 + $0xb10] sm:$0xff] }
 0x122   :  { %6611 = vmatprep.subr.mxu0 %v410_v11  ;;  %6681 = vmatprep.subr.mxu1 %v412_v12  ;;  %v1193_v11 = vrot.slane %v1179_v63, %v8668_v17  ;;  %v61_v12 = vld [vmem:[%s10073_s0 + $0x140] sm:$0xff] }
 0x124   :  { %v3149_v24 = vpop.f32.mrf.mxu0  ;;  %6508 = vmatmul.mubr.f32.vlgmr.msra.gmra.mxu0 %v1118_v57  ;;  %v3219_v25 = vpop.f32.mrf.mxu1  ;;  %6578 = vmatmul.mubr.f32.vlgmr.msra.gmra.mxu1 %v1125_v58  ;;  %v417_v57 = vld [vmem:[%s10074_s1 + $0xad8] sm:$0xff]  ;;  %v419_v58 = vld [vmem:[%s10074_s1 + $0xae8] sm:$0xff] }
 0x125   :  { %v3150_v26 = vadd.f32 %v3149_v24, %v3080_v10  ;;  %6612 = vmatpush1.xpose.msra.mxu0 %v409_v16  ;;  %6682 = vmatpush1.xpose.msra.mxu1 %v411_v18  ;;  %v1186_v10 = vrot.slane %v60_v56, %v8668_v17  ;;  %v229_v16 = vld [vmem:[%s10074_s1 + $0x4f8] sm:$0xff]  ;;  %v235_v56 = vld [vmem:[%s10074_s1 + $0x528] sm:$0xff] }
 0x126   :  { %v3151_v27 = vpop.f32.mrf.mxu0  ;;  %v3221_v28 = vpop.f32.mrf.mxu1  ;;  %6613 = vmatprep.subr.mxu0 %v215_v19  ;;  %6683 = vmatprep.subr.mxu1 %v217_v20  ;;  %v1195_v19 = vcombine.high %v1193_v11, %v1193_v11  ;;  %v1196_v20 = vcombine.high %v61_v12, %v61_v12 }
 0x127   :  { %v3220_v31 = vadd.f32 %v3219_v25, %v3150_v26  ;;  %6647 = vmatprep.mubr.f32.mxu0 %v1143_v21  ;;  %6717 = vmatprep.mubr.f32.mxu1 %v1144_v22  ;;  %v1194_v18 = vcombine.high %v1186_v10, %v1186_v10  ;;  %v226_v26 = vld [vmem:[%s10074_s1 + $0x4e0] sm:$0xff]  ;;  %v228_v27 = vld [vmem:[%s10074_s1 + $0x4f0] sm:$0xff] }
 0x129   :  { %6614 = vmatpush1.xpose.msra.mxu0 %v214_v29  ;;  %6684 = vmatpush1.xpose.msra.mxu1 %v216_v30  ;;  %v426_v29 = vld [vmem:[%s10074_s1 + $0xb20] sm:$0xff]  ;;  %v428_v30 = vld [vmem:[%s10074_s1 + $0xb30] sm:$0xff] }
 0x12a   :  { %6751 = vmatprep.subr.mxu0 %v414_v32  ;;  %6821 = vmatprep.subr.mxu1 %v416_v33  ;;  %v1210_v32 = vrot.slane %v1196_v20, %v8668_v17  ;;  %v62_v33 = vld [vmem:[%s10073_s0 + $0x148] sm:$0xff] }
 0x12c   :  { %v3289_v44 = vpop.f32.mrf.mxu0  ;;  %6648 = vmatmul.mubr.f32.vlgmr.msra.gmra.mxu0 %v1135_v13  ;;  %v3359_v45 = vpop.f32.mrf.mxu1  ;;  %6718 = vmatmul.mubr.f32.vlgmr.msra.gmra.mxu1 %v1142_v14  ;;  %v421_v13 = vld [vmem:[%s10074_s1 + $0xaf8] sm:$0xff]  ;;  %v423_v14 = vld [vmem:[%s10074_s1 + $0xb08] sm:$0xff] }
 0x12d   :  { %v3290_v46 = vadd.f32 %v3289_v44, %v3220_v31  ;;  %6752 = vmatpush1.xpose.msra.mxu0 %v413_v37  ;;  %6822 = vmatpush1.xpose.msra.mxu1 %v415_v38  ;;  %v1203_v31 = vrot.slane %v61_v12, %v8668_v17  ;;  %v233_v37 = vld [vmem:[%s10074_s1 + $0x518] sm:$0xff]  ;;  %v239_v12 = vld [vmem:[%s10074_s1 + $0x548] sm:$0xff] }
 0x12e   :  { %v3291_v47 = vpop.f32.mrf.mxu0  ;;  %v3361_v48 = vpop.f32.mrf.mxu1  ;;  %6753 = vmatprep.subr.mxu0 %v219_v39  ;;  %6823 = vmatprep.subr.mxu1 %v221_v40  ;;  %v1212_v39 = vcombine.high %v1210_v32, %v1210_v32  ;;  %v1213_v40 = vcombine.high %v62_v33, %v62_v33 }
 0x12f   :  { %v3360_v51 = vadd.f32 %v3359_v45, %v3290_v46  ;;  %6787 = vmatprep.mubr.f32.mxu0 %v1160_v41  ;;  %6857 = vmatprep.mubr.f32.mxu1 %v1161_v42  ;;  %v1211_v38 = vcombine.high %v1203_v31, %v1203_v31  ;;  %v230_v46 = vld [vmem:[%s10074_s1 + $0x500] sm:$0xff]  ;;  %v232_v47 = vld [vmem:[%s10074_s1 + $0x510] sm:$0xff] }
 0x131   :  { %6754 = vmatpush1.xpose.msra.mxu0 %v218_v49  ;;  %6824 = vmatpush1.xpose.msra.mxu1 %v220_v50  ;;  %v430_v49 = vld [vmem:[%s10074_s1 + $0xb40] sm:$0xff]  ;;  %v432_v50 = vld [vmem:[%s10074_s1 + $0xb50] sm:$0xff] }
 0x132   :  { %6891 = vmatprep.subr.mxu0 %v418_v52  ;;  %6961 = vmatprep.subr.mxu1 %v420_v53  ;;  %v1227_v52 = vrot.slane %v1213_v40, %v8668_v17  ;;  %v63_v53 = vld [vmem:[%s10073_s0 + $0x150] sm:$0xff] }
 0x134   :  { %v3429_v0 = vpop.f32.mrf.mxu0  ;;  %6788 = vmatmul.mubr.f32.vlgmr.msra.gmra.mxu0 %v1152_v34  ;;  %v3499_v1 = vpop.f32.mrf.mxu1  ;;  %6858 = vmatmul.mubr.f32.vlgmr.msra.gmra.mxu1 %v1159_v35  ;;  %v425_v34 = vld [vmem:[%s10074_s1 + $0xb18] sm:$0xff]  ;;  %v427_v35 = vld [vmem:[%s10074_s1 + $0xb28] sm:$0xff] }
 0x135   :  { %v3430_v2 = vadd.f32 %v3429_v0, %v3360_v51  ;;  %6892 = vmatpush1.xpose.msra.mxu0 %v417_v57  ;;  %6962 = vmatpush1.xpose.msra.mxu1 %v419_v58  ;;  %v1220_v51 = vrot.slane %v62_v33, %v8668_v17  ;;  %v237_v57 = vld [vmem:[%s10074_s1 + $0x538] sm:$0xff]  ;;  %v243_v33 = vld [vmem:[%s10074_s1 + $0x568] sm:$0xff] }
 0x136   :  { %v3431_v3 = vpop.f32.mrf.mxu0  ;;  %v3501_v4 = vpop.f32.mrf.mxu1  ;;  %6893 = vmatprep.subr.mxu0 %v223_v59  ;;  %6963 = vmatprep.subr.mxu1 %v225_v60  ;;  %v1229_v59 = vcombine.high %v1227_v52, %v1227_v52  ;;  %v1230_v60 = vcombine.high %v63_v53, %v63_v53 }
 0x137   :  { %v3500_v7 = vadd.f32 %v3499_v1, %v3430_v2  ;;  %6927 = vmatprep.mubr.f32.mxu0 %v1177_v61  ;;  %6997 = vmatprep.mubr.f32.mxu1 %v1178_v62  ;;  %v1228_v58 = vcombine.high %v1220_v51, %v1220_v51  ;;  %v234_v2 = vld [vmem:[%s10074_s1 + $0x520] sm:$0xff]  ;;  %v236_v3 = vld [vmem:[%s10074_s1 + $0x530] sm:$0xff] }
 0x139   :  { %6894 = vmatpush1.xpose.msra.mxu0 %v222_v5  ;;  %6964 = vmatpush1.xpose.msra.mxu1 %v224_v6  ;;  %v434_v5 = vld [vmem:[%s10074_s1 + $0xb60] sm:$0xff]  ;;  %v436_v6 = vld [vmem:[%s10074_s1 + $0xb70] sm:$0xff] }
 0x13a   :  { %7031 = vmatprep.subr.mxu0 %v422_v8  ;;  %7101 = vmatprep.subr.mxu1 %v424_v9  ;;  %v1244_v8 = vrot.slane %v1230_v60, %v8668_v17  ;;  %v64_v9 = vld [vmem:[%s10073_s0 + $0x158] sm:$0xff] }
 0x13c   :  { %v3569_v21 = vpop.f32.mrf.mxu0  ;;  %6928 = vmatmul.mubr.f32.vlgmr.msra.gmra.mxu0 %v1169_v54  ;;  %v3639_v22 = vpop.f32.mrf.mxu1  ;;  %6998 = vmatmul.mubr.f32.vlgmr.msra.gmra.mxu1 %v1176_v55  ;;  %v429_v54 = vld [vmem:[%s10074_s1 + $0xb38] sm:$0xff]  ;;  %v431_v55 = vld [vmem:[%s10074_s1 + $0xb48] sm:$0xff] }
 0x13d   :  { %v3570_v23 = vadd.f32 %v3569_v21, %v3500_v7  ;;  %7032 = vmatpush1.xpose.msra.mxu0 %v421_v13  ;;  %7102 = vmatpush1.xpose.msra.mxu1 %v423_v14  ;;  %v1237_v7 = vrot.slane %v63_v53, %v8668_v17  ;;  %v241_v13 = vld [vmem:[%s10074_s1 + $0x558] sm:$0xff]  ;;  %v247_v53 = vld [vmem:[%s10074_s1 + $0x588] sm:$0xff] }
 0x13e   :  { %v3571_v24 = vpop.f32.mrf.mxu0  ;;  %v3641_v25 = vpop.f32.mrf.mxu1  ;;  %7033 = vmatprep.subr.mxu0 %v227_v15  ;;  %7103 = vmatprep.subr.mxu1 %v229_v16  ;;  %v1246_v15 = vcombine.high %v1244_v8, %v1244_v8  ;;  %v1247_v16 = vcombine.high %v64_v9, %v64_v9 }
 0x13f   :  { %v3640_v28 = vadd.f32 %v3639_v22, %v3570_v23  ;;  %7067 = vmatprep.mubr.f32.mxu0 %v1194_v18  ;;  %7137 = vmatprep.mubr.f32.mxu1 %v1195_v19  ;;  %v1245_v14 = vcombine.high %v1237_v7, %v1237_v7  ;;  %v238_v23 = vld [vmem:[%s10074_s1 + $0x540] sm:$0xff]  ;;  %v240_v24 = vld [vmem:[%s10074_s1 + $0x550] sm:$0xff] }
 0x141   :  { %7034 = vmatpush1.xpose.msra.mxu0 %v226_v26  ;;  %7104 = vmatpush1.xpose.msra.mxu1 %v228_v27  ;;  %v438_v26 = vld [vmem:[%s10074_s1 + $0xb80] sm:$0xff]  ;;  %v440_v27 = vld [vmem:[%s10074_s1 + $0xb90] sm:$0xff] }
 0x142   :  { %7171 = vmatprep.subr.mxu0 %v426_v29  ;;  %7241 = vmatprep.subr.mxu1 %v428_v30  ;;  %v1261_v29 = vrot.slane %v1247_v16, %v8668_v17  ;;  %v65_v30 = vld [vmem:[%s10073_s0 + $0x160] sm:$0xff] }
 0x144   :  { %v3709_v41 = vpop.f32.mrf.mxu0  ;;  %7068 = vmatmul.mubr.f32.vlgmr.msra.gmra.mxu0 %v1186_v10  ;;  %v3779_v42 = vpop.f32.mrf.mxu1  ;;  %7138 = vmatmul.mubr.f32.vlgmr.msra.gmra.mxu1 %v1193_v11  ;;  %v433_v10 = vld [vmem:[%s10074_s1 + $0xb58] sm:$0xff]  ;;  %v435_v11 = vld [vmem:[%s10074_s1 + $0xb68] sm:$0xff] }
 0x145   :  { %v3710_v43 = vadd.f32 %v3709_v41, %v3640_v28  ;;  %7172 = vmatpush1.xpose.msra.mxu0 %v425_v34  ;;  %7242 = vmatpush1.xpose.msra.mxu1 %v427_v35  ;;  %v1254_v28 = vrot.slane %v64_v9, %v8668_v17  ;;  %v245_v34 = vld [vmem:[%s10074_s1 + $0x578] sm:$0xff]  ;;  %v251_v9 = vld [vmem:[%s10074_s1 + $0x5a8] sm:$0xff] }
 0x146   :  { %v3711_v44 = vpop.f32.mrf.mxu0  ;;  %v3781_v45 = vpop.f32.mrf.mxu1  ;;  %7173 = vmatprep.subr.mxu0 %v231_v36  ;;  %7243 = vmatprep.subr.mxu1 %v233_v37  ;;  %v1263_v36 = vcombine.high %v1261_v29, %v1261_v29  ;;  %v1264_v37 = vcombine.high %v65_v30, %v65_v30 }
 0x147   :  { %v3780_v48 = vadd.f32 %v3779_v42, %v3710_v43  ;;  %7207 = vmatprep.mubr.f32.mxu0 %v1211_v38  ;;  %7277 = vmatprep.mubr.f32.mxu1 %v1212_v39  ;;  %v1262_v35 = vcombine.high %v1254_v28, %v1254_v28  ;;  %v242_v43 = vld [vmem:[%s10074_s1 + $0x560] sm:$0xff]  ;;  %v244_v44 = vld [vmem:[%s10074_s1 + $0x570] sm:$0xff] }
 0x149   :  { %7174 = vmatpush1.xpose.msra.mxu0 %v230_v46  ;;  %7244 = vmatpush1.xpose.msra.mxu1 %v232_v47  ;;  %v442_v46 = vld [vmem:[%s10074_s1 + $0xba0] sm:$0xff]  ;;  %v444_v47 = vld [vmem:[%s10074_s1 + $0xbb0] sm:$0xff] }
 0x14a   :  { %7311 = vmatprep.subr.mxu0 %v430_v49  ;;  %7381 = vmatprep.subr.mxu1 %v432_v50  ;;  %v1278_v49 = vrot.slane %v1264_v37, %v8668_v17  ;;  %v66_v50 = vld [vmem:[%s10073_s0 + $0x168] sm:$0xff] }
 0x14c   :  { %v3849_v61 = vpop.f32.mrf.mxu0  ;;  %7208 = vmatmul.mubr.f32.vlgmr.msra.gmra.mxu0 %v1203_v31  ;;  %v3919_v62 = vpop.f32.mrf.mxu1  ;;  %7278 = vmatmul.mubr.f32.vlgmr.msra.gmra.mxu1 %v1210_v32  ;;  %v437_v31 = vld [vmem:[%s10074_s1 + $0xb78] sm:$0xff]  ;;  %v439_v32 = vld [vmem:[%s10074_s1 + $0xb88] sm:$0xff] }
 0x14d   :  { %v3850_v63 = vadd.f32 %v3849_v61, %v3780_v48  ;;  %7312 = vmatpush1.xpose.msra.mxu0 %v429_v54  ;;  %7382 = vmatpush1.xpose.msra.mxu1 %v431_v55  ;;  %v1271_v48 = vrot.slane %v65_v30, %v8668_v17  ;;  %v249_v54 = vld [vmem:[%s10074_s1 + $0x598] sm:$0xff]  ;;  %v255_v30 = vld [vmem:[%s10074_s1 + $0x5c8] sm:$0xff] }
 0x14e   :  { %v3851_v0 = vpop.f32.mrf.mxu0  ;;  %v3921_v1 = vpop.f32.mrf.mxu1  ;;  %7313 = vmatprep.subr.mxu0 %v235_v56  ;;  %7383 = vmatprep.subr.mxu1 %v237_v57  ;;  %v1280_v56 = vcombine.high %v1278_v49, %v1278_v49  ;;  %v1281_v57 = vcombine.high %v66_v50, %v66_v50 }
 0x14f   :  { %v3920_v4 = vadd.f32 %v3919_v62, %v3850_v63  ;;  %7347 = vmatprep.mubr.f32.mxu0 %v1228_v58  ;;  %7417 = vmatprep.mubr.f32.mxu1 %v1229_v59  ;;  %v1279_v55 = vcombine.high %v1271_v48, %v1271_v48  ;;  %v246_v63 = vld [vmem:[%s10074_s1 + $0x580] sm:$0xff]  ;;  %v248_v0 = vld [vmem:[%s10074_s1 + $0x590] sm:$0xff] }
 0x151   :  { %7314 = vmatpush1.xpose.msra.mxu0 %v234_v2  ;;  %7384 = vmatpush1.xpose.msra.mxu1 %v236_v3  ;;  %v446_v2 = vld [vmem:[%s10074_s1 + $0xbc0] sm:$0xff]  ;;  %v448_v3 = vld [vmem:[%s10074_s1 + $0xbd0] sm:$0xff] }
 0x152   :  { %7451 = vmatprep.subr.mxu0 %v434_v5  ;;  %7521 = vmatprep.subr.mxu1 %v436_v6  ;;  %v1295_v5 = vrot.slane %v1281_v57, %v8668_v17  ;;  %v67_v6 = vld [vmem:[%s10073_s0 + $0x170] sm:$0xff] }
 0x154   :  { %v3989_v18 = vpop.f32.mrf.mxu0  ;;  %7348 = vmatmul.mubr.f32.vlgmr.msra.gmra.mxu0 %v1220_v51  ;;  %v4059_v19 = vpop.f32.mrf.mxu1  ;;  %7418 = vmatmul.mubr.f32.vlgmr.msra.gmra.mxu1 %v1227_v52  ;;  %v441_v51 = vld [vmem:[%s10074_s1 + $0xb98] sm:$0xff]  ;;  %v443_v52 = vld [vmem:[%s10074_s1 + $0xba8] sm:$0xff] }
 0x155   :  { %v3990_v20 = vadd.f32 %v3989_v18, %v3920_v4  ;;  %7452 = vmatpush1.xpose.msra.mxu0 %v433_v10  ;;  %7522 = vmatpush1.xpose.msra.mxu1 %v435_v11  ;;  %v1288_v4 = vrot.slane %v66_v50, %v8668_v17  ;;  %v253_v10 = vld [vmem:[%s10074_s1 + $0x5b8] sm:$0xff] }
 0x156   :  { %v3991_v21 = vpop.f32.mrf.mxu0  ;;  %v4061_v22 = vpop.f32.mrf.mxu1  ;;  %7453 = vmatprep.subr.mxu0 %v239_v12  ;;  %7523 = vmatprep.subr.mxu1 %v241_v13  ;;  %v1297_v12 = vcombine.high %v1295_v5, %v1295_v5  ;;  %v1298_v13 = vcombine.high %v67_v6, %v67_v6  ;;  %v261_v50 = vld [vmem:[%s10074_s1 + $0x5f8] sm:$0xff] }
 0x157   :  { %v4060_v25 = vadd.f32 %v4059_v19, %v3990_v20  ;;  %7487 = vmatprep.mubr.f32.mxu0 %v1245_v14  ;;  %7557 = vmatprep.mubr.f32.mxu1 %v1246_v15  ;;  %v1296_v11 = vcombine.high %v1288_v4, %v1288_v4  ;;  %v250_v20 = vld [vmem:[%s10074_s1 + $0x5a0] sm:$0xff]  ;;  %v252_v21 = vld [vmem:[%s10074_s1 + $0x5b0] sm:$0xff] }
 0x159   :  { %7454 = vmatpush1.xpose.msra.mxu0 %v238_v23  ;;  %7524 = vmatpush1.xpose.msra.mxu1 %v240_v24  ;;  %v450_v23 = vld [vmem:[%s10074_s1 + $0xbe0] sm:$0xff]  ;;  %v452_v24 = vld [vmem:[%s10074_s1 + $0xbf0] sm:$0xff] }
 0x15a   :  { %7591 = vmatprep.subr.mxu0 %v438_v26  ;;  %7661 = vmatprep.subr.mxu1 %v440_v27  ;;  %v1312_v26 = vrot.slane %v1298_v13, %v8668_v17  ;;  %v68_v27 = vld [vmem:[%s10073_s0 + $0x178] sm:$0xff] }
 0x15c   :  { %v4129_v38 = vpop.f32.mrf.mxu0  ;;  %7488 = vmatmul.mubr.f32.vlgmr.msra.gmra.mxu0 %v1237_v7  ;;  %v4199_v39 = vpop.f32.mrf.mxu1  ;;  %7558 = vmatmul.mubr.f32.vlgmr.msra.gmra.mxu1 %v1244_v8  ;;  %v445_v7 = vld [vmem:[%s10074_s1 + $0xbb8] sm:$0xff]  ;;  %v447_v8 = vld [vmem:[%s10074_s1 + $0xbc8] sm:$0xff] }
 0x15d   :  { %v4130_v40 = vadd.f32 %v4129_v38, %v4060_v25  ;;  %7592 = vmatpush1.xpose.msra.mxu0 %v437_v31  ;;  %7662 = vmatpush1.xpose.msra.mxu1 %v439_v32  ;;  %v1305_v25 = vrot.slane %v67_v6, %v8668_v17  ;;  %v257_v31 = vld [vmem:[%s10074_s1 + $0x5d8] sm:$0xff] }
 0x15e   :  { %v4131_v41 = vpop.f32.mrf.mxu0  ;;  %v4201_v42 = vpop.f32.mrf.mxu1  ;;  %7593 = vmatprep.subr.mxu0 %v243_v33  ;;  %7663 = vmatprep.subr.mxu1 %v245_v34  ;;  %v1314_v33 = vcombine.high %v1312_v26, %v1312_v26  ;;  %v1315_v34 = vcombine.high %v68_v27, %v68_v27 }
 0x15f   :  { %v4200_v45 = vadd.f32 %v4199_v39, %v4130_v40  ;;  %7627 = vmatprep.mubr.f32.mxu0 %v1262_v35  ;;  %7697 = vmatprep.mubr.f32.mxu1 %v1263_v36  ;;  %v1313_v32 = vcombine.high %v1305_v25, %v1305_v25  ;;  %v254_v40 = vld [vmem:[%s10074_s1 + $0x5c0] sm:$0xff]  ;;  %v256_v41 = vld [vmem:[%s10074_s1 + $0x5d0] sm:$0xff] }
 0x161   :  { %7594 = vmatpush1.xpose.msra.mxu0 %v242_v43  ;;  %7664 = vmatpush1.xpose.msra.mxu1 %v244_v44  ;;  %v454_v43 = vld [vmem:[%s10074_s1 + $0xc00] sm:$0xff]  ;;  %v456_v44 = vld [vmem:[%s10074_s1 + $0xc10] sm:$0xff] }
 0x162   :  { %7731 = vmatprep.subr.mxu0 %v442_v46  ;;  %7801 = vmatprep.subr.mxu1 %v444_v47  ;;  %v1329_v46 = vrot.slane %v1315_v34, %v8668_v17  ;;  %v453_v47 = vld [vmem:[%s10074_s1 + $0xbf8] sm:$0xff] }
 0x164   :  { %v4269_v58 = vpop.f32.mrf.mxu0  ;;  %7628 = vmatmul.mubr.f32.vlgmr.msra.gmra.mxu0 %v1254_v28  ;;  %v4339_v59 = vpop.f32.mrf.mxu1  ;;  %7698 = vmatmul.mubr.f32.vlgmr.msra.gmra.mxu1 %v1261_v29  ;;  %v449_v28 = vld [vmem:[%s10074_s1 + $0xbd8] sm:$0xff]  ;;  %v451_v29 = vld [vmem:[%s10074_s1 + $0xbe8] sm:$0xff] }
 0x165   :  { %v4270_v60 = vadd.f32 %v4269_v58, %v4200_v45  ;;  %7732 = vmatpush1.xpose.msra.mxu0 %v441_v51  ;;  %7802 = vmatpush1.xpose.msra.mxu1 %v443_v52  ;;  %v1322_v45 = vrot.slane %v68_v27, %v8668_v17  ;;  %v1331_v52 = vcombine.high %v1329_v46, %v1329_v46 }
 0x166   :  { %v4271_v61 = vpop.f32.mrf.mxu0  ;;  %v4341_v62 = vpop.f32.mrf.mxu1  ;;  %7733 = vmatprep.subr.mxu0 %v247_v53  ;;  %7803 = vmatprep.subr.mxu1 %v249_v54 }
 0x167   :  { %v4340_v1 = vadd.f32 %v4339_v59, %v4270_v60  ;;  %7767 = vmatprep.mubr.f32.mxu0 %v1279_v55  ;;  %7837 = vmatprep.mubr.f32.mxu1 %v1280_v56  ;;  %v1330_v51 = vcombine.high %v1322_v45, %v1322_v45  ;;  %v69_v55 = vld [vmem:[%s10073_s0 + $0x180] sm:$0x3f]  ;;  %v260_v60 = vld [vmem:[%s10074_s1 + $0x5f0] sm:$0xff] }
 0x168   :  { %v258_v59 = vld [vmem:[%s10074_s1 + $0x5e0] sm:$0xff] }
 0x169   :  { %7734 = vmatpush1.xpose.msra.mxu0 %v246_v63  ;;  %7804 = vmatpush1.xpose.msra.mxu1 %v248_v0  ;;  %v458_v62 = vld [vmem:[%s10074_s1 + $0xc20] sm:$0xff]  ;;  %v1339_v63 = vrot.slane %v69_v55, %v8668_v17  ;;  %v8602_v0 = vmov 0.0  }
 0x16a   :  { %7871 = vmatprep.subr.mxu0 %v446_v2  ;;  %7941 = vmatprep.subr.mxu1 %v448_v3  ;;  %v459_v2 = vld [vmem:[%s10074_s1 + $0xc28] sm:$0xff] }
 0x16b   :  { %v263_v3 = vld [vmem:[%s10074_s1 + $0x608] sm:$0xff] }
 0x16c   :  { %v4409_v14 = vpop.f32.mrf.mxu0  ;;  %7768 = vmatmul.mubr.f32.vlgmr.msra.gmra.mxu0 %v1271_v48  ;;  %v4479_v15 = vpop.f32.mrf.mxu1  ;;  %7838 = vmatmul.mubr.f32.vlgmr.msra.gmra.mxu1 %v1278_v49  ;;  %v455_v48 = vld [vmem:[%s10074_s1 + $0xc08] sm:$0xff] }
 0x16d   :  { %v4410_v16 = vadd.f32 %v4409_v14, %v4340_v1  ;;  %7872 = vmatpush1.xpose.msra.mxu0 %v445_v7  ;;  %7942 = vmatpush1.xpose.msra.mxu1 %v447_v8  ;;  %v259_v49 = vld [vmem:[%s10074_s1 + $0x5e8] sm:$0xff]  ;;  %v457_v1 = vld [vmem:[%s10074_s1 + $0xc18] sm:$0xff]  ;;  %v1332_v7 = vcombine.high %v69_v55, %v69_v55 }
 0x16e   :  { %v4411_v18 = vpop.f32.mrf.mxu0  ;;  %v4481_v19 = vpop.f32.mrf.mxu1  ;;  %7873 = vmatprep.subr.mxu0 %v251_v9  ;;  %7943 = vmatprep.subr.mxu1 %v253_v10 }
 0x16f   :  { %v4480_v22 = vadd.f32 %v4479_v15, %v4410_v16  ;;  %7907 = vmatprep.mubr.f32.mxu0 %v1296_v11  ;;  %7977 = vmatprep.mubr.f32.mxu1 %v1297_v12  ;;  %v262_v11 = vld [vmem:[%s10074_s1 + $0x600] sm:$0xff]  ;;  %v264_v12 = vld [vmem:[%s10074_s1 + $0x610] sm:$0xff]  ;;  %v1346_v14 = vrot.slane %v1332_v7, %v8668_v17 }
 0x170   :  { %v8404_v7 = vld [vmem:[%s10076_s3] sm:$0xff] }
 0x171   :  { %7874 = vmatpush1.xpose.msra.mxu0 %v250_v20  ;;  %7944 = vmatpush1.xpose.msra.mxu1 %v252_v21 }
 0x172   :  { %8011 = vmatprep.subr.mxu0 %v450_v23  ;;  %8081 = vmatprep.subr.mxu1 %v452_v24 }
 0x174   :  { %v4549_v35 = vpop.f32.mrf.mxu0  ;;  %7908 = vmatmul.mubr.f32.vlgmr.msra.gmra.mxu0 %v1288_v4  ;;  %v4619_v36 = vpop.f32.mrf.mxu1  ;;  %7978 = vmatmul.mubr.f32.vlgmr.msra.gmra.mxu1 %v1295_v5  ;;  %v1347_v4 = vcombine.high %v1339_v63, %v1339_v63 }
 0x175   :  { %v4550_v37 = vadd.f32 %v4549_v35, %v4480_v22  ;;  %8012 = vmatpush1.xpose.msra.mxu0 %v449_v28  ;;  %8082 = vmatpush1.xpose.msra.mxu1 %v451_v29 }
 0x176   :  { %v4551_v38 = vpop.f32.mrf.mxu0  ;;  %v4621_v39 = vpop.f32.mrf.mxu1  ;;  %8013 = vmatprep.subr.mxu0 %v255_v30  ;;  %8083 = vmatprep.subr.mxu1 %v257_v31 }
 0x177   :  { %v4620_v42 = vadd.f32 %v4619_v36, %v4550_v37  ;;  %8047 = vmatprep.mubr.f32.mxu0 %v1313_v32  ;;  %8117 = vmatprep.mubr.f32.mxu1 %v1314_v33 }
 0x179   :  { %8014 = vmatpush1.xpose.msra.mxu0 %v254_v40  ;;  %8084 = vmatpush1.xpose.msra.mxu1 %v256_v41 }
 0x17a   :  { %8151 = vmatprep.subr.mxu0 %v454_v43  ;;  %8221 = vmatprep.subr.mxu1 %v456_v44 }
 0x17c   :  { %v4689_v53 = vpop.f32.mrf.mxu0  ;;  %8048 = vmatmul.mubr.f32.vlgmr.msra.gmra.mxu0 %v1305_v25  ;;  %v4759_v54 = vpop.f32.mrf.mxu1  ;;  %8118 = vmatmul.mubr.f32.vlgmr.msra.gmra.mxu1 %v1312_v26 }
 0x17d   :  { %v4690_v56 = vadd.f32 %v4689_v53, %v4620_v42  ;;  %8152 = vmatpush1.xpose.msra.mxu0 %v453_v47  ;;  %8222 = vmatpush1.xpose.msra.mxu1 %v455_v48 }
 0x17e   :  { %v4691_v57 = vpop.f32.mrf.mxu0  ;;  %v4761_v58 = vpop.f32.mrf.mxu1  ;;  %8153 = vmatprep.subr.mxu0 %v259_v49  ;;  %8223 = vmatprep.subr.mxu1 %v261_v50 }
 0x17f   :  { %v4760_v61 = vadd.f32 %v4759_v54, %v4690_v56  ;;  %8187 = vmatprep.mubr.f32.mxu0 %v1330_v51  ;;  %8257 = vmatprep.mubr.f32.mxu1 %v1331_v52 }
 0x181   :  { %8154 = vmatpush1.xpose.msra.mxu0 %v258_v59  ;;  %8224 = vmatpush1.xpose.msra.mxu1 %v260_v60 }
 0x182   :  { %8291 = vmatprep.subr.mxu0 %v458_v62  ;;  %8512 = vmatprep.subr.mxu1 %v8602_v0 }
 0x184   :  { %v4829_v5 = vpop.f32.mrf.mxu0  ;;  %8188 = vmatmul.mubr.f32.vlgmr.msra.gmra.mxu0 %v1322_v45  ;;  %v4899_v6 = vpop.f32.mrf.mxu1  ;;  %8258 = vmatmul.mubr.f32.vlgmr.msra.gmra.mxu1 %v1329_v46 }
 0x185   :  { %v4830_v8 = vadd.f32 %v4829_v5, %v4760_v61  ;;  %8292 = vmatpush1.xpose.msra.mxu0 %v457_v1  ;;  %8513 = vmatpush3.xpose.msra.mxu1 %v459_v2 }
 0x186   :  { %v4831_v9 = vpop.f32.mrf.mxu0  ;;  %v4901_v10 = vpop.f32.mrf.mxu1  ;;  %8293 = vmatprep.subr.mxu0 %v263_v3  ;;  %8514 = vmatprep.subr.mxu1 %v8602_v0 }
 0x187   :  { %v4900_v13 = vadd.f32 %v4899_v6, %v4830_v8  ;;  %8327 = vmatprep.mubr.f32.mxu0 %v1347_v4  ;;  %8516 = vmatprep.mubr.msk.f32.mxu1 %vm8603_vm0, %v8602_v0  ;;  %v8405_v6 = vld [vmem:[%s10076_s3 + $0x8] sm:$0xff] }
 0x189   :  { %8294 = vmatpush1.xpose.msra.mxu0 %v262_v11  ;;  %8515 = vmatpush3.xpose.msra.mxu1 %v264_v12 }
 0x18a   :  { %8519 = vmatprep.subr.mxu0 %v8602_v0 }
 0x18c   :  { %v4969_v15 = vpop.f32.mrf.mxu0  ;;  %8328 = vmatmul.mubr.f32.vlgmr.msra.gmra.mxu0 %v1339_v63  ;;  %8517 = vmatmul.mubr.f32.vlgmr.msra.gmra.mxu1 %v1346_v14  ;;  %v5039_v16 = vpop.f32.mrf.mxu1 }
 0x18d   :  { %v4970_v18 = vadd.f32 %v4969_v15, %v4900_v13  ;;  %8523 = vmatprep.mubr.msk.f32.mxu0 %vm8603_vm0, %v8602_v0  ;;  %8520 = vmatpush3.msra.mxu0 %v8405_v6 }
 0x18e   :  { %v4971_v19 = vpop.f32.mrf.mxu0  ;;  %v5041_v20 = vpop.f32.mrf.mxu1  ;;  %8521 = vmatprep.subr.mxu0 %v8602_v0 }
 0x18f   :  { %v5040_v21 = vadd.f32 %v5039_v16, %v4970_v18  ;;  %8522 = vmatpush3.msra.mxu0 %v8404_v7 }
 0x194   :  { %v5109_v22 = vpop.f32.mrf.mxu0  ;;  %v5179_v23 = vpop.f32.mrf.mxu1 }
 0x195   :  { %v5110_v24 = vadd.f32 %v5109_v22, %v5040_v21 }
 0x196   :  { %v5111_v25 = vpop.f32.mrf.mxu0  ;;  %v5181_v26 = vpop.f32.mrf.mxu1 }
 0x197   :  { %v5180_v17 = vadd.f32 %v5179_v23, %v5110_v24 }
 0x19c   :  { %v5249_v27 = vpop.f32.mrf.mxu0  ;;  %v5319_v28 = vpop.f32.mrf.mxu1 }
 0x19d   :  { %v5250_v29 = vadd.f32 %v5249_v27, %v5180_v17 }
 0x19e   :  { %v5251_v30 = vpop.f32.mrf.mxu0  ;;  %v5321_v31 = vpop.f32.mrf.mxu1 }
 0x19f   :  { %v5320_v32 = vadd.f32 %v5319_v28, %v5250_v29 }
 0x1a4   :  { %v5389_v33 = vpop.f32.mrf.mxu0  ;;  %v5459_v34 = vpop.f32.mrf.mxu1 }
 0x1a5   :  { %v5390_v35 = vadd.f32 %v5389_v33, %v5320_v32 }
 0x1a6   :  { %v5391_v36 = vpop.f32.mrf.mxu0  ;;  %v5461_v37 = vpop.f32.mrf.mxu1 }
 0x1a7   :  { %v5460_v38 = vadd.f32 %v5459_v34, %v5390_v35 }
 0x1ac   :  { %v5529_v39 = vpop.f32.mrf.mxu0  ;;  %v5599_v40 = vpop.f32.mrf.mxu1 }
 0x1ad   :  { %v5530_v41 = vadd.f32 %v5529_v39, %v5460_v38 }
 0x1ae   :  { %v5531_v42 = vpop.f32.mrf.mxu0  ;;  %v5601_v43 = vpop.f32.mrf.mxu1 }
 0x1af   :  { %v5600_v44 = vadd.f32 %v5599_v40, %v5530_v41 }
 0x1b4   :  { %v5669_v45 = vpop.f32.mrf.mxu0  ;;  %v5739_v46 = vpop.f32.mrf.mxu1 }
 0x1b5   :  { %v5670_v47 = vadd.f32 %v5669_v45, %v5600_v44 }
 0x1b6   :  { %v5671_v48 = vpop.f32.mrf.mxu0  ;;  %v5741_v49 = vpop.f32.mrf.mxu1 }
 0x1b7   :  { %v5740_v50 = vadd.f32 %v5739_v46, %v5670_v47 }
 0x1bc   :  { %v5809_v51 = vpop.f32.mrf.mxu0  ;;  %v5879_v52 = vpop.f32.mrf.mxu1 }
 0x1bd   :  { %v5810_v53 = vadd.f32 %v5809_v51, %v5740_v50 }
 0x1be   :  { %v5811_v54 = vpop.f32.mrf.mxu0  ;;  %v5881_v55 = vpop.f32.mrf.mxu1 }
 0x1bf   :  { %v5880_v56 = vadd.f32 %v5879_v52, %v5810_v53 }
 0x1c4   :  { %v5949_v57 = vpop.f32.mrf.mxu0  ;;  %v6019_v58 = vpop.f32.mrf.mxu1 }
 0x1c5   :  { %v5950_v59 = vadd.f32 %v5949_v57, %v5880_v56 }
 0x1c6   :  { %v5951_v60 = vpop.f32.mrf.mxu0  ;;  %v6021_v61 = vpop.f32.mrf.mxu1 }
 0x1c7   :  { %v6020_v62 = vadd.f32 %v6019_v58, %v5950_v59 }
 0x1cc   :  { %v6089_v63 = vpop.f32.mrf.mxu0  ;;  %v6159_v1 = vpop.f32.mrf.mxu1 }
 0x1cd   :  { %v6090_v2 = vadd.f32 %v6089_v63, %v6020_v62 }
 0x1ce   :  { %v6091_v3 = vpop.f32.mrf.mxu0  ;;  %v6161_v4 = vpop.f32.mrf.mxu1 }
 0x1cf   :  { %v6160_v5 = vadd.f32 %v6159_v1, %v6090_v2 }
 0x1d4   :  { %v6229_v8 = vpop.f32.mrf.mxu0  ;;  %v6299_v9 = vpop.f32.mrf.mxu1 }
 0x1d5   :  { %v6230_v24 = vadd.f32 %v6229_v8, %v6160_v5 }
 0x1d6   :  { %v6231_v10 = vpop.f32.mrf.mxu0  ;;  %v6301_v11 = vpop.f32.mrf.mxu1 }
 0x1d7   :  { %v6300_v28 = vadd.f32 %v6299_v9, %v6230_v24 }
 0x1dc   :  { %v6369_v12 = vpop.f32.mrf.mxu0  ;;  %v6439_v13 = vpop.f32.mrf.mxu1 }
 0x1dd   :  { %v6370_v29 = vadd.f32 %v6369_v12, %v6300_v28 }
 0x1de   :  { %v6371_v14 = vpop.f32.mrf.mxu0  ;;  %v6441_v15 = vpop.f32.mrf.mxu1 }
 0x1df   :  { %v6440_v32 = vadd.f32 %v6439_v13, %v6370_v29 }
 0x1e4   :  { %v6509_v16 = vpop.f32.mrf.mxu0  ;;  %v6579_v18 = vpop.f32.mrf.mxu1 }
 0x1e5   :  { %v6510_v35 = vadd.f32 %v6509_v16, %v6440_v32 }
 0x1e6   :  { %v6511_v19 = vpop.f32.mrf.mxu0  ;;  %v6581_v20 = vpop.f32.mrf.mxu1 }
 0x1e7   :  { %v6580_v36 = vadd.f32 %v6579_v18, %v6510_v35 }
 0x1ec   :  { %v6649_v21 = vpop.f32.mrf.mxu0  ;;  %v6719_v22 = vpop.f32.mrf.mxu1 }
 0x1ed   :  { %v6650_v39 = vadd.f32 %v6649_v21, %v6580_v36 }
 0x1ee   :  { %v6651_v0 = vpop.f32.mrf.mxu0  ;;  %v6721_v23 = vpop.f32.mrf.mxu1 }
 0x1ef   :  { %v6720_v42 = vadd.f32 %v6719_v22, %v6650_v39 }
 0x1f4   :  { %v6789_v25 = vpop.f32.mrf.mxu0  ;;  %v6859_v26 = vpop.f32.mrf.mxu1 }
 0x1f5   :  { %v6790_v43 = vadd.f32 %v6789_v25, %v6720_v42 }
 0x1f6   :  { %v6791_v17 = vpop.f32.mrf.mxu0  ;;  %v6861_v27 = vpop.f32.mrf.mxu1 }
 0x1f7   :  { %v6860_v48 = vadd.f32 %v6859_v26, %v6790_v43 }
 0x1fc   :  { %v6929_v30 = vpop.f32.mrf.mxu0  ;;  %v6999_v31 = vpop.f32.mrf.mxu1 }
 0x1fd   :  { %v6930_v49 = vadd.f32 %v6929_v30, %v6860_v48 }
 0x1fe   :  { %v6931_v33 = vpop.f32.mrf.mxu0  ;;  %v7001_v34 = vpop.f32.mrf.mxu1 }
 0x1ff   :  { %v7000_v52 = vadd.f32 %v6999_v31, %v6930_v49 }
 0x204   :  { %v7069_v37 = vpop.f32.mrf.mxu0  ;;  %v7139_v38 = vpop.f32.mrf.mxu1 }
 0x205   :  { %v7070_v55 = vadd.f32 %v7069_v37, %v7000_v52 }
 0x206   :  { %v7071_v40 = vpop.f32.mrf.mxu0  ;;  %v7141_v41 = vpop.f32.mrf.mxu1 }
 0x207   :  { %v7140_v56 = vadd.f32 %v7139_v38, %v7070_v55  ;;  %v8504_v40 = vld [vmem:[%s10077_s4] ss:$0 sm:$0xff] }
 0x20c   :  { %v7209_v44 = vpop.f32.mrf.mxu0  ;;  %v7279_v45 = vpop.f32.mrf.mxu1 }
 0x20d   :  { %v7210_v59 = vadd.f32 %v7209_v44, %v7140_v56 }
 0x20e   :  { %v7211_v46 = vpop.f32.mrf.mxu0  ;;  %v7281_v47 = vpop.f32.mrf.mxu1 }
 0x20f   :  { %v7280_v62 = vadd.f32 %v7279_v45, %v7210_v59 }
 0x214   :  { %v7349_v50 = vpop.f32.mrf.mxu0  ;;  %v7419_v51 = vpop.f32.mrf.mxu1 }
 0x215   :  { %v7350_v63 = vadd.f32 %v7349_v50, %v7280_v62 }
 0x216   :  { %v7351_v53 = vpop.f32.mrf.mxu0  ;;  %v7421_v54 = vpop.f32.mrf.mxu1 }
 0x217   :  { %v7420_v5 = vadd.f32 %v7419_v51, %v7350_v63 }
 0x21c   :  { %v7489_v57 = vpop.f32.mrf.mxu0  ;;  %v7559_v58 = vpop.f32.mrf.mxu1 }
 0x21d   :  { %v7490_v6 = vadd.f32 %v7489_v57, %v7420_v5 }
 0x21e   :  { %v7491_v60 = vpop.f32.mrf.mxu0  ;;  %v7561_v61 = vpop.f32.mrf.mxu1 }
 0x21f   :  { %v7560_v9 = vadd.f32 %v7559_v58, %v7490_v6 }
 0x224   :  { %v7629_v1 = vpop.f32.mrf.mxu0  ;;  %v7699_v2 = vpop.f32.mrf.mxu1 }
 0x225   :  { %v7630_v12 = vadd.f32 %v7629_v1, %v7560_v9 }
 0x226   :  { %v7631_v3 = vpop.f32.mrf.mxu0  ;;  %v7701_v4 = vpop.f32.mrf.mxu1 }
 0x227   :  { %v7700_v13 = vadd.f32 %v7699_v2, %v7630_v12 }
 0x22c   :  { %v7769_v7 = vpop.f32.mrf.mxu0  ;;  %v7839_v8 = vpop.f32.mrf.mxu1 }
 0x22d   :  { %v7770_v16 = vadd.f32 %v7769_v7, %v7700_v13 }
 0x22e   :  { %v7771_v10 = vpop.f32.mrf.mxu0  ;;  %v7841_v11 = vpop.f32.mrf.mxu1 }
 0x22f   :  { %v7840_v20 = vadd.f32 %v7839_v8, %v7770_v16 }
 0x234   :  { %v7909_v14 = vpop.f32.mrf.mxu0  ;;  %v7979_v15 = vpop.f32.mrf.mxu1 }
 0x235   :  { %v7910_v21 = vadd.f32 %v7909_v14, %v7840_v20 }
 0x236   :  { %v7911_v18 = vpop.f32.mrf.mxu0  ;;  %v7981_v19 = vpop.f32.mrf.mxu1 }
 0x237   :  { %v7980_v25 = vadd.f32 %v7979_v15, %v7910_v21 }
 0x23c   :  { %v8049_v22 = vpop.f32.mrf.mxu0  ;;  %v8119_v0 = vpop.f32.mrf.mxu1 }
 0x23d   :  { %v8050_v26 = vadd.f32 %v8049_v22, %v7980_v25 }
 0x23e   :  { %v8051_v23 = vpop.f32.mrf.mxu0  ;;  %v8121_v24 = vpop.f32.mrf.mxu1 }
 0x23f   :  { %v8120_v28 = vadd.f32 %v8119_v0, %v8050_v26 }
 0x244   :  { %v8189_v17 = vpop.f32.mrf.mxu0  ;;  %v8259_v27 = vpop.f32.mrf.mxu1 }
 0x245   :  { %v8190_v31 = vadd.f32 %v8189_v17, %v8120_v28 }
 0x246   :  { %v8191_v29 = vpop.f32.mrf.mxu0  ;;  %v8261_v30 = vpop.f32.mrf.mxu1 }
 0x247   :  { %v8260_v32 = vadd.f32 %v8259_v27, %v8190_v31 }
 0x24c   :  { %v8329_v33 = vpop.f32.mrf.mxu0  ;;  %v8399_v34 = vpop.f32.mrf.mxu1 }
 0x24d   :  { %v8330_v35 = vadd.f32 %v8329_v33, %v8260_v32 }
 0x24e   :  { %v8331_v36 = vpop.f32.mrf.mxu0  ;;  %v8518_v37 = vpop.f32.mrf.mxu1 }
 0x24f   :  { %v8400_v38 = vadd.f32 %v8399_v34, %v8330_v35 }
 0x251   :  { %v8403_v39 = vmax.f32 %v8400_v38, 0.0 }
 0x253   :  { %8524 = vmatmul.mubr.msk.f32.vlgmr.msra.gmra.mxu0 %vm8413_vm1, %v8403_v39 }
 0x313   :  { %v8483_v41 = vpop.f32.mrf.mxu0 }
 0x314   :  { %v8484_v42 = vadd.f32 %v8504_v40, %v8483_v41 }
 0x315   :  { %v8525_v43 = vpop.f32.mrf.mxu0 }
 0x316   :  { %8488 = vst.msk [vmem:[#allocation2] sm:$0x3] %vm8487_vm2, %v8484_v42 }
 0x317   :  { %8590 = shalt.err (!%p8587_p4)
}
 0x318   :  { %8498 = dma.vmem_to_hbm [thread:$0]  %s8496_s2, 32, %s10078_s5, [#allocation3]  }
 0x319   :  { %8599 = dma.done.wait [#allocation3], 32  }
 0x31a   :  { %8600 = vsyncadd [#allocation3], 4294967264 }
 0x31b   :  { %8502 = vsyncpa [#allocation3], 1 }

</bundles_post_ra>
